<compile_context>
chip_gen: v7x
topology: tpu7x:2x2x1
jax: 0.10.0
libtpu: 0.0.40
codegen_flags: <defaults>
</compile_context>

<pallas_src>
import functools
import math
import numpy as np
import jax
import jax.numpy as jnp
from jax.experimental import pallas as pl
from jax.experimental.pallas import tpu as pltpu

# bf16 MXU operands (f32 accumulation via preferred_element_type) and bf16
# inter-kernel activations: MXU-native on v6e/v7x and halves HBM traffic
# between the many pallas_calls.  All softmax / LayerNorm / exp elementwise
# math stays in f32 inside the kernels (v5e has no bf16 VPU/EUP path).
# Set both to jnp.float32 for bit-closer numerics.
MXU_DTYPE = jnp.bfloat16
ACT_DTYPE = jnp.bfloat16
NEG_INF = -1e30
LN_EPS = 1e-5


# -----------------------------------------------------------------------------
# Tiling helper
# -----------------------------------------------------------------------------

def _pick_tile(dim, pref, align):
    """Largest tile <= pref that is a multiple of `align` and divides `dim`;
    small dims use the full extent (full-extent blocks are always legal)."""
    if dim <= pref:
        return dim
    t = (pref // align) * align
    while t >= align:
        if dim % t == 0:
            return t
        t -= align
    # TODO(synk): pad awkward dims upstream instead of this full-extent
    # fallback (full-dim blocks can exceed v7x's 64 MiB VMEM at prod sizes).
    return dim


# -----------------------------------------------------------------------------
# Kernel 1: tiled GEMM  (x @ w + b, optional fused ReLU), bf16 MXU, f32 acc
# -----------------------------------------------------------------------------

def _matmul_kernel(x_ref, w_ref, b_ref, o_ref, acc_ref, *, activation):
    @pl.when(pl.program_id(2) == 0)
    def _():
        acc_ref[...] = jnp.zeros_like(acc_ref)

    acc_ref[...] += jnp.dot(x_ref[...].astype(MXU_DTYPE),
                            w_ref[...].astype(MXU_DTYPE),
                            preferred_element_type=jnp.float32)

    @pl.when(pl.program_id(2) == pl.num_programs(2) - 1)
    def _():
        r = acc_ref[...] + b_ref[...]
        if activation == "relu":
            r = jnp.maximum(r, 0.0)
        o_ref[...] = r.astype(o_ref.dtype)


def pallas_matmul(x, w, b, activation=None, out_dtype=ACT_DTYPE):
    """(M,K) @ (K,N) + b(1,N), tiled with a VMEM f32 accumulator."""
    M, K = x.shape
    N = w.shape[1]
    tm = _pick_tile(M, 256, 128)   # 128-aligned row tile (full extent if small)
    tn = _pick_tile(N, 512, 128)
    tk = _pick_tile(K, 512, 128)
    kernel = functools.partial(_matmul_kernel, activation=activation)
    return pl.pallas_call(
        kernel,
        out_shape=jax.ShapeDtypeStruct((M, N), out_dtype),
        grid=(M // tm, N // tn, K // tk),
        in_specs=[pl.BlockSpec((tm, tk), lambda i, j, ki: (i, ki)),
                  pl.BlockSpec((tk, tn), lambda i, j, ki: (ki, j)),
                  pl.BlockSpec((1, tn), lambda i, j, ki: (0, j))],
        out_specs=pl.BlockSpec((tm, tn), lambda i, j, ki: (i, j)),
        scratch_shapes=[pltpu.VMEM((tm, tn), jnp.float32)],
        compiler_params=pltpu.CompilerParams(
            dimension_semantics=("parallel", "parallel", "arbitrary")),
    )(x, w, b)


# -----------------------------------------------------------------------------
# Kernel 2: fused multi-head attention block
#   (all heads per batch element, additive mask bias built once, per-head
#    results stored into VMEM scratch, epilogue = proj + residual + LN + mask)
# -----------------------------------------------------------------------------

def _mha_kernel(*refs, h, d_k, d_v, scale, causal, adaptive, fused_qkv):
    if fused_qkv:
        (qkv_ref, m_ref, res_ref, wo_ref, bo_ref, g_ref, be_ref, pm_ref,
         o_ref, attn_scr) = refs
        slab = qkv_ref[0]                               # (nq, 2*h*d_k + h*d_v)
        q_all = slab[:, :h * d_k]
        k_all = slab[:, h * d_k:2 * h * d_k]
        v_all = slab[:, 2 * h * d_k:]
        sk_all = sv_all = None
    else:
        if adaptive:
            (q_ref, kv_ref, s_ref, m_ref, res_ref, wo_ref, bo_ref, g_ref,
             be_ref, pm_ref, o_ref, attn_scr) = refs
        else:
            (q_ref, kv_ref, m_ref, res_ref, wo_ref, bo_ref, g_ref,
             be_ref, pm_ref, o_ref, attn_scr) = refs
            s_ref = None
        q_all = q_ref[0]                                # (nq, h*d_k)
        kv = kv_ref[0]                                  # (nk, h*d_k + h*d_v)
        k_all = kv[:, :h * d_k]
        v_all = kv[:, h * d_k:]
        if adaptive:
            ss = s_ref[0]                               # (nq, h*d_k + h*d_v)
            sk_all = ss[:, :h * d_k]
            sv_all = ss[:, h * d_k:]
        else:
            sk_all = sv_all = None

    nq = q_all.shape[0]
    nk = k_all.shape[0]

    # Single additive mask bias (key padding + causal), built ONCE (not per head).
    km = m_ref[0].astype(jnp.float32)                   # (1, nk), 1.0 == masked
    bias = jnp.broadcast_to(jnp.where(km > 0.5, NEG_INF, 0.0), (nq, nk))
    if causal:
        row = jax.lax.broadcasted_iota(jnp.int32, (nq, nk), 0)
        col = jax.lax.broadcasted_iota(jnp.int32, (nq, nk), 1)
        bias = jnp.where(col > row, NEG_INF, bias)

    for hd in range(h):
        # scale folded into Q: nq*d_k mults instead of nq*nk after the dot
        q_f = q_all[:, hd * d_k:(hd + 1) * d_k].astype(jnp.float32) * scale
        kh = k_all[:, hd * d_k:(hd + 1) * d_k].astype(MXU_DTYPE)
        vh = v_all[:, hd * d_v:(hd + 1) * d_v].astype(MXU_DTYPE)
        # QK^T via dot_general contraction: no materialized transpose of K
        s = jax.lax.dot_general(q_f.astype(MXU_DTYPE), kh,
                                (((1,), (1,)), ((), ())),
                                preferred_element_type=jnp.float32) + bias
        if adaptive:
            # Sentinel ("adaptive") attention: the per-query language signal is
            # one extra key/value slot competing in the same softmax.
            sk_f = sk_all[:, hd * d_k:(hd + 1) * d_k].astype(jnp.float32)
            sv_f = sv_all[:, hd * d_v:(hd + 1) * d_v].astype(jnp.float32)
            ls = jnp.sum(q_f * sk_f, axis=-1, keepdims=True)        # (nq, 1)
            mx = jnp.maximum(jnp.max(s, axis=-1, keepdims=True), ls)
            es = jnp.exp(s - mx)
            els = jnp.exp(ls - mx)
            inv = 1.0 / (jnp.sum(es, axis=-1, keepdims=True) + els)
            pv = jnp.dot(es.astype(MXU_DTYPE), vh,
                         preferred_element_type=jnp.float32)
            oh = (pv + els * sv_f) * inv          # normalize AFTER the PV matmul
        else:
            mx = jnp.max(s, axis=-1, keepdims=True)
            es = jnp.exp(s - mx)
            inv = 1.0 / jnp.sum(es, axis=-1, keepdims=True)
            oh = jnp.dot(es.astype(MXU_DTYPE), vh,
                         preferred_element_type=jnp.float32) * inv
        # direct per-head store (no concatenate -> no h live tiles / spills)
        attn_scr[:, hd * d_v:(hd + 1) * d_v] = oh

    # Fused epilogue: out-projection + bias + residual + LayerNorm + row mask
    attn = attn_scr[...].astype(MXU_DTYPE)              # (nq, h*d_v)
    y = jnp.dot(attn, wo_ref[...].astype(MXU_DTYPE),
                preferred_element_type=jnp.float32)
    y = y + bo_ref[...] + res_ref[0].astype(jnp.float32)
    mu = jnp.mean(y, axis=-1, keepdims=True)
    var = jnp.mean(jnp.square(y - mu), axis=-1, keepdims=True)
    y = (y - mu) * jax.lax.rsqrt(var + LN_EPS)
    y = y * g_ref[...] + be_ref[...]
    y = y * (1.0 - pm_ref[0])                           # masked_fill(padding, 0)
    o_ref[0] = y.astype(o_ref.dtype)


def pallas_mha(attn_inputs, key_mask, residual, w_o, b_o, ln_g, ln_b, pad_rows,
               *, h, d_k, d_v, causal, adaptive, fused_qkv):
    b, nq, d_model = residual.shape
    nk = key_mask.shape[-1]
    kernel = functools.partial(_mha_kernel, h=h, d_k=d_k, d_v=d_v,
                               scale=1.0 / math.sqrt(d_k), causal=causal,
                               adaptive=adaptive, fused_qkv=fused_qkv)
    in_specs = [pl.BlockSpec((1,) + a.shape[1:], lambda i: (i, 0, 0))
                for a in attn_inputs]
    in_specs += [
        pl.BlockSpec((1, 1, nk), lambda i: (i, 0, 0)),          # key pad mask
        pl.BlockSpec((1, nq, d_model), lambda i: (i, 0, 0)),    # residual
        pl.BlockSpec(w_o.shape, lambda i: (0, 0)),
        pl.BlockSpec(b_o.shape, lambda i: (0, 0)),
        pl.BlockSpec(ln_g.shape, lambda i: (0, 0)),
        pl.BlockSpec(ln_b.shape, lambda i: (0, 0)),
        pl.BlockSpec((1, nq, 1), lambda i: (i, 0, 0)),          # padded rows
    ]
    # TODO(synk): for long sequences on v7x (64 MiB VMEM) tile nk with an
    # 'arbitrary' grid axis + online softmax instead of whole-sequence K/V.
    return pl.pallas_call(
        kernel,
        out_shape=jax.ShapeDtypeStruct((b, nq, d_model), ACT_DTYPE),
        grid=(b,),
        in_specs=in_specs,
        out_specs=pl.BlockSpec((1, nq, d_model), lambda i: (i, 0, 0)),
        scratch_shapes=[pltpu.VMEM((nq, h * d_v), jnp.float32)],
        compiler_params=pltpu.CompilerParams(dimension_semantics=("parallel",)),
    )(*attn_inputs, key_mask, residual, w_o, b_o, ln_g, ln_b, pad_rows)


# -----------------------------------------------------------------------------
# Kernel 3: fc2 + bias + residual + LayerNorm (+ row mask), K (=d_ff) tiled
# -----------------------------------------------------------------------------

def _ffn2_res_ln_kernel(x_ref, w_ref, b_ref, res_ref, g_ref, be_ref, pm_ref,
                        o_ref, acc_ref, *, apply_row_mask):
    @pl.when(pl.program_id(1) == 0)
    def _():
        acc_ref[...] = jnp.zeros_like(acc_ref)

    acc_ref[...] += jnp.dot(x_ref[...].astype(MXU_DTYPE),
                            w_ref[...].astype(MXU_DTYPE),
                            preferred_element_type=jnp.float32)

    @pl.when(pl.program_id(1) == pl.num_programs(1) - 1)
    def _():
        y = acc_ref[...] + b_ref[...] + res_ref[...].astype(jnp.float32)
        mu = jnp.mean(y, axis=-1, keepdims=True)
        var = jnp.mean(jnp.square(y - mu), axis=-1, keepdims=True)
        y = (y - mu) * jax.lax.rsqrt(var + LN_EPS)
        y = y * g_ref[...] + be_ref[...]
        if apply_row_mask:
            y = y * (1.0 - pm_ref[...])
        o_ref[...] = y.astype(o_ref.dtype)


def pallas_proj_residual_ln(x, w, b, res, gamma, beta, row_mask, *, apply_row_mask):
    M, K = x.shape
    N = w.shape[1]
    tm = _pick_tile(M, 256, 128)
    tk = _pick_tile(K, 512, 128)
    kernel = functools.partial(_ffn2_res_ln_kernel, apply_row_mask=apply_row_mask)
    return pl.pallas_call(
        kernel,
        out_shape=jax.ShapeDtypeStruct((M, N), ACT_DTYPE),
        grid=(M // tm, K // tk),
        in_specs=[pl.BlockSpec((tm, tk), lambda i, ki: (i, ki)),
                  pl.BlockSpec((tk, N), lambda i, ki: (ki, 0)),
                  pl.BlockSpec((1, N), lambda i, ki: (0, 0)),
                  pl.BlockSpec((tm, N), lambda i, ki: (i, 0)),
                  pl.BlockSpec((1, N), lambda i, ki: (0, 0)),
                  pl.BlockSpec((1, N), lambda i, ki: (0, 0)),
                  pl.BlockSpec((tm, 1), lambda i, ki: (i, 0))],
        out_specs=pl.BlockSpec((tm, N), lambda i, ki: (i, 0)),
        scratch_shapes=[pltpu.VMEM((tm, N), jnp.float32)],
        compiler_params=pltpu.CompilerParams(
            dimension_semantics=("parallel", "arbitrary")),
    )(x, w, b, res, gamma, beta, row_mask)


# -----------------------------------------------------------------------------
# Kernel 4: vocab projection + log_softmax, vocab-tiled with online LSE
#   pass A: logits tiles + running max / sum-exp (LSE written at last tile)
#   pass B: tiny tiled subtraction  log_probs = logits - lse
# -----------------------------------------------------------------------------

def _logits_lse_kernel(x_ref, w_ref, logits_ref, lse_ref, m_scr, l_scr):
    j = pl.program_id(1)

    @pl.when(j == 0)
    def _():
        m_scr[...] = jnp.full_like(m_scr, -jnp.inf)
        l_scr[...] = jnp.zeros_like(l_scr)

    lg = jnp.dot(x_ref[...].astype(MXU_DTYPE), w_ref[...].astype(MXU_DTYPE),
                 preferred_element_type=jnp.float32)
    logits_ref[...] = lg
    m_prev = m_scr[...]
    m_new = jnp.maximum(m_prev, jnp.max(lg, axis=-1, keepdims=True))
    l_scr[...] = (l_scr[...] * jnp.exp(m_prev - m_new)
                  + jnp.sum(jnp.exp(lg - m_new), axis=-1, keepdims=True))
    m_scr[...] = m_new

    @pl.when(j == pl.num_programs(1) - 1)
    def _():
        lse_ref[...] = m_scr[...] + jnp.log(l_scr[...])


def _sub_lse_kernel(logits_ref, lse_ref, o_ref):
    o_ref[...] = logits_ref[...] - lse_ref[...]


def pallas_vocab_logsoftmax(x, w):
    M, K = x.shape
    V = w.shape[1]
    tm = _pick_tile(M, 256, 128)
    tv = _pick_tile(V, 2048, 128)
    logits, lse = pl.pallas_call(
        _logits_lse_kernel,
        out_shape=(jax.ShapeDtypeStruct((M, V), jnp.float32),
                   jax.ShapeDtypeStruct((M, 1), jnp.float32)),
        grid=(M // tm, V // tv),
        in_specs=[pl.BlockSpec((tm, K), lambda i, j: (i, 0)),
                  pl.BlockSpec((K, tv), lambda i, j: (0, j))],
        out_specs=(pl.BlockSpec((tm, tv), lambda i, j: (i, j)),
                   pl.BlockSpec((tm, 1), lambda i, j: (i, 0))),
        scratch_shapes=[pltpu.VMEM((tm, 1), jnp.float32),
                        pltpu.VMEM((tm, 1), jnp.float32)],
        compiler_params=pltpu.CompilerParams(
            dimension_semantics=("parallel", "arbitrary")),
    )(x, w)
    return pl.pallas_call(
        _sub_lse_kernel,
        out_shape=jax.ShapeDtypeStruct((M, V), jnp.float32),
        grid=(M // tm, V // tv),
        in_specs=[pl.BlockSpec((tm, tv), lambda i, j: (i, j)),
                  pl.BlockSpec((tm, 1), lambda i, j: (i, 0))],
        out_specs=pl.BlockSpec((tm, tv), lambda i, j: (i, j)),
        compiler_params=pltpu.CompilerParams(
            dimension_semantics=("parallel", "parallel")),
    )(logits, lse)


# -----------------------------------------------------------------------------
# Parameter initialization (deterministic, fused weight layouts, bf16 weights)
# -----------------------------------------------------------------------------

def _init_linear(key, fan_in, fan_out):
    kw, kb = jax.random.split(key)
    w = jax.random.normal(kw, (fan_in, fan_out), jnp.float32) * 0.02
    b = jax.random.normal(kb, (1, fan_out), jnp.float32) * 0.02
    return w, b


def _init_mha(key, d_model, d_k, d_v, h, *, fuse_qkv, adaptive=False):
    ks = jax.random.split(key, 6)
    wq, bq = _init_linear(ks[0], d_model, h * d_k)
    wk, bk = _init_linear(ks[1], d_model, h * d_k)
    wv, bv = _init_linear(ks[2], d_model, h * d_v)
    wo, bo = _init_linear(ks[3], h * d_v, d_model)
    p = {"w_o": wo.astype(MXU_DTYPE), "b_o": bo,
         "ln_g": jnp.ones((1, d_model), jnp.float32),
         "ln_b": jnp.zeros((1, d_model), jnp.float32)}
    if fuse_qkv:
        p["w_qkv"] = jnp.concatenate([wq, wk, wv], axis=1).astype(MXU_DTYPE)
        p["b_qkv"] = jnp.concatenate([bq, bk, bv], axis=1)
    else:
        p["w_q"], p["b_q"] = wq.astype(MXU_DTYPE), bq
        p["w_kv"] = jnp.concatenate([wk, wv], axis=1).astype(MXU_DTYPE)
        p["b_kv"] = jnp.concatenate([bk, bv], axis=1)
    if adaptive:
        wsk, bsk = _init_linear(ks[4], d_model, h * d_k)
        wsv, bsv = _init_linear(ks[5], d_model, h * d_v)
        p["w_s"] = jnp.concatenate([wsk, wsv], axis=1).astype(MXU_DTYPE)
        p["b_s"] = jnp.concatenate([bsk, bsv], axis=1)
    return p


def _init_pwff(key, d_model, d_ff):
    k1, k2 = jax.random.split(key)
    w1, b1 = _init_linear(k1, d_model, d_ff)
    w2, b2 = _init_linear(k2, d_ff, d_model)
    return {"w1": w1.astype(MXU_DTYPE), "b1": b1,
            "w2": w2.astype(MXU_DTYPE), "b2": b2,
            "ln_g": jnp.ones((1, d_model), jnp.float32),
            "ln_b": jnp.zeros((1, d_model), jnp.float32)}


def _init_layer(key, d_model, d_k, d_v, h, d_ff, adaptive=False):
    k1, k2, k3 = jax.random.split(key, 3)
    return {"self_attn": _init_mha(k1, d_model, d_k, d_v, h, fuse_qkv=True),
            "enc_attn": _init_mha(k2, d_model, d_k, d_v, h, fuse_qkv=False,
                                  adaptive=adaptive),
            "pwff": _init_pwff(k3, d_model, d_ff)}


def sinusoid_encoding_table(n_pos, d_model, padding_idx=0):
    pos = np.arange(n_pos)[:, None].astype(np.float64)
    i = np.arange(d_model)[None, :]
    angle = pos / np.power(10000.0, 2 * (i // 2) / d_model)
    table = np.zeros((n_pos, d_model), np.float32)
    table[:, 0::2] = np.sin(angle[:, 0::2])
    table[:, 1::2] = np.cos(angle[:, 1::2])
    table[padding_idx] = 0.0
    return jnp.asarray(table)


def init_adaptive_decoder_params(key, vocab_size, max_len, n_dec, padding_idx,
                                 d_model, d_k, d_v, h, d_ff):
    keys = jax.random.split(key, n_dec + 4)
    emb = jax.random.normal(keys[0], (vocab_size, d_model), jnp.float32) * 0.02
    emb = emb.at[padding_idx].set(0.0)
    layers = [_init_layer(keys[1 + i], d_model, d_k, d_v, h, d_ff, adaptive=False)
              for i in range(n_dec)]
    layers.append(_init_layer(keys[1 + n_dec], d_model, d_k, d_v, h, d_ff,
                              adaptive=True))
    # TODO(synk): the pretrained language model has no Pallas equivalent here;
    # it is replaced by a deterministic linear projection of the word embeddings.
    lm_w, lm_b = _init_linear(keys[2 + n_dec], d_model, d_model)
    fc_w = jax.random.normal(keys[3 + n_dec], (d_model, vocab_size), jnp.float32) * 0.02
    return {"word_emb": emb.astype(ACT_DTYPE),
            "pos_emb": sinusoid_encoding_table(max_len + 1, d_model, 0).astype(ACT_DTYPE),
            "layers": layers,
            "language_model": {"w": lm_w.astype(MXU_DTYPE), "b": lm_b},
            "fc_w": fc_w.astype(MXU_DTYPE)}


# -----------------------------------------------------------------------------
# Module forward (glue in JAX under jit, hot paths in Pallas)
# -----------------------------------------------------------------------------

def mha_forward(p, queries, keys_values, key_mask, pad_rows, *, d_k, d_v, h,
                causal, language_signals=None):
    """MultiHeadAttention (m2 style): attention + fc_o + residual + LayerNorm
    plus the padded-row masked_fill — all in one fused Pallas kernel.  The
    fused QKV/KV/sentinel GEMM slabs are fed straight into that kernel (no
    wrapper-side lane slicing -> no extra HBM copies).  Dropout is identity."""
    b, nq, d_model = queries.shape
    nk = keys_values.shape[1]
    qf = queries.reshape(b * nq, d_model)
    adaptive = language_signals is not None
    fused_qkv = "w_qkv" in p

    if fused_qkv:                    # self-attention: one fused QKV GEMM
        attn_inputs = [pallas_matmul(qf, p["w_qkv"], p["b_qkv"]).reshape(b, nq, -1)]
    else:                            # cross-attention: Q GEMM + fused KV GEMM
        q = pallas_matmul(qf, p["w_q"], p["b_q"]).reshape(b, nq, -1)
        kv = pallas_matmul(keys_values.reshape(b * nk, d_model),
                           p["w_kv"], p["b_kv"]).reshape(b, nk, -1)
        attn_inputs = [q, kv]
    if adaptive:
        # TODO(synk): exact upstream AdaptiveScaledDotProductAttention source not
        # provided; implemented as sentinel-gated attention over the language signal.
        attn_inputs.append(pallas_matmul(language_signals.reshape(b * nq, d_model),
                                         p["w_s"], p["b_s"]).reshape(b, nq, -1))

    return pallas_mha(attn_inputs, key_mask, queries, p["w_o"], p["b_o"],
                      p["ln_g"], p["ln_b"], pad_rows,
                      h=h, d_k=d_k, d_v=d_v, causal=causal,
                      adaptive=adaptive, fused_qkv=fused_qkv)


def pwff_forward(p, x, pad_rows, apply_row_mask):
    b, n, d_model = x.shape
    xf = x.reshape(b * n, d_model)
    h1 = pallas_matmul(xf, p["w1"], p["b1"], activation="relu")
    out = pallas_proj_residual_ln(h1, p["w2"], p["b2"], xf, p["ln_g"], p["ln_b"],
                                  pad_rows.reshape(b * n, 1),
                                  apply_row_mask=apply_row_mask)
    return out.reshape(b, n, d_model)


def decoder_layer_forward(p, x, enc_kv, self_key_mask, enc_key_mask, pad_rows,
                          *, d_k, d_v, h, language_signals=None, adaptive=False):
    self_att = mha_forward(p["self_attn"], x, x, self_key_mask, pad_rows,
                           d_k=d_k, d_v=d_v, h=h, causal=True)
    enc_att = mha_forward(p["enc_attn"], self_att, enc_kv, enc_key_mask, pad_rows,
                          d_k=d_k, d_v=d_v, h=h, causal=False,
                          language_signals=language_signals if adaptive else None)
    # regular DecoderLayer does not mask after pwff; AdaptiveDecoderLayer does
    return pwff_forward(p["pwff"], enc_att, pad_rows, apply_row_mask=adaptive)


def adaptive_decoder_forward(params, tokens, enc_outputs, enc_pos_embedding,
                             enc_attention_mask, *, padding_idx, n_dec,
                             d_k, d_v, h):
    b_s, seq_len = tokens.shape
    enc_kv = (enc_outputs + enc_pos_embedding).astype(ACT_DTYPE)
    enc_len = enc_kv.shape[1]

    mask_queries = (tokens == padding_idx)                               # (b, seq)
    self_key_mask = mask_queries[:, None, :].astype(jnp.float32)         # (b, 1, seq)
    enc_key_mask = enc_attention_mask.reshape(b_s, 1, enc_len).astype(jnp.float32)
    pad_rows = mask_queries[:, :, None].astype(jnp.float32)              # (b, seq, 1)

    seq = jnp.broadcast_to(jnp.arange(1, seq_len + 1, dtype=jnp.int32)[None, :],
                           (b_s, seq_len))
    seq = jnp.where(mask_queries, 0, seq)

    out = params["word_emb"][tokens]                                     # (b, seq, d_model)
    word_pos_embedding = params["pos_emb"][seq]
    d_model = out.shape[-1]

    # Synthetic language-model feature (see TODO in init), reused by every layer.
    language_feature = pallas_matmul(out.reshape(b_s * seq_len, d_model),
                                     params["language_model"]["w"],
                                     params["language_model"]["b"]
                                     ).reshape(b_s, seq_len, d_model)

    for i, layer_p in enumerate(params["layers"]):
        # NOTE: the reference adds the positional embedding at EVERY layer
        # ('out += word_pos_embedding' inside the loop) — kept intentionally.
        out = out + word_pos_embedding
        out = decoder_layer_forward(layer_p, out, enc_kv, self_key_mask,
                                    enc_key_mask, pad_rows,
                                    d_k=d_k, d_v=d_v, h=h,
                                    language_signals=language_feature,
                                    adaptive=(i >= n_dec))

    # vocab projection (nn.Linear bias=False) + log_softmax (vocab-tiled, online LSE)
    log_probs = pallas_vocab_logsoftmax(out.reshape(b_s * seq_len, d_model),
                                        params["fc_w"])
    return log_probs.reshape(b_s, seq_len, -1)


# -----------------------------------------------------------------------------
# Demo
# -----------------------------------------------------------------------------

if __name__ == "__main__":
    VOCAB_SIZE = 50
    MAX_LEN = 20
    N_DEC = 2
    PADDING_IDX = 0
    D_MODEL, D_K, D_V, H, D_FF = 32, 8, 8, 4, 64
    B, SEQ, ENC_LEN = 2, 8, 10

    root = jax.random.PRNGKey(0)
    k_params, k_tok, k_enc, k_pos = jax.random.split(root, 4)

    params = init_adaptive_decoder_params(k_params, VOCAB_SIZE, MAX_LEN, N_DEC,
                                          PADDING_IDX, D_MODEL, D_K, D_V, H, D_FF)

    tokens = jax.random.randint(k_tok, (B, SEQ), 1, VOCAB_SIZE, dtype=jnp.int32)
    tokens = tokens.at[1, -2:].set(PADDING_IDX)                 # some padding tokens
    enc_outputs = jax.random.normal(k_enc, (B, ENC_LEN, D_MODEL), jnp.float32) * 0.1
    enc_pos_embedding = jax.random.normal(k_pos, (B, ENC_LEN, D_MODEL), jnp.float32) * 0.1
    enc_attention_mask = jnp.zeros((B, 1, 1, ENC_LEN), jnp.bool_)

    fwd = jax.jit(functools.partial(adaptive_decoder_forward,
                                    padding_idx=PADDING_IDX, n_dec=N_DEC,
                                    d_k=D_K, d_v=D_V, h=H))
    out = fwd(params, tokens, enc_outputs, enc_pos_embedding, enc_attention_mask)
    out = jax.block_until_ready(out)

    assert out.shape == (B, SEQ, VOCAB_SIZE), out.shape
    assert bool(jnp.all(jnp.isfinite(out)))
    # rows of log_softmax should sum (in prob space) to ~1
    assert bool(jnp.allclose(jnp.sum(jnp.exp(out), axis=-1), 1.0, atol=1e-3))
    print("KERNEL_OK")
</pallas_src>

<mosaic_0001>
module attributes {stable_mosaic.version = 11 : i64} {
  func.func @_matmul_kernel(%arg0: i32, %arg1: i32, %arg2: i32, %arg3: memref<16x32xbf16, #tpu.memory_space<vmem>>, %arg4: memref<32x96xbf16, #tpu.memory_space<vmem>>, %arg5: memref<1x96xf32, #tpu.memory_space<vmem>>, %arg6: memref<16x96xbf16, #tpu.memory_space<vmem>>, %arg7: memref<16x96xf32, #tpu.memory_space<vmem>>) attributes {dimension_semantics = [#tpu.dimension_semantics<parallel>, #tpu.dimension_semantics<parallel>, #tpu.dimension_semantics<arbitrary>], iteration_bounds = array<i64: 1, 1, 1>, scalar_prefetch = 0 : i64, scratch_operands = 1 : i64, tpu.core_type = #tpu.core_type<tc>, window_params = [{transform_indices = @transform_0, window_bounds = array<i64: 16, 32>}, {transform_indices = @transform_1, window_bounds = array<i64: 32, 96>}, {transform_indices = @transform_2, window_bounds = array<i64: 1, 96>}, {transform_indices = @transform_3, window_bounds = array<i64: 16, 96>}]} {
    %c0_i32 = arith.constant 0 : i32
    %0 = arith.cmpi eq, %arg2, %c0_i32 : i32
    %1 = arith.extui %0 : i1 to i32
    %c0_i32_0 = arith.constant 0 : i32
    %2 = arith.cmpi ne, %1, %c0_i32_0 : i32
    scf.if %2 {
      %cst_10 = arith.constant 0.000000e+00 : f32
      %12 = vector.broadcast %cst_10 : f32 to vector<16x96xf32>
      %c0_11 = arith.constant 0 : index
      %c0_12 = arith.constant 0 : index
      %13 = vector.load %arg7[%c0_11, %c0_12] : memref<16x96xf32, #tpu.memory_space<vmem>>, vector<16x96xf32>
      tpu.vector_store %arg7[%c0_11, %c0_12], %12 {strides = array<i32>} : memref<16x96xf32, #tpu.memory_space<vmem>>, vector<16x96xf32>,
    } else {
    }
    %c0 = arith.constant 0 : index
    %c0_1 = arith.constant 0 : index
    %3 = vector.load %arg7[%c0, %c0_1] : memref<16x96xf32, #tpu.memory_space<vmem>>, vector<16x96xf32>
    %c0_2 = arith.constant 0 : index
    %c0_3 = arith.constant 0 : index
    %4 = vector.load %arg3[%c0_2, %c0_3] : memref<16x32xbf16, #tpu.memory_space<vmem>>, vector<16x32xbf16>
    %c0_4 = arith.constant 0 : index
    %c0_5 = arith.constant 0 : index
    %5 = vector.load %arg4[%c0_4, %c0_5] : memref<32x96xbf16, #tpu.memory_space<vmem>>, vector<32x96xbf16>
    %cst = arith.constant dense<0.000000e+00> : vector<16x96xf32>
    %6 = tpu.matmul %4, %5, %cst {dimension_numbers = #tpu.dot_dimension_numbers<[1], [0], [0], [1], [0, 0, 1, 1], [], []>} : vector<16x32xbf16>, vector<32x96xbf16>, vector<16x96xf32> -> vector<16x96xf32>
    %7 = arith.addf %3, %6 : vector<16x96xf32>
    %c0_6 = arith.constant 0 : index
    %c0_7 = arith.constant 0 : index
    %8 = vector.load %arg7[%c0_6, %c0_7] : memref<16x96xf32, #tpu.memory_space<vmem>>, vector<16x96xf32>
    tpu.vector_store %arg7[%c0_6, %c0_7], %7 {strides = array<i32>} : memref<16x96xf32, #tpu.memory_space<vmem>>, vector<16x96xf32>,
    %c0_i32_8 = arith.constant 0 : i32
    %9 = arith.cmpi eq, %arg2, %c0_i32_8 : i32
    %10 = arith.extui %9 : i1 to i32
    %c0_i32_9 = arith.constant 0 : i32
    %11 = arith.cmpi ne, %10, %c0_i32_9 : i32
    scf.if %11 {
      %c0_10 = arith.constant 0 : index
      %c0_11 = arith.constant 0 : index
      %12 = vector.load %arg7[%c0_10, %c0_11] : memref<16x96xf32, #tpu.memory_space<vmem>>, vector<16x96xf32>
      %c0_12 = arith.constant 0 : index
      %c0_13 = arith.constant 0 : index
      %13 = vector.load %arg5[%c0_12, %c0_13] : memref<1x96xf32, #tpu.memory_space<vmem>>, vector<1x96xf32>
      %14 = vector.broadcast %13 : vector<1x96xf32> to vector<16x96xf32>
      %15 = arith.addf %12, %14 : vector<16x96xf32>
      %16 = arith.truncf %15 : vector<16x96xf32> to vector<16x96xbf16>
      %c0_14 = arith.constant 0 : index
      %c0_15 = arith.constant 0 : index
      %17 = vector.load %arg6[%c0_14, %c0_15] : memref<16x96xbf16, #tpu.memory_space<vmem>>, vector<16x96xbf16>
      tpu.vector_store %arg6[%c0_14, %c0_15], %16 {strides = array<i32>} : memref<16x96xbf16, #tpu.memory_space<vmem>>, vector<16x96xbf16>,
    } else {
    }
    return
  }
  func.func @transform_0(%arg0: i32, %arg1: i32, %arg2: i32) -> (i32, i32) {
    %c0_i32 = arith.constant 0 : i32
    return %arg0, %arg2 : i32, i32
  }
  func.func @transform_1(%arg0: i32, %arg1: i32, %arg2: i32) -> (i32, i32) {
    %c0_i32 = arith.constant 0 : i32
    return %arg2, %arg1 : i32, i32
  }
  func.func @transform_2(%arg0: i32, %arg1: i32, %arg2: i32) -> (i32, i32) {
    %c0_i32 = arith.constant 0 : i32
    %c0_i32_0 = arith.constant 0 : i32
    return %c0_i32, %arg1 : i32, i32
  }
  func.func @transform_3(%arg0: i32, %arg1: i32, %arg2: i32) -> (i32, i32) {
    %c0_i32 = arith.constant 0 : i32
    return %arg0, %arg1 : i32, i32
  }
}

module attributes {stable_mosaic.version = 11 : i64} {
  func.func @_matmul_kernel(%arg0: i32, %arg1: i32, %arg2: i32, %arg3: memref<16x32xbf16, #tpu.memory_space<vmem>>, %arg4: memref<32x32xbf16, #tpu.memory_space<vmem>>, %arg5: memref<1x32xf32, #tpu.memory_space<vmem>>, %arg6: memref<16x32xbf16, #tpu.memory_space<vmem>>, %arg7: memref<16x32xf32, #tpu.memory_space<vmem>>) attributes {dimension_semantics = [#tpu.dimension_semantics<parallel>, #tpu.dimension_semantics<parallel>, #tpu.dimension_semantics<arbitrary>], iteration_bounds = array<i64: 1, 1, 1>, scalar_prefetch = 0 : i64, scratch_operands = 1 : i64, tpu.core_type = #tpu.core_type<tc>, window_params = [{transform_indices = @transform_0, window_bounds = array<i64: 16, 32>}, {transform_indices = @transform_1, window_bounds = array<i64: 32, 32>}, {transform_indices = @transform_2, window_bounds = array<i64: 1, 32>}, {transform_indices = @transform_3, window_bounds = array<i64: 16, 32>}]} {
    %c0_i32 = arith.constant 0 : i32
    %0 = arith.cmpi eq, %arg2, %c0_i32 : i32
    %1 = arith.extui %0 : i1 to i32
    %c0_i32_0 = arith.constant 0 : i32
    %2 = arith.cmpi ne, %1, %c0_i32_0 : i32
    scf.if %2 {
      %cst_10 = arith.constant 0.000000e+00 : f32
      %12 = vector.broadcast %cst_10 : f32 to vector<16x32xf32>
      %c0_11 = arith.constant 0 : index
      %c0_12 = arith.constant 0 : index
      %13 = vector.load %arg7[%c0_11, %c0_12] : memref<16x32xf32, #tpu.memory_space<vmem>>, vector<16x32xf32>
      tpu.vector_store %arg7[%c0_11, %c0_12], %12 {strides = array<i32>} : memref<16x32xf32, #tpu.memory_space<vmem>>, vector<16x32xf32>,
    } else {
    }
    %c0 = arith.constant 0 : index
    %c0_1 = arith.constant 0 : index
    %3 = vector.load %arg7[%c0, %c0_1] : memref<16x32xf32, #tpu.memory_space<vmem>>, vector<16x32xf32>
    %c0_2 = arith.constant 0 : index
    %c0_3 = arith.constant 0 : index
    %4 = vector.load %arg3[%c0_2, %c0_3] : memref<16x32xbf16, #tpu.memory_space<vmem>>, vector<16x32xbf16>
    %c0_4 = arith.constant 0 : index
    %c0_5 = arith.constant 0 : index
    %5 = vector.load %arg4[%c0_4, %c0_5] : memref<32x32xbf16, #tpu.memory_space<vmem>>, vector<32x32xbf16>
    %cst = arith.constant dense<0.000000e+00> : vector<16x32xf32>
    %6 = tpu.matmul %4, %5, %cst {dimension_numbers = #tpu.dot_dimension_numbers<[1], [0], [0], [1], [0, 0, 1, 1], [], []>} : vector<16x32xbf16>, vector<32x32xbf16>, vector<16x32xf32> -> vector<16x32xf32>
    %7 = arith.addf %3, %6 : vector<16x32xf32>
    %c0_6 = arith.constant 0 : index
    %c0_7 = arith.constant 0 : index
    %8 = vector.load %arg7[%c0_6, %c0_7] : memref<16x32xf32, #tpu.memory_space<vmem>>, vector<16x32xf32>
    tpu.vector_store %arg7[%c0_6, %c0_7], %7 {strides = array<i32>} : memref<16x32xf32, #tpu.memory_space<vmem>>, vector<16x32xf32>,
    %c0_i32_8 = arith.constant 0 : i32
    %9 = arith.cmpi eq, %arg2, %c0_i32_8 : i32
    %10 = arith.extui %9 : i1 to i32
    %c0_i32_9 = arith.constant 0 : i32
    %11 = arith.cmpi ne, %10, %c0_i32_9 : i32
    scf.if %11 {
      %c0_10 = arith.constant 0 : index
      %c0_11 = arith.constant 0 : index
      %12 = vector.load %arg7[%c0_10, %c0_11] : memref<16x32xf32, #tpu.memory_space<vmem>>, vector<16x32xf32>
      %c0_12 = arith.constant 0 : index
      %c0_13 = arith.constant 0 : index
      %13 = vector.load %arg5[%c0_12, %c0_13] : memref<1x32xf32, #tpu.memory_space<vmem>>, vector<1x32xf32>
      %14 = vector.broadcast %13 : vector<1x32xf32> to vector<16x32xf32>
      %15 = arith.addf %12, %14 : vector<16x32xf32>
      %16 = arith.truncf %15 : vector<16x32xf32> to vector<16x32xbf16>
      %c0_14 = arith.constant 0 : index
      %c0_15 = arith.constant 0 : index
      %17 = vector.load %arg6[%c0_14, %c0_15] : memref<16x32xbf16, #tpu.memory_space<vmem>>, vector<16x32xbf16>
      tpu.vector_store %arg6[%c0_14, %c0_15], %16 {strides = array<i32>} : memref<16x32xbf16, #tpu.memory_space<vmem>>, vector<16x32xbf16>,
    } else {
    }
    return
  }
  func.func @transform_0(%arg0: i32, %arg1: i32, %arg2: i32) -> (i32, i32) {
    %c0_i32 = arith.constant 0 : i32
    return %arg0, %arg2 : i32, i32
  }
  func.func @transform_1(%arg0: i32, %arg1: i32, %arg2: i32) -> (i32, i32) {
    %c0_i32 = arith.constant 0 : i32
    return %arg2, %arg1 : i32, i32
  }
  func.func @transform_2(%arg0: i32, %arg1: i32, %arg2: i32) -> (i32, i32) {
    %c0_i32 = arith.constant 0 : i32
    %c0_i32_0 = arith.constant 0 : i32
    return %c0_i32, %arg1 : i32, i32
  }
  func.func @transform_3(%arg0: i32, %arg1: i32, %arg2: i32) -> (i32, i32) {
    %c0_i32 = arith.constant 0 : i32
    return %arg0, %arg1 : i32, i32
  }
}

module attributes {stable_mosaic.version = 11 : i64} {
  func.func @_mha_kernel(%arg0: i32, %arg1: memref<1x8x96xbf16, #tpu.memory_space<vmem>>, %arg2: memref<1x1x8xf32, #tpu.memory_space<vmem>>, %arg3: memref<1x8x32xbf16, #tpu.memory_space<vmem>>, %arg4: memref<32x32xbf16, #tpu.memory_space<vmem>>, %arg5: memref<1x32xf32, #tpu.memory_space<vmem>>, %arg6: memref<1x32xf32, #tpu.memory_space<vmem>>, %arg7: memref<1x32xf32, #tpu.memory_space<vmem>>, %arg8: memref<1x8x1xf32, #tpu.memory_space<vmem>>, %arg9: memref<1x8x32xbf16, #tpu.memory_space<vmem>>, %arg10: memref<8x32xf32, #tpu.memory_space<vmem>>) attributes {dimension_semantics = [#tpu.dimension_semantics<parallel>], iteration_bounds = array<i64: 2>, scalar_prefetch = 0 : i64, scratch_operands = 1 : i64, tpu.core_type = #tpu.core_type<tc>, window_params = [{transform_indices = @transform_0, window_bounds = array<i64: 1, 8, 96>}, {transform_indices = @transform_1, window_bounds = array<i64: 1, 1, 8>}, {transform_indices = @transform_2, window_bounds = array<i64: 1, 8, 32>}, {pipeline_mode = #tpu.pipeline_mode<synchronous>, transform_indices = @transform_3, window_bounds = array<i64: 32, 32>}, {pipeline_mode = #tpu.pipeline_mode<synchronous>, transform_indices = @transform_4, window_bounds = array<i64: 1, 32>}, {pipeline_mode = #tpu.pipeline_mode<synchronous>, transform_indices = @transform_5, window_bounds = array<i64: 1, 32>}, {pipeline_mode = #tpu.pipeline_mode<synchronous>, transform_indices = @transform_6, window_bounds = array<i64: 1, 32>}, {transform_indices = @transform_7, window_bounds = array<i64: 1, 8, 1>}, {transform_indices = @transform_8, window_bounds = array<i64: 1, 8, 32>}]} {
    %c0 = arith.constant 0 : index
    %c0_0 = arith.constant 0 : index
    %c0_1 = arith.constant 0 : index
    %0 = vector.load %arg1[%c0, %c0_0, %c0_1] : memref<1x8x96xbf16, #tpu.memory_space<vmem>>, vector<1x8x96xbf16>
    %1 = vector.shape_cast %0 : vector<1x8x96xbf16> to vector<8x96xbf16>
    %2 = vector.extract_strided_slice %1 {offsets = [0, 0], sizes = [8, 32], strides = [1, 1]} : vector<8x96xbf16> to vector<8x32xbf16>
    %3 = vector.extract_strided_slice %1 {offsets = [0, 32], sizes = [8, 32], strides = [1, 1]} : vector<8x96xbf16> to vector<8x32xbf16>
    %4 = vector.extract_strided_slice %1 {offsets = [0, 64], sizes = [8, 32], strides = [1, 1]} : vector<8x96xbf16> to vector<8x32xbf16>
    %c0_2 = arith.constant 0 : index
    %c0_3 = arith.constant 0 : index
    %c0_4 = arith.constant 0 : index
    %5 = vector.load %arg2[%c0_2, %c0_3, %c0_4] : memref<1x1x8xf32, #tpu.memory_space<vmem>>, vector<1x1x8xf32>
    %6 = vector.shape_cast %5 : vector<1x1x8xf32> to vector<1x8xf32>
    %cst = arith.constant 5.000000e-01 : f32
    %7 = vector.broadcast %cst : f32 to vector<1x8xf32>
    %8 = arith.cmpf ogt, %6, %7 : vector<1x8xf32>
    %cst_5 = arith.constant -1.000000e+30 : f32
    %cst_6 = arith.constant 0.000000e+00 : f32
    %9 = vector.broadcast %cst_5 : f32 to vector<1x8xf32>
    %10 = vector.broadcast %cst_6 : f32 to vector<1x8xf32>
    %11 = arith.select %8, %9, %10 : vector<1x8xi1>, vector<1x8xf32>
    %12 = vector.shape_cast %11 : vector<1x8xf32> to vector<1x8xf32>
    %13 = vector.broadcast %12 : vector<1x8xf32> to vector<8x8xf32>
    %14 = tpu.iota {dimensions = array<i32: 0>} : vector<8x8xi32>
    %15 = tpu.iota {dimensions = array<i32: 1>} : vector<8x8xi32>
    %16 = arith.cmpi sgt, %15, %14 : vector<8x8xi32>
    %cst_7 = arith.constant -1.000000e+30 : f32
    %17 = vector.broadcast %cst_7 : f32 to vector<8x8xf32>
    %18 = arith.select %16, %17, %13 : vector<8x8xi1>, vector<8x8xf32>
    %19 = vector.extract_strided_slice %2 {offsets = [0, 0], sizes = [8, 8], strides = [1, 1]} : vector<8x32xbf16> to vector<8x8xbf16>
    %20 = arith.extf %19 : vector<8x8xbf16> to vector<8x8xf32>
    %cst_8 = arith.constant 0.353553385 : f32
    %21 = vector.broadcast %cst_8 : f32 to vector<8x8xf32>
    %22 = arith.mulf %20, %21 : vector<8x8xf32>
    %23 = vector.extract_strided_slice %3 {offsets = [0, 0], sizes = [8, 8], strides = [1, 1]} : vector<8x32xbf16> to vector<8x8xbf16>
    %24 = vector.extract_strided_slice %4 {offsets = [0, 0], sizes = [8, 8], strides = [1, 1]} : vector<8x32xbf16> to vector<8x8xbf16>
    %25 = arith.truncf %22 : vector<8x8xf32> to vector<8x8xbf16>
    %cst_9 = arith.constant dense<0.000000e+00> : vector<8x8xf32>
    %26 = tpu.matmul %25, %23, %cst_9 {dimension_numbers = #tpu.dot_dimension_numbers<[1], [1], [0], [0], [0, 0, 1, 0], [], []>} : vector<8x8xbf16>, vector<8x8xbf16>, vector<8x8xf32> -> vector<8x8xf32>
    %27 = arith.addf %26, %18 : vector<8x8xf32>
    %cst_10 = arith.constant dense<0xFF800000> : vector<8xf32>
    %28 = vector.multi_reduction <maximumf>, %27, %cst_10 [1] : vector<8x8xf32> to vector<8xf32>
    %29 = vector.shape_cast %28 : vector<8xf32> to vector<8x1xf32>
    %30 = vector.broadcast %29 : vector<8x1xf32> to vector<8x8xf32>
    %31 = arith.subf %27, %30 : vector<8x8xf32>
    %32 = math.exp %31 : vector<8x8xf32>
    %cst_11 = arith.constant dense<0.000000e+00> : vector<8xf32>
    %33 = vector.multi_reduction <add>, %32, %cst_11 [1] : vector<8x8xf32> to vector<8xf32>
    %34 = vector.shape_cast %33 : vector<8xf32> to vector<8x1xf32>
    %cst_12 = arith.constant 1.000000e+00 : f32
    %35 = vector.broadcast %cst_12 : f32 to vector<8x1xf32>
    %36 = arith.divf %35, %34 : vector<8x1xf32>
    %37 = arith.truncf %32 : vector<8x8xf32> to vector<8x8xbf16>
    %cst_13 = arith.constant dense<0.000000e+00> : vector<8x8xf32>
    %38 = tpu.matmul %37, %24, %cst_13 {dimension_numbers = #tpu.dot_dimension_numbers<[1], [0], [0], [1], [0, 0, 1, 1], [], []>} : vector<8x8xbf16>, vector<8x8xbf16>, vector<8x8xf32> -> vector<8x8xf32>
    %39 = vector.broadcast %36 : vector<8x1xf32> to vector<8x8xf32>
    %40 = arith.mulf %38, %39 : vector<8x8xf32>
    %c0_14 = arith.constant 0 : index
    %c0_15 = arith.constant 0 : index
    %41 = vector.load %arg10[%c0_14, %c0_15] : memref<8x32xf32, #tpu.memory_space<vmem>>, vector<8x8xf32>
    tpu.vector_store %arg10[%c0_14, %c0_15], %40 {strides = array<i32>} : memref<8x32xf32, #tpu.memory_space<vmem>>, vector<8x8xf32>,
    %42 = vector.extract_strided_slice %2 {offsets = [0, 8], sizes = [8, 8], strides = [1, 1]} : vector<8x32xbf16> to vector<8x8xbf16>
    %43 = arith.extf %42 : vector<8x8xbf16> to vector<8x8xf32>
    %cst_16 = arith.constant 0.353553385 : f32
    %44 = vector.broadcast %cst_16 : f32 to vector<8x8xf32>
    %45 = arith.mulf %43, %44 : vector<8x8xf32>
    %46 = vector.extract_strided_slice %3 {offsets = [0, 8], sizes = [8, 8], strides = [1, 1]} : vector<8x32xbf16> to vector<8x8xbf16>
    %47 = vector.extract_strided_slice %4 {offsets = [0, 8], sizes = [8, 8], strides = [1, 1]} : vector<8x32xbf16> to vector<8x8xbf16>
    %48 = arith.truncf %45 : vector<8x8xf32> to vector<8x8xbf16>
    %cst_17 = arith.constant dense<0.000000e+00> : vector<8x8xf32>
    %49 = tpu.matmul %48, %46, %cst_17 {dimension_numbers = #tpu.dot_dimension_numbers<[1], [1], [0], [0], [0, 0, 1, 0], [], []>} : vector<8x8xbf16>, vector<8x8xbf16>, vector<8x8xf32> -> vector<8x8xf32>
    %50 = arith.addf %49, %18 : vector<8x8xf32>
    %cst_18 = arith.constant dense<0xFF800000> : vector<8xf32>
    %51 = vector.multi_reduction <maximumf>, %50, %cst_18 [1] : vector<8x8xf32> to vector<8xf32>
    %52 = vector.shape_cast %51 : vector<8xf32> to vector<8x1xf32>
    %53 = vector.broadcast %52 : vector<8x1xf32> to vector<8x8xf32>
    %54 = arith.subf %50, %53 : vector<8x8xf32>
    %55 = math.exp %54 : vector<8x8xf32>
    %cst_19 = arith.constant dense<0.000000e+00> : vector<8xf32>
    %56 = vector.multi_reduction <add>, %55, %cst_19 [1] : vector<8x8xf32> to vector<8xf32>
    %57 = vector.shape_cast %56 : vector<8xf32> to vector<8x1xf32>
    %cst_20 = arith.constant 1.000000e+00 : f32
    %58 = vector.broadcast %cst_20 : f32 to vector<8x1xf32>
    %59 = arith.divf %58, %57 : vector<8x1xf32>
    %60 = arith.truncf %55 : vector<8x8xf32> to vector<8x8xbf16>
    %cst_21 = arith.constant dense<0.000000e+00> : vector<8x8xf32>
    %61 = tpu.matmul %60, %47, %cst_21 {dimension_numbers = #tpu.dot_dimension_numbers<[1], [0], [0], [1], [0, 0, 1, 1], [], []>} : vector<8x8xbf16>, vector<8x8xbf16>, vector<8x8xf32> -> vector<8x8xf32>
    %62 = vector.broadcast %59 : vector<8x1xf32> to vector<8x8xf32>
    %63 = arith.mulf %61, %62 : vector<8x8xf32>
    %c0_22 = arith.constant 0 : index
    %c8 = arith.constant 8 : index
    %64 = vector.load %arg10[%c0_22, %c8] : memref<8x32xf32, #tpu.memory_space<vmem>>, vector<8x8xf32>
    tpu.vector_store %arg10[%c0_22, %c8], %63 {strides = array<i32>} : memref<8x32xf32, #tpu.memory_space<vmem>>, vector<8x8xf32>,
    %65 = vector.extract_strided_slice %2 {offsets = [0, 16], sizes = [8, 8], strides = [1, 1]} : vector<8x32xbf16> to vector<8x8xbf16>
    %66 = arith.extf %65 : vector<8x8xbf16> to vector<8x8xf32>
    %cst_23 = arith.constant 0.353553385 : f32
    %67 = vector.broadcast %cst_23 : f32 to vector<8x8xf32>
    %68 = arith.mulf %66, %67 : vector<8x8xf32>
    %69 = vector.extract_strided_slice %3 {offsets = [0, 16], sizes = [8, 8], strides = [1, 1]} : vector<8x32xbf16> to vector<8x8xbf16>
    %70 = vector.extract_strided_slice %4 {offsets = [0, 16], sizes = [8, 8], strides = [1, 1]} : vector<8x32xbf16> to vector<8x8xbf16>
    %71 = arith.truncf %68 : vector<8x8xf32> to vector<8x8xbf16>
    %cst_24 = arith.constant dense<0.000000e+00> : vector<8x8xf32>
    %72 = tpu.matmul %71, %69, %cst_24 {dimension_numbers = #tpu.dot_dimension_numbers<[1], [1], [0], [0], [0, 0, 1, 0], [], []>} : vector<8x8xbf16>, vector<8x8xbf16>, vector<8x8xf32> -> vector<8x8xf32>
    %73 = arith.addf %72, %18 : vector<8x8xf32>
    %cst_25 = arith.constant dense<0xFF800000> : vector<8xf32>
    %74 = vector.multi_reduction <maximumf>, %73, %cst_25 [1] : vector<8x8xf32> to vector<8xf32>
    %75 = vector.shape_cast %74 : vector<8xf32> to vector<8x1xf32>
    %76 = vector.broadcast %75 : vector<8x1xf32> to vector<8x8xf32>
    %77 = arith.subf %73, %76 : vector<8x8xf32>
    %78 = math.exp %77 : vector<8x8xf32>
    %cst_26 = arith.constant dense<0.000000e+00> : vector<8xf32>
    %79 = vector.multi_reduction <add>, %78, %cst_26 [1] : vector<8x8xf32> to vector<8xf32>
    %80 = vector.shape_cast %79 : vector<8xf32> to vector<8x1xf32>
    %cst_27 = arith.constant 1.000000e+00 : f32
    %81 = vector.broadcast %cst_27 : f32 to vector<8x1xf32>
    %82 = arith.divf %81, %80 : vector<8x1xf32>
    %83 = arith.truncf %78 : vector<8x8xf32> to vector<8x8xbf16>
    %cst_28 = arith.constant dense<0.000000e+00> : vector<8x8xf32>
    %84 = tpu.matmul %83, %70, %cst_28 {dimension_numbers = #tpu.dot_dimension_numbers<[1], [0], [0], [1], [0, 0, 1, 1], [], []>} : vector<8x8xbf16>, vector<8x8xbf16>, vector<8x8xf32> -> vector<8x8xf32>
    %85 = vector.broadcast %82 : vector<8x1xf32> to vector<8x8xf32>
    %86 = arith.mulf %84, %85 : vector<8x8xf32>
    %c0_29 = arith.constant 0 : index
    %c16 = arith.constant 16 : index
    %87 = vector.load %arg10[%c0_29, %c16] : memref<8x32xf32, #tpu.memory_space<vmem>>, vector<8x8xf32>
    tpu.vector_store %arg10[%c0_29, %c16], %86 {strides = array<i32>} : memref<8x32xf32, #tpu.memory_space<vmem>>, vector<8x8xf32>,
    %88 = vector.extract_strided_slice %2 {offsets = [0, 24], sizes = [8, 8], strides = [1, 1]} : vector<8x32xbf16> to vector<8x8xbf16>
    %89 = arith.extf %88 : vector<8x8xbf16> to vector<8x8xf32>
    %cst_30 = arith.constant 0.353553385 : f32
    %90 = vector.broadcast %cst_30 : f32 to vector<8x8xf32>
    %91 = arith.mulf %89, %90 : vector<8x8xf32>
    %92 = vector.extract_strided_slice %3 {offsets = [0, 24], sizes = [8, 8], strides = [1, 1]} : vector<8x32xbf16> to vector<8x8xbf16>
    %93 = vector.extract_strided_slice %4 {offsets = [0, 24], sizes = [8, 8], strides = [1, 1]} : vector<8x32xbf16> to vector<8x8xbf16>
    %94 = arith.truncf %91 : vector<8x8xf32> to vector<8x8xbf16>
    %cst_31 = arith.constant dense<0.000000e+00> : vector<8x8xf32>
    %95 = tpu.matmul %94, %92, %cst_31 {dimension_numbers = #tpu.dot_dimension_numbers<[1], [1], [0], [0], [0, 0, 1, 0], [], []>} : vector<8x8xbf16>, vector<8x8xbf16>, vector<8x8xf32> -> vector<8x8xf32>
    %96 = arith.addf %95, %18 : vector<8x8xf32>
    %cst_32 = arith.constant dense<0xFF800000> : vector<8xf32>
    %97 = vector.multi_reduction <maximumf>, %96, %cst_32 [1] : vector<8x8xf32> to vector<8xf32>
    %98 = vector.shape_cast %97 : vector<8xf32> to vector<8x1xf32>
    %99 = vector.broadcast %98 : vector<8x1xf32> to vector<8x8xf32>
    %100 = arith.subf %96, %99 : vector<8x8xf32>
    %101 = math.exp %100 : vector<8x8xf32>
    %cst_33 = arith.constant dense<0.000000e+00> : vector<8xf32>
    %102 = vector.multi_reduction <add>, %101, %cst_33 [1] : vector<8x8xf32> to vector<8xf32>
    %103 = vector.shape_cast %102 : vector<8xf32> to vector<8x1xf32>
    %cst_34 = arith.constant 1.000000e+00 : f32
    %104 = vector.broadcast %cst_34 : f32 to vector<8x1xf32>
    %105 = arith.divf %104, %103 : vector<8x1xf32>
    %106 = arith.truncf %101 : vector<8x8xf32> to vector<8x8xbf16>
    %cst_35 = arith.constant dense<0.000000e+00> : vector<8x8xf32>
    %107 = tpu.matmul %106, %93, %cst_35 {dimension_numbers = #tpu.dot_dimension_numbers<[1], [0], [0], [1], [0, 0, 1, 1], [], []>} : vector<8x8xbf16>, vector<8x8xbf16>, vector<8x8xf32> -> vector<8x8xf32>
    %108 = vector.broadcast %105 : vector<8x1xf32> to vector<8x8xf32>
    %109 = arith.mulf %107, %108 : vector<8x8xf32>
    %c0_36 = arith.constant 0 : index
    %c24 = arith.constant 24 : index
    %110 = vector.load %arg10[%c0_36, %c24] : memref<8x32xf32, #tpu.memory_space<vmem>>, vector<8x8xf32>
    tpu.vector_store %arg10[%c0_36, %c24], %109 {strides = array<i32>} : memref<8x32xf32, #tpu.memory_space<vmem>>, vector<8x8xf32>,
    %c0_37 = arith.constant 0 : index
    %c0_38 = arith.constant 0 : index
    %111 = vector.load %arg10[%c0_37, %c0_38] : memref<8x32xf32, #tpu.memory_space<vmem>>, vector<8x32xf32>
    %112 = arith.truncf %111 : vector<8x32xf32> to vector<8x32xbf16>
    %c0_39 = arith.constant 0 : index
    %c0_40 = arith.constant 0 : index
    %113 = vector.load %arg4[%c0_39, %c0_40] : memref<32x32xbf16, #tpu.memory_space<vmem>>, vector<32x32xbf16>
    %cst_41 = arith.constant dense<0.000000e+00> : vector<8x32xf32>
    %114 = tpu.matmul %112, %113, %cst_41 {dimension_numbers = #tpu.dot_dimension_numbers<[1], [0], [0], [1], [0, 0, 1, 1], [], []>} : vector<8x32xbf16>, vector<32x32xbf16>, vector<8x32xf32> -> vector<8x32xf32>
    %c0_42 = arith.constant 0 : index
    %c0_43 = arith.constant 0 : index
    %115 = vector.load %arg5[%c0_42, %c0_43] : memref<1x32xf32, #tpu.memory_space<vmem>>, vector<1x32xf32>
    %116 = vector.broadcast %115 : vector<1x32xf32> to vector<8x32xf32>
    %117 = arith.addf %114, %116 : vector<8x32xf32>
    %c0_44 = arith.constant 0 : index
    %c0_45 = arith.constant 0 : index
    %c0_46 = arith.constant 0 : index
    %118 = vector.load %arg3[%c0_44, %c0_45, %c0_46] : memref<1x8x32xbf16, #tpu.memory_space<vmem>>, vector<1x8x32xbf16>
    %119 = vector.shape_cast %118 : vector<1x8x32xbf16> to vector<8x32xbf16>
    %120 = arith.extf %119 : vector<8x32xbf16> to vector<8x32xf32>
    %121 = arith.addf %117, %120 : vector<8x32xf32>
    %cst_47 = arith.constant dense<0.000000e+00> : vector<8xf32>
    %122 = vector.multi_reduction <add>, %121, %cst_47 [1] : vector<8x32xf32> to vector<8xf32>
    %123 = vector.shape_cast %122 : vector<8xf32> to vector<8x1xf32>
    %cst_48 = arith.constant 3.200000e+01 : f32
    %124 = vector.broadcast %cst_48 : f32 to vector<8x1xf32>
    %125 = arith.divf %123, %124 : vector<8x1xf32>
    %126 = vector.broadcast %125 : vector<8x1xf32> to vector<8x32xf32>
    %127 = arith.subf %121, %126 : vector<8x32xf32>
    %128 = arith.mulf %127, %127 : vector<8x32xf32>
    %cst_49 = arith.constant dense<0.000000e+00> : vector<8xf32>
    %129 = vector.multi_reduction <add>, %128, %cst_49 [1] : vector<8x32xf32> to vector<8xf32>
    %130 = vector.shape_cast %129 : vector<8xf32> to vector<8x1xf32>
    %cst_50 = arith.constant 3.200000e+01 : f32
    %131 = vector.broadcast %cst_50 : f32 to vector<8x1xf32>
    %132 = arith.divf %130, %131 : vector<8x1xf32>
    %133 = vector.broadcast %125 : vector<8x1xf32> to vector<8x32xf32>
    %134 = arith.subf %121, %133 : vector<8x32xf32>
    %cst_51 = arith.constant 9.99999974E-6 : f32
    %135 = vector.broadcast %cst_51 : f32 to vector<8x1xf32>
    %136 = arith.addf %132, %135 : vector<8x1xf32>
    %137 = math.rsqrt %136 : vector<8x1xf32>
    %138 = vector.broadcast %137 : vector<8x1xf32> to vector<8x32xf32>
    %139 = arith.mulf %134, %138 : vector<8x32xf32>
    %c0_52 = arith.constant 0 : index
    %c0_53 = arith.constant 0 : index
    %140 = vector.load %arg6[%c0_52, %c0_53] : memref<1x32xf32, #tpu.memory_space<vmem>>, vector<1x32xf32>
    %141 = vector.broadcast %140 : vector<1x32xf32> to vector<8x32xf32>
    %142 = arith.mulf %139, %141 : vector<8x32xf32>
    %c0_54 = arith.constant 0 : index
    %c0_55 = arith.constant 0 : index
    %143 = vector.load %arg7[%c0_54, %c0_55] : memref<1x32xf32, #tpu.memory_space<vmem>>, vector<1x32xf32>
    %144 = vector.broadcast %143 : vector<1x32xf32> to vector<8x32xf32>
    %145 = arith.addf %142, %144 : vector<8x32xf32>
    %c0_56 = arith.constant 0 : index
    %c0_57 = arith.constant 0 : index
    %c0_58 = arith.constant 0 : index
    %146 = vector.load %arg8[%c0_56, %c0_57, %c0_58] : memref<1x8x1xf32, #tpu.memory_space<vmem>>, vector<1x8x1xf32>
    %147 = vector.shape_cast %146 : vector<1x8x1xf32> to vector<8x1xf32>
    %cst_59 = arith.constant 1.000000e+00 : f32
    %148 = vector.broadcast %cst_59 : f32 to vector<8x1xf32>
    %149 = arith.subf %148, %147 : vector<8x1xf32>
    %150 = vector.broadcast %149 : vector<8x1xf32> to vector<8x32xf32>
    %151 = arith.mulf %145, %150 : vector<8x32xf32>
    %152 = arith.truncf %151 : vector<8x32xf32> to vector<8x32xbf16>
    %c0_60 = arith.constant 0 : index
    %c0_61 = arith.constant 0 : index
    %c0_62 = arith.constant 0 : index
    %153 = vector.load %arg9[%c0_60, %c0_61, %c0_62] : memref<1x8x32xbf16, #tpu.memory_space<vmem>>, vector<1x8x32xbf16>
    %154 = vector.shape_cast %153 : vector<1x8x32xbf16> to vector<8x32xbf16>
    %155 = vector.shape_cast %152 : vector<8x32xbf16> to vector<1x8x32xbf16>
    tpu.vector_store %arg9[%c0_60, %c0_61, %c0_62], %155 {strides = array<i32>} : memref<1x8x32xbf16, #tpu.memory_space<vmem>>, vector<1x8x32xbf16>,
    return
  }
  func.func @transform_0(%arg0: i32) -> (i32, i32, i32) {
    %c0_i32 = arith.constant 0 : i32
    %c0_i32_0 = arith.constant 0 : i32
    %c0_i32_1 = arith.constant 0 : i32
    return %arg0, %c0_i32, %c0_i32_0 : i32, i32, i32
  }
  func.func @transform_1(%arg0: i32) -> (i32, i32, i32) {
    %c0_i32 = arith.constant 0 : i32
    %c0_i32_0 = arith.constant 0 : i32
    %c0_i32_1 = arith.constant 0 : i32
    return %arg0, %c0_i32, %c0_i32_0 : i32, i32, i32
  }
  func.func @transform_2(%arg0: i32) -> (i32, i32, i32) {
    %c0_i32 = arith.constant 0 : i32
    %c0_i32_0 = arith.constant 0 : i32
    %c0_i32_1 = arith.constant 0 : i32
    return %arg0, %c0_i32, %c0_i32_0 : i32, i32, i32
  }
  func.func @transform_3(%arg0: i32) -> (i32, i32) {
    %c0_i32 = arith.constant 0 : i32
    %c0_i32_0 = arith.constant 0 : i32
    %c0_i32_1 = arith.constant 0 : i32
    return %c0_i32, %c0_i32_0 : i32, i32
  }
  func.func @transform_4(%arg0: i32) -> (i32, i32) {
    %c0_i32 = arith.constant 0 : i32
    %c0_i32_0 = arith.constant 0 : i32
    %c0_i32_1 = arith.constant 0 : i32
    return %c0_i32, %c0_i32_0 : i32, i32
  }
  func.func @transform_5(%arg0: i32) -> (i32, i32) {
    %c0_i32 = arith.constant 0 : i32
    %c0_i32_0 = arith.constant 0 : i32
    %c0_i32_1 = arith.constant 0 : i32
    return %c0_i32, %c0_i32_0 : i32, i32
  }
  func.func @transform_6(%arg0: i32) -> (i32, i32) {
    %c0_i32 = arith.constant 0 : i32
    %c0_i32_0 = arith.constant 0 : i32
    %c0_i32_1 = arith.constant 0 : i32
    return %c0_i32, %c0_i32_0 : i32, i32
  }
  func.func @transform_7(%arg0: i32) -> (i32, i32, i32) {
    %c0_i32 = arith.constant 0 : i32
    %c0_i32_0 = arith.constant 0 : i32
    %c0_i32_1 = arith.constant 0 : i32
    return %arg0, %c0_i32, %c0_i32_0 : i32, i32, i32
  }
  func.func @transform_8(%arg0: i32) -> (i32, i32, i32) {
    %c0_i32 = arith.constant 0 : i32
    %c0_i32_0 = arith.constant 0 : i32
    %c0_i32_1 = arith.constant 0 : i32
    return %arg0, %c0_i32, %c0_i32_0 : i32, i32, i32
  }
}

module attributes {stable_mosaic.version = 11 : i64} {
  func.func @_matmul_kernel(%arg0: i32, %arg1: i32, %arg2: i32, %arg3: memref<20x32xbf16, #tpu.memory_space<vmem>>, %arg4: memref<32x64xbf16, #tpu.memory_space<vmem>>, %arg5: memref<1x64xf32, #tpu.memory_space<vmem>>, %arg6: memref<20x64xbf16, #tpu.memory_space<vmem>>, %arg7: memref<20x64xf32, #tpu.memory_space<vmem>>) attributes {dimension_semantics = [#tpu.dimension_semantics<parallel>, #tpu.dimension_semantics<parallel>, #tpu.dimension_semantics<arbitrary>], iteration_bounds = array<i64: 1, 1, 1>, scalar_prefetch = 0 : i64, scratch_operands = 1 : i64, tpu.core_type = #tpu.core_type<tc>, window_params = [{transform_indices = @transform_0, window_bounds = array<i64: 20, 32>}, {transform_indices = @transform_1, window_bounds = array<i64: 32, 64>}, {transform_indices = @transform_2, window_bounds = array<i64: 1, 64>}, {transform_indices = @transform_3, window_bounds = array<i64: 20, 64>}]} {
    %c0_i32 = arith.constant 0 : i32
    %0 = arith.cmpi eq, %arg2, %c0_i32 : i32
    %1 = arith.extui %0 : i1 to i32
    %c0_i32_0 = arith.constant 0 : i32
    %2 = arith.cmpi ne, %1, %c0_i32_0 : i32
    scf.if %2 {
      %cst_10 = arith.constant 0.000000e+00 : f32
      %12 = vector.broadcast %cst_10 : f32 to vector<20x64xf32>
      %c0_11 = arith.constant 0 : index
      %c0_12 = arith.constant 0 : index
      %13 = vector.load %arg7[%c0_11, %c0_12] : memref<20x64xf32, #tpu.memory_space<vmem>>, vector<20x64xf32>
      tpu.vector_store %arg7[%c0_11, %c0_12], %12 {strides = array<i32>} : memref<20x64xf32, #tpu.memory_space<vmem>>, vector<20x64xf32>,
    } else {
    }
    %c0 = arith.constant 0 : index
    %c0_1 = arith.constant 0 : index
    %3 = vector.load %arg7[%c0, %c0_1] : memref<20x64xf32, #tpu.memory_space<vmem>>, vector<20x64xf32>
    %c0_2 = arith.constant 0 : index
    %c0_3 = arith.constant 0 : index
    %4 = vector.load %arg3[%c0_2, %c0_3] : memref<20x32xbf16, #tpu.memory_space<vmem>>, vector<20x32xbf16>
    %c0_4 = arith.constant 0 : index
    %c0_5 = arith.constant 0 : index
    %5 = vector.load %arg4[%c0_4, %c0_5] : memref<32x64xbf16, #tpu.memory_space<vmem>>, vector<32x64xbf16>
    %cst = arith.constant dense<0.000000e+00> : vector<20x64xf32>
    %6 = tpu.matmul %4, %5, %cst {dimension_numbers = #tpu.dot_dimension_numbers<[1], [0], [0], [1], [0, 0, 1, 1], [], []>} : vector<20x32xbf16>, vector<32x64xbf16>, vector<20x64xf32> -> vector<20x64xf32>
    %7 = arith.addf %3, %6 : vector<20x64xf32>
    %c0_6 = arith.constant 0 : index
    %c0_7 = arith.constant 0 : index
    %8 = vector.load %arg7[%c0_6, %c0_7] : memref<20x64xf32, #tpu.memory_space<vmem>>, vector<20x64xf32>
    tpu.vector_store %arg7[%c0_6, %c0_7], %7 {strides = array<i32>} : memref<20x64xf32, #tpu.memory_space<vmem>>, vector<20x64xf32>,
    %c0_i32_8 = arith.constant 0 : i32
    %9 = arith.cmpi eq, %arg2, %c0_i32_8 : i32
    %10 = arith.extui %9 : i1 to i32
    %c0_i32_9 = arith.constant 0 : i32
    %11 = arith.cmpi ne, %10, %c0_i32_9 : i32
    scf.if %11 {
      %c0_10 = arith.constant 0 : index
      %c0_11 = arith.constant 0 : index
      %12 = vector.load %arg7[%c0_10, %c0_11] : memref<20x64xf32, #tpu.memory_space<vmem>>, vector<20x64xf32>
      %c0_12 = arith.constant 0 : index
      %c0_13 = arith.constant 0 : index
      %13 = vector.load %arg5[%c0_12, %c0_13] : memref<1x64xf32, #tpu.memory_space<vmem>>, vector<1x64xf32>
      %14 = vector.broadcast %13 : vector<1x64xf32> to vector<20x64xf32>
      %15 = arith.addf %12, %14 : vector<20x64xf32>
      %16 = arith.truncf %15 : vector<20x64xf32> to vector<20x64xbf16>
      %c0_14 = arith.constant 0 : index
      %c0_15 = arith.constant 0 : index
      %17 = vector.load %arg6[%c0_14, %c0_15] : memref<20x64xbf16, #tpu.memory_space<vmem>>, vector<20x64xbf16>
      tpu.vector_store %arg6[%c0_14, %c0_15], %16 {strides = array<i32>} : memref<20x64xbf16, #tpu.memory_space<vmem>>, vector<20x64xbf16>,
    } else {
    }
    return
  }
  func.func @transform_0(%arg0: i32, %arg1: i32, %arg2: i32) -> (i32, i32) {
    %c0_i32 = arith.constant 0 : i32
    return %arg0, %arg2 : i32, i32
  }
  func.func @transform_1(%arg0: i32, %arg1: i32, %arg2: i32) -> (i32, i32) {
    %c0_i32 = arith.constant 0 : i32
    return %arg2, %arg1 : i32, i32
  }
  func.func @transform_2(%arg0: i32, %arg1: i32, %arg2: i32) -> (i32, i32) {
    %c0_i32 = arith.constant 0 : i32
    %c0_i32_0 = arith.constant 0 : i32
    return %c0_i32, %arg1 : i32, i32
  }
  func.func @transform_3(%arg0: i32, %arg1: i32, %arg2: i32) -> (i32, i32) {
    %c0_i32 = arith.constant 0 : i32
    return %arg0, %arg1 : i32, i32
  }
}

module attributes {stable_mosaic.version = 11 : i64} {
  func.func @_matmul_kernel(%arg0: i32, %arg1: i32, %arg2: i32, %arg3: memref<16x32xbf16, #tpu.memory_space<vmem>>, %arg4: memref<32x64xbf16, #tpu.memory_space<vmem>>, %arg5: memref<1x64xf32, #tpu.memory_space<vmem>>, %arg6: memref<16x64xbf16, #tpu.memory_space<vmem>>, %arg7: memref<16x64xf32, #tpu.memory_space<vmem>>) attributes {dimension_semantics = [#tpu.dimension_semantics<parallel>, #tpu.dimension_semantics<parallel>, #tpu.dimension_semantics<arbitrary>], iteration_bounds = array<i64: 1, 1, 1>, scalar_prefetch = 0 : i64, scratch_operands = 1 : i64, tpu.core_type = #tpu.core_type<tc>, window_params = [{transform_indices = @transform_0, window_bounds = array<i64: 16, 32>}, {transform_indices = @transform_1, window_bounds = array<i64: 32, 64>}, {transform_indices = @transform_2, window_bounds = array<i64: 1, 64>}, {transform_indices = @transform_3, window_bounds = array<i64: 16, 64>}]} {
    %c0_i32 = arith.constant 0 : i32
    %0 = arith.cmpi eq, %arg2, %c0_i32 : i32
    %1 = arith.extui %0 : i1 to i32
    %c0_i32_0 = arith.constant 0 : i32
    %2 = arith.cmpi ne, %1, %c0_i32_0 : i32
    scf.if %2 {
      %cst_10 = arith.constant 0.000000e+00 : f32
      %12 = vector.broadcast %cst_10 : f32 to vector<16x64xf32>
      %c0_11 = arith.constant 0 : index
      %c0_12 = arith.constant 0 : index
      %13 = vector.load %arg7[%c0_11, %c0_12] : memref<16x64xf32, #tpu.memory_space<vmem>>, vector<16x64xf32>
      tpu.vector_store %arg7[%c0_11, %c0_12], %12 {strides = array<i32>} : memref<16x64xf32, #tpu.memory_space<vmem>>, vector<16x64xf32>,
    } else {
    }
    %c0 = arith.constant 0 : index
    %c0_1 = arith.constant 0 : index
    %3 = vector.load %arg7[%c0, %c0_1] : memref<16x64xf32, #tpu.memory_space<vmem>>, vector<16x64xf32>
    %c0_2 = arith.constant 0 : index
    %c0_3 = arith.constant 0 : index
    %4 = vector.load %arg3[%c0_2, %c0_3] : memref<16x32xbf16, #tpu.memory_space<vmem>>, vector<16x32xbf16>
    %c0_4 = arith.constant 0 : index
    %c0_5 = arith.constant 0 : index
    %5 = vector.load %arg4[%c0_4, %c0_5] : memref<32x64xbf16, #tpu.memory_space<vmem>>, vector<32x64xbf16>
    %cst = arith.constant dense<0.000000e+00> : vector<16x64xf32>
    %6 = tpu.matmul %4, %5, %cst {dimension_numbers = #tpu.dot_dimension_numbers<[1], [0], [0], [1], [0, 0, 1, 1], [], []>} : vector<16x32xbf16>, vector<32x64xbf16>, vector<16x64xf32> -> vector<16x64xf32>
    %7 = arith.addf %3, %6 : vector<16x64xf32>
    %c0_6 = arith.constant 0 : index
    %c0_7 = arith.constant 0 : index
    %8 = vector.load %arg7[%c0_6, %c0_7] : memref<16x64xf32, #tpu.memory_space<vmem>>, vector<16x64xf32>
    tpu.vector_store %arg7[%c0_6, %c0_7], %7 {strides = array<i32>} : memref<16x64xf32, #tpu.memory_space<vmem>>, vector<16x64xf32>,
    %c0_i32_8 = arith.constant 0 : i32
    %9 = arith.cmpi eq, %arg2, %c0_i32_8 : i32
    %10 = arith.extui %9 : i1 to i32
    %c0_i32_9 = arith.constant 0 : i32
    %11 = arith.cmpi ne, %10, %c0_i32_9 : i32
    scf.if %11 {
      %c0_10 = arith.constant 0 : index
      %c0_11 = arith.constant 0 : index
      %12 = vector.load %arg7[%c0_10, %c0_11] : memref<16x64xf32, #tpu.memory_space<vmem>>, vector<16x64xf32>
      %c0_12 = arith.constant 0 : index
      %c0_13 = arith.constant 0 : index
      %13 = vector.load %arg5[%c0_12, %c0_13] : memref<1x64xf32, #tpu.memory_space<vmem>>, vector<1x64xf32>
      %14 = vector.broadcast %13 : vector<1x64xf32> to vector<16x64xf32>
      %15 = arith.addf %12, %14 : vector<16x64xf32>
      %cst_14 = arith.constant 0.000000e+00 : f32
      %16 = vector.broadcast %cst_14 : f32 to vector<16x64xf32>
      %17 = arith.maximumf %15, %16 : vector<16x64xf32>
      %18 = arith.truncf %17 : vector<16x64xf32> to vector<16x64xbf16>
      %c0_15 = arith.constant 0 : index
      %c0_16 = arith.constant 0 : index
      %19 = vector.load %arg6[%c0_15, %c0_16] : memref<16x64xbf16, #tpu.memory_space<vmem>>, vector<16x64xbf16>
      tpu.vector_store %arg6[%c0_15, %c0_16], %18 {strides = array<i32>} : memref<16x64xbf16, #tpu.memory_space<vmem>>, vector<16x64xbf16>,
    } else {
    }
    return
  }
  func.func @transform_0(%arg0: i32, %arg1: i32, %arg2: i32) -> (i32, i32) {
    %c0_i32 = arith.constant 0 : i32
    return %arg0, %arg2 : i32, i32
  }
  func.func @transform_1(%arg0: i32, %arg1: i32, %arg2: i32) -> (i32, i32) {
    %c0_i32 = arith.constant 0 : i32
    return %arg2, %arg1 : i32, i32
  }
  func.func @transform_2(%arg0: i32, %arg1: i32, %arg2: i32) -> (i32, i32) {
    %c0_i32 = arith.constant 0 : i32
    %c0_i32_0 = arith.constant 0 : i32
    return %c0_i32, %arg1 : i32, i32
  }
  func.func @transform_3(%arg0: i32, %arg1: i32, %arg2: i32) -> (i32, i32) {
    %c0_i32 = arith.constant 0 : i32
    return %arg0, %arg1 : i32, i32
  }
}

module attributes {stable_mosaic.version = 11 : i64} {
  func.func @_mha_kernel(%arg0: i32, %arg1: memref<1x8x32xbf16, #tpu.memory_space<vmem>>, %arg2: memref<1x10x64xbf16, #tpu.memory_space<vmem>>, %arg3: memref<1x1x10xf32, #tpu.memory_space<vmem>>, %arg4: memref<1x8x32xbf16, #tpu.memory_space<vmem>>, %arg5: memref<32x32xbf16, #tpu.memory_space<vmem>>, %arg6: memref<1x32xf32, #tpu.memory_space<vmem>>, %arg7: memref<1x32xf32, #tpu.memory_space<vmem>>, %arg8: memref<1x32xf32, #tpu.memory_space<vmem>>, %arg9: memref<1x8x1xf32, #tpu.memory_space<vmem>>, %arg10: memref<1x8x32xbf16, #tpu.memory_space<vmem>>, %arg11: memref<8x32xf32, #tpu.memory_space<vmem>>) attributes {dimension_semantics = [#tpu.dimension_semantics<parallel>], iteration_bounds = array<i64: 2>, scalar_prefetch = 0 : i64, scratch_operands = 1 : i64, tpu.core_type = #tpu.core_type<tc>, window_params = [{transform_indices = @transform_0, window_bounds = array<i64: 1, 8, 32>}, {transform_indices = @transform_1, window_bounds = array<i64: 1, 10, 64>}, {transform_indices = @transform_2, window_bounds = array<i64: 1, 1, 10>}, {transform_indices = @transform_3, window_bounds = array<i64: 1, 8, 32>}, {pipeline_mode = #tpu.pipeline_mode<synchronous>, transform_indices = @transform_4, window_bounds = array<i64: 32, 32>}, {pipeline_mode = #tpu.pipeline_mode<synchronous>, transform_indices = @transform_5, window_bounds = array<i64: 1, 32>}, {pipeline_mode = #tpu.pipeline_mode<synchronous>, transform_indices = @transform_6, window_bounds = array<i64: 1, 32>}, {pipeline_mode = #tpu.pipeline_mode<synchronous>, transform_indices = @transform_7, window_bounds = array<i64: 1, 32>}, {transform_indices = @transform_8, window_bounds = array<i64: 1, 8, 1>}, {transform_indices = @transform_9, window_bounds = array<i64: 1, 8, 32>}]} {
    %c0 = arith.constant 0 : index
    %c0_0 = arith.constant 0 : index
    %c0_1 = arith.constant 0 : index
    %0 = vector.load %arg1[%c0, %c0_0, %c0_1] : memref<1x8x32xbf16, #tpu.memory_space<vmem>>, vector<1x8x32xbf16>
    %1 = vector.shape_cast %0 : vector<1x8x32xbf16> to vector<8x32xbf16>
    %c0_2 = arith.constant 0 : index
    %c0_3 = arith.constant 0 : index
    %c0_4 = arith.constant 0 : index
    %2 = vector.load %arg2[%c0_2, %c0_3, %c0_4] : memref<1x10x64xbf16, #tpu.memory_space<vmem>>, vector<1x10x64xbf16>
    %3 = vector.shape_cast %2 : vector<1x10x64xbf16> to vector<10x64xbf16>
    %4 = vector.extract_strided_slice %3 {offsets = [0, 0], sizes = [10, 32], strides = [1, 1]} : vector<10x64xbf16> to vector<10x32xbf16>
    %5 = vector.extract_strided_slice %3 {offsets = [0, 32], sizes = [10, 32], strides = [1, 1]} : vector<10x64xbf16> to vector<10x32xbf16>
    %c0_5 = arith.constant 0 : index
    %c0_6 = arith.constant 0 : index
    %c0_7 = arith.constant 0 : index
    %6 = vector.load %arg3[%c0_5, %c0_6, %c0_7] : memref<1x1x10xf32, #tpu.memory_space<vmem>>, vector<1x1x10xf32>
    %7 = vector.shape_cast %6 : vector<1x1x10xf32> to vector<1x10xf32>
    %cst = arith.constant 5.000000e-01 : f32
    %8 = vector.broadcast %cst : f32 to vector<1x10xf32>
    %9 = arith.cmpf ogt, %7, %8 : vector<1x10xf32>
    %cst_8 = arith.constant -1.000000e+30 : f32
    %cst_9 = arith.constant 0.000000e+00 : f32
    %10 = vector.broadcast %cst_8 : f32 to vector<1x10xf32>
    %11 = vector.broadcast %cst_9 : f32 to vector<1x10xf32>
    %12 = arith.select %9, %10, %11 : vector<1x10xi1>, vector<1x10xf32>
    %13 = vector.shape_cast %12 : vector<1x10xf32> to vector<1x10xf32>
    %14 = vector.broadcast %13 : vector<1x10xf32> to vector<8x10xf32>
    %15 = vector.extract_strided_slice %1 {offsets = [0, 0], sizes = [8, 8], strides = [1, 1]} : vector<8x32xbf16> to vector<8x8xbf16>
    %16 = arith.extf %15 : vector<8x8xbf16> to vector<8x8xf32>
    %cst_10 = arith.constant 0.353553385 : f32
    %17 = vector.broadcast %cst_10 : f32 to vector<8x8xf32>
    %18 = arith.mulf %16, %17 : vector<8x8xf32>
    %19 = vector.extract_strided_slice %4 {offsets = [0, 0], sizes = [10, 8], strides = [1, 1]} : vector<10x32xbf16> to vector<10x8xbf16>
    %20 = vector.extract_strided_slice %5 {offsets = [0, 0], sizes = [10, 8], strides = [1, 1]} : vector<10x32xbf16> to vector<10x8xbf16>
    %21 = arith.truncf %18 : vector<8x8xf32> to vector<8x8xbf16>
    %cst_11 = arith.constant dense<0.000000e+00> : vector<8x10xf32>
    %22 = tpu.matmul %21, %19, %cst_11 {dimension_numbers = #tpu.dot_dimension_numbers<[1], [1], [0], [0], [0, 0, 1, 0], [], []>} : vector<8x8xbf16>, vector<10x8xbf16>, vector<8x10xf32> -> vector<8x10xf32>
    %23 = arith.addf %22, %14 : vector<8x10xf32>
    %cst_12 = arith.constant dense<0xFF800000> : vector<8xf32>
    %24 = vector.multi_reduction <maximumf>, %23, %cst_12 [1] : vector<8x10xf32> to vector<8xf32>
    %25 = vector.shape_cast %24 : vector<8xf32> to vector<8x1xf32>
    %26 = vector.broadcast %25 : vector<8x1xf32> to vector<8x10xf32>
    %27 = arith.subf %23, %26 : vector<8x10xf32>
    %28 = math.exp %27 : vector<8x10xf32>
    %cst_13 = arith.constant dense<0.000000e+00> : vector<8xf32>
    %29 = vector.multi_reduction <add>, %28, %cst_13 [1] : vector<8x10xf32> to vector<8xf32>
    %30 = vector.shape_cast %29 : vector<8xf32> to vector<8x1xf32>
    %cst_14 = arith.constant 1.000000e+00 : f32
    %31 = vector.broadcast %cst_14 : f32 to vector<8x1xf32>
    %32 = arith.divf %31, %30 : vector<8x1xf32>
    %33 = arith.truncf %28 : vector<8x10xf32> to vector<8x10xbf16>
    %cst_15 = arith.constant dense<0.000000e+00> : vector<8x8xf32>
    %34 = tpu.matmul %33, %20, %cst_15 {dimension_numbers = #tpu.dot_dimension_numbers<[1], [0], [0], [1], [0, 0, 1, 1], [], []>} : vector<8x10xbf16>, vector<10x8xbf16>, vector<8x8xf32> -> vector<8x8xf32>
    %35 = vector.broadcast %32 : vector<8x1xf32> to vector<8x8xf32>
    %36 = arith.mulf %34, %35 : vector<8x8xf32>
    %c0_16 = arith.constant 0 : index
    %c0_17 = arith.constant 0 : index
    %37 = vector.load %arg11[%c0_16, %c0_17] : memref<8x32xf32, #tpu.memory_space<vmem>>, vector<8x8xf32>
    tpu.vector_store %arg11[%c0_16, %c0_17], %36 {strides = array<i32>} : memref<8x32xf32, #tpu.memory_space<vmem>>, vector<8x8xf32>,
    %38 = vector.extract_strided_slice %1 {offsets = [0, 8], sizes = [8, 8], strides = [1, 1]} : vector<8x32xbf16> to vector<8x8xbf16>
    %39 = arith.extf %38 : vector<8x8xbf16> to vector<8x8xf32>
    %cst_18 = arith.constant 0.353553385 : f32
    %40 = vector.broadcast %cst_18 : f32 to vector<8x8xf32>
    %41 = arith.mulf %39, %40 : vector<8x8xf32>
    %42 = vector.extract_strided_slice %4 {offsets = [0, 8], sizes = [10, 8], strides = [1, 1]} : vector<10x32xbf16> to vector<10x8xbf16>
    %43 = vector.extract_strided_slice %5 {offsets = [0, 8], sizes = [10, 8], strides = [1, 1]} : vector<10x32xbf16> to vector<10x8xbf16>
    %44 = arith.truncf %41 : vector<8x8xf32> to vector<8x8xbf16>
    %cst_19 = arith.constant dense<0.000000e+00> : vector<8x10xf32>
    %45 = tpu.matmul %44, %42, %cst_19 {dimension_numbers = #tpu.dot_dimension_numbers<[1], [1], [0], [0], [0, 0, 1, 0], [], []>} : vector<8x8xbf16>, vector<10x8xbf16>, vector<8x10xf32> -> vector<8x10xf32>
    %46 = arith.addf %45, %14 : vector<8x10xf32>
    %cst_20 = arith.constant dense<0xFF800000> : vector<8xf32>
    %47 = vector.multi_reduction <maximumf>, %46, %cst_20 [1] : vector<8x10xf32> to vector<8xf32>
    %48 = vector.shape_cast %47 : vector<8xf32> to vector<8x1xf32>
    %49 = vector.broadcast %48 : vector<8x1xf32> to vector<8x10xf32>
    %50 = arith.subf %46, %49 : vector<8x10xf32>
    %51 = math.exp %50 : vector<8x10xf32>
    %cst_21 = arith.constant dense<0.000000e+00> : vector<8xf32>
    %52 = vector.multi_reduction <add>, %51, %cst_21 [1] : vector<8x10xf32> to vector<8xf32>
    %53 = vector.shape_cast %52 : vector<8xf32> to vector<8x1xf32>
    %cst_22 = arith.constant 1.000000e+00 : f32
    %54 = vector.broadcast %cst_22 : f32 to vector<8x1xf32>
    %55 = arith.divf %54, %53 : vector<8x1xf32>
    %56 = arith.truncf %51 : vector<8x10xf32> to vector<8x10xbf16>
    %cst_23 = arith.constant dense<0.000000e+00> : vector<8x8xf32>
    %57 = tpu.matmul %56, %43, %cst_23 {dimension_numbers = #tpu.dot_dimension_numbers<[1], [0], [0], [1], [0, 0, 1, 1], [], []>} : vector<8x10xbf16>, vector<10x8xbf16>, vector<8x8xf32> -> vector<8x8xf32>
    %58 = vector.broadcast %55 : vector<8x1xf32> to vector<8x8xf32>
    %59 = arith.mulf %57, %58 : vector<8x8xf32>
    %c0_24 = arith.constant 0 : index
    %c8 = arith.constant 8 : index
    %60 = vector.load %arg11[%c0_24, %c8] : memref<8x32xf32, #tpu.memory_space<vmem>>, vector<8x8xf32>
    tpu.vector_store %arg11[%c0_24, %c8], %59 {strides = array<i32>} : memref<8x32xf32, #tpu.memory_space<vmem>>, vector<8x8xf32>,
    %61 = vector.extract_strided_slice %1 {offsets = [0, 16], sizes = [8, 8], strides = [1, 1]} : vector<8x32xbf16> to vector<8x8xbf16>
    %62 = arith.extf %61 : vector<8x8xbf16> to vector<8x8xf32>
    %cst_25 = arith.constant 0.353553385 : f32
    %63 = vector.broadcast %cst_25 : f32 to vector<8x8xf32>
    %64 = arith.mulf %62, %63 : vector<8x8xf32>
    %65 = vector.extract_strided_slice %4 {offsets = [0, 16], sizes = [10, 8], strides = [1, 1]} : vector<10x32xbf16> to vector<10x8xbf16>
    %66 = vector.extract_strided_slice %5 {offsets = [0, 16], sizes = [10, 8], strides = [1, 1]} : vector<10x32xbf16> to vector<10x8xbf16>
    %67 = arith.truncf %64 : vector<8x8xf32> to vector<8x8xbf16>
    %cst_26 = arith.constant dense<0.000000e+00> : vector<8x10xf32>
    %68 = tpu.matmul %67, %65, %cst_26 {dimension_numbers = #tpu.dot_dimension_numbers<[1], [1], [0], [0], [0, 0, 1, 0], [], []>} : vector<8x8xbf16>, vector<10x8xbf16>, vector<8x10xf32> -> vector<8x10xf32>
    %69 = arith.addf %68, %14 : vector<8x10xf32>
    %cst_27 = arith.constant dense<0xFF800000> : vector<8xf32>
    %70 = vector.multi_reduction <maximumf>, %69, %cst_27 [1] : vector<8x10xf32> to vector<8xf32>
    %71 = vector.shape_cast %70 : vector<8xf32> to vector<8x1xf32>
    %72 = vector.broadcast %71 : vector<8x1xf32> to vector<8x10xf32>
    %73 = arith.subf %69, %72 : vector<8x10xf32>
    %74 = math.exp %73 : vector<8x10xf32>
    %cst_28 = arith.constant dense<0.000000e+00> : vector<8xf32>
    %75 = vector.multi_reduction <add>, %74, %cst_28 [1] : vector<8x10xf32> to vector<8xf32>
    %76 = vector.shape_cast %75 : vector<8xf32> to vector<8x1xf32>
    %cst_29 = arith.constant 1.000000e+00 : f32
    %77 = vector.broadcast %cst_29 : f32 to vector<8x1xf32>
    %78 = arith.divf %77, %76 : vector<8x1xf32>
    %79 = arith.truncf %74 : vector<8x10xf32> to vector<8x10xbf16>
    %cst_30 = arith.constant dense<0.000000e+00> : vector<8x8xf32>
    %80 = tpu.matmul %79, %66, %cst_30 {dimension_numbers = #tpu.dot_dimension_numbers<[1], [0], [0], [1], [0, 0, 1, 1], [], []>} : vector<8x10xbf16>, vector<10x8xbf16>, vector<8x8xf32> -> vector<8x8xf32>
    %81 = vector.broadcast %78 : vector<8x1xf32> to vector<8x8xf32>
    %82 = arith.mulf %80, %81 : vector<8x8xf32>
    %c0_31 = arith.constant 0 : index
    %c16 = arith.constant 16 : index
    %83 = vector.load %arg11[%c0_31, %c16] : memref<8x32xf32, #tpu.memory_space<vmem>>, vector<8x8xf32>
    tpu.vector_store %arg11[%c0_31, %c16], %82 {strides = array<i32>} : memref<8x32xf32, #tpu.memory_space<vmem>>, vector<8x8xf32>,
    %84 = vector.extract_strided_slice %1 {offsets = [0, 24], sizes = [8, 8], strides = [1, 1]} : vector<8x32xbf16> to vector<8x8xbf16>
    %85 = arith.extf %84 : vector<8x8xbf16> to vector<8x8xf32>
    %cst_32 = arith.constant 0.353553385 : f32
    %86 = vector.broadcast %cst_32 : f32 to vector<8x8xf32>
    %87 = arith.mulf %85, %86 : vector<8x8xf32>
    %88 = vector.extract_strided_slice %4 {offsets = [0, 24], sizes = [10, 8], strides = [1, 1]} : vector<10x32xbf16> to vector<10x8xbf16>
    %89 = vector.extract_strided_slice %5 {offsets = [0, 24], sizes = [10, 8], strides = [1, 1]} : vector<10x32xbf16> to vector<10x8xbf16>
    %90 = arith.truncf %87 : vector<8x8xf32> to vector<8x8xbf16>
    %cst_33 = arith.constant dense<0.000000e+00> : vector<8x10xf32>
    %91 = tpu.matmul %90, %88, %cst_33 {dimension_numbers = #tpu.dot_dimension_numbers<[1], [1], [0], [0], [0, 0, 1, 0], [], []>} : vector<8x8xbf16>, vector<10x8xbf16>, vector<8x10xf32> -> vector<8x10xf32>
    %92 = arith.addf %91, %14 : vector<8x10xf32>
    %cst_34 = arith.constant dense<0xFF800000> : vector<8xf32>
    %93 = vector.multi_reduction <maximumf>, %92, %cst_34 [1] : vector<8x10xf32> to vector<8xf32>
    %94 = vector.shape_cast %93 : vector<8xf32> to vector<8x1xf32>
    %95 = vector.broadcast %94 : vector<8x1xf32> to vector<8x10xf32>
    %96 = arith.subf %92, %95 : vector<8x10xf32>
    %97 = math.exp %96 : vector<8x10xf32>
    %cst_35 = arith.constant dense<0.000000e+00> : vector<8xf32>
    %98 = vector.multi_reduction <add>, %97, %cst_35 [1] : vector<8x10xf32> to vector<8xf32>
    %99 = vector.shape_cast %98 : vector<8xf32> to vector<8x1xf32>
    %cst_36 = arith.constant 1.000000e+00 : f32
    %100 = vector.broadcast %cst_36 : f32 to vector<8x1xf32>
    %101 = arith.divf %100, %99 : vector<8x1xf32>
    %102 = arith.truncf %97 : vector<8x10xf32> to vector<8x10xbf16>
    %cst_37 = arith.constant dense<0.000000e+00> : vector<8x8xf32>
    %103 = tpu.matmul %102, %89, %cst_37 {dimension_numbers = #tpu.dot_dimension_numbers<[1], [0], [0], [1], [0, 0, 1, 1], [], []>} : vector<8x10xbf16>, vector<10x8xbf16>, vector<8x8xf32> -> vector<8x8xf32>
    %104 = vector.broadcast %101 : vector<8x1xf32> to vector<8x8xf32>
    %105 = arith.mulf %103, %104 : vector<8x8xf32>
    %c0_38 = arith.constant 0 : index
    %c24 = arith.constant 24 : index
    %106 = vector.load %arg11[%c0_38, %c24] : memref<8x32xf32, #tpu.memory_space<vmem>>, vector<8x8xf32>
    tpu.vector_store %arg11[%c0_38, %c24], %105 {strides = array<i32>} : memref<8x32xf32, #tpu.memory_space<vmem>>, vector<8x8xf32>,
    %c0_39 = arith.constant 0 : index
    %c0_40 = arith.constant 0 : index
    %107 = vector.load %arg11[%c0_39, %c0_40] : memref<8x32xf32, #tpu.memory_space<vmem>>, vector<8x32xf32>
    %108 = arith.truncf %107 : vector<8x32xf32> to vector<8x32xbf16>
    %c0_41 = arith.constant 0 : index
    %c0_42 = arith.constant 0 : index
    %109 = vector.load %arg5[%c0_41, %c0_42] : memref<32x32xbf16, #tpu.memory_space<vmem>>, vector<32x32xbf16>
    %cst_43 = arith.constant dense<0.000000e+00> : vector<8x32xf32>
    %110 = tpu.matmul %108, %109, %cst_43 {dimension_numbers = #tpu.dot_dimension_numbers<[1], [0], [0], [1], [0, 0, 1, 1], [], []>} : vector<8x32xbf16>, vector<32x32xbf16>, vector<8x32xf32> -> vector<8x32xf32>
    %c0_44 = arith.constant 0 : index
    %c0_45 = arith.constant 0 : index
    %111 = vector.load %arg6[%c0_44, %c0_45] : memref<1x32xf32, #tpu.memory_space<vmem>>, vector<1x32xf32>
    %112 = vector.broadcast %111 : vector<1x32xf32> to vector<8x32xf32>
    %113 = arith.addf %110, %112 : vector<8x32xf32>
    %c0_46 = arith.constant 0 : index
    %c0_47 = arith.constant 0 : index
    %c0_48 = arith.constant 0 : index
    %114 = vector.load %arg4[%c0_46, %c0_47, %c0_48] : memref<1x8x32xbf16, #tpu.memory_space<vmem>>, vector<1x8x32xbf16>
    %115 = vector.shape_cast %114 : vector<1x8x32xbf16> to vector<8x32xbf16>
    %116 = arith.extf %115 : vector<8x32xbf16> to vector<8x32xf32>
    %117 = arith.addf %113, %116 : vector<8x32xf32>
    %cst_49 = arith.constant dense<0.000000e+00> : vector<8xf32>
    %118 = vector.multi_reduction <add>, %117, %cst_49 [1] : vector<8x32xf32> to vector<8xf32>
    %119 = vector.shape_cast %118 : vector<8xf32> to vector<8x1xf32>
    %cst_50 = arith.constant 3.200000e+01 : f32
    %120 = vector.broadcast %cst_50 : f32 to vector<8x1xf32>
    %121 = arith.divf %119, %120 : vector<8x1xf32>
    %122 = vector.broadcast %121 : vector<8x1xf32> to vector<8x32xf32>
    %123 = arith.subf %117, %122 : vector<8x32xf32>
    %124 = arith.mulf %123, %123 : vector<8x32xf32>
    %cst_51 = arith.constant dense<0.000000e+00> : vector<8xf32>
    %125 = vector.multi_reduction <add>, %124, %cst_51 [1] : vector<8x32xf32> to vector<8xf32>
    %126 = vector.shape_cast %125 : vector<8xf32> to vector<8x1xf32>
    %cst_52 = arith.constant 3.200000e+01 : f32
    %127 = vector.broadcast %cst_52 : f32 to vector<8x1xf32>
    %128 = arith.divf %126, %127 : vector<8x1xf32>
    %129 = vector.broadcast %121 : vector<8x1xf32> to vector<8x32xf32>
    %130 = arith.subf %117, %129 : vector<8x32xf32>
    %cst_53 = arith.constant 9.99999974E-6 : f32
    %131 = vector.broadcast %cst_53 : f32 to vector<8x1xf32>
    %132 = arith.addf %128, %131 : vector<8x1xf32>
    %133 = math.rsqrt %132 : vector<8x1xf32>
    %134 = vector.broadcast %133 : vector<8x1xf32> to vector<8x32xf32>
    %135 = arith.mulf %130, %134 : vector<8x32xf32>
    %c0_54 = arith.constant 0 : index
    %c0_55 = arith.constant 0 : index
    %136 = vector.load %arg7[%c0_54, %c0_55] : memref<1x32xf32, #tpu.memory_space<vmem>>, vector<1x32xf32>
    %137 = vector.broadcast %136 : vector<1x32xf32> to vector<8x32xf32>
    %138 = arith.mulf %135, %137 : vector<8x32xf32>
    %c0_56 = arith.constant 0 : index
    %c0_57 = arith.constant 0 : index
    %139 = vector.load %arg8[%c0_56, %c0_57] : memref<1x32xf32, #tpu.memory_space<vmem>>, vector<1x32xf32>
    %140 = vector.broadcast %139 : vector<1x32xf32> to vector<8x32xf32>
    %141 = arith.addf %138, %140 : vector<8x32xf32>
    %c0_58 = arith.constant 0 : index
    %c0_59 = arith.constant 0 : index
    %c0_60 = arith.constant 0 : index
    %142 = vector.load %arg9[%c0_58, %c0_59, %c0_60] : memref<1x8x1xf32, #tpu.memory_space<vmem>>, vector<1x8x1xf32>
    %143 = vector.shape_cast %142 : vector<1x8x1xf32> to vector<8x1xf32>
    %cst_61 = arith.constant 1.000000e+00 : f32
    %144 = vector.broadcast %cst_61 : f32 to vector<8x1xf32>
    %145 = arith.subf %144, %143 : vector<8x1xf32>
    %146 = vector.broadcast %145 : vector<8x1xf32> to vector<8x32xf32>
    %147 = arith.mulf %141, %146 : vector<8x32xf32>
    %148 = arith.truncf %147 : vector<8x32xf32> to vector<8x32xbf16>
    %c0_62 = arith.constant 0 : index
    %c0_63 = arith.constant 0 : index
    %c0_64 = arith.constant 0 : index
    %149 = vector.load %arg10[%c0_62, %c0_63, %c0_64] : memref<1x8x32xbf16, #tpu.memory_space<vmem>>, vector<1x8x32xbf16>
    %150 = vector.shape_cast %149 : vector<1x8x32xbf16> to vector<8x32xbf16>
    %151 = vector.shape_cast %148 : vector<8x32xbf16> to vector<1x8x32xbf16>
    tpu.vector_store %arg10[%c0_62, %c0_63, %c0_64], %151 {strides = array<i32>} : memref<1x8x32xbf16, #tpu.memory_space<vmem>>, vector<1x8x32xbf16>,
    return
  }
  func.func @transform_0(%arg0: i32) -> (i32, i32, i32) {
    %c0_i32 = arith.constant 0 : i32
    %c0_i32_0 = arith.constant 0 : i32
    %c0_i32_1 = arith.constant 0 : i32
    return %arg0, %c0_i32, %c0_i32_0 : i32, i32, i32
  }
  func.func @transform_1(%arg0: i32) -> (i32, i32, i32) {
    %c0_i32 = arith.constant 0 : i32
    %c0_i32_0 = arith.constant 0 : i32
    %c0_i32_1 = arith.constant 0 : i32
    return %arg0, %c0_i32, %c0_i32_0 : i32, i32, i32
  }
  func.func @transform_2(%arg0: i32) -> (i32, i32, i32) {
    %c0_i32 = arith.constant 0 : i32
    %c0_i32_0 = arith.constant 0 : i32
    %c0_i32_1 = arith.constant 0 : i32
    return %arg0, %c0_i32, %c0_i32_0 : i32, i32, i32
  }
  func.func @transform_3(%arg0: i32) -> (i32, i32, i32) {
    %c0_i32 = arith.constant 0 : i32
    %c0_i32_0 = arith.constant 0 : i32
    %c0_i32_1 = arith.constant 0 : i32
    return %arg0, %c0_i32, %c0_i32_0 : i32, i32, i32
  }
  func.func @transform_4(%arg0: i32) -> (i32, i32) {
    %c0_i32 = arith.constant 0 : i32
    %c0_i32_0 = arith.constant 0 : i32
    %c0_i32_1 = arith.constant 0 : i32
    return %c0_i32, %c0_i32_0 : i32, i32
  }
  func.func @transform_5(%arg0: i32) -> (i32, i32) {
    %c0_i32 = arith.constant 0 : i32
    %c0_i32_0 = arith.constant 0 : i32
    %c0_i32_1 = arith.constant 0 : i32
    return %c0_i32, %c0_i32_0 : i32, i32
  }
  func.func @transform_6(%arg0: i32) -> (i32, i32) {
    %c0_i32 = arith.constant 0 : i32
    %c0_i32_0 = arith.constant 0 : i32
    %c0_i32_1 = arith.constant 0 : i32
    return %c0_i32, %c0_i32_0 : i32, i32
  }
  func.func @transform_7(%arg0: i32) -> (i32, i32) {
    %c0_i32 = arith.constant 0 : i32
    %c0_i32_0 = arith.constant 0 : i32
    %c0_i32_1 = arith.constant 0 : i32
    return %c0_i32, %c0_i32_0 : i32, i32
  }
  func.func @transform_8(%arg0: i32) -> (i32, i32, i32) {
    %c0_i32 = arith.constant 0 : i32
    %c0_i32_0 = arith.constant 0 : i32
    %c0_i32_1 = arith.constant 0 : i32
    return %arg0, %c0_i32, %c0_i32_0 : i32, i32, i32
  }
  func.func @transform_9(%arg0: i32) -> (i32, i32, i32) {
    %c0_i32 = arith.constant 0 : i32
    %c0_i32_0 = arith.constant 0 : i32
    %c0_i32_1 = arith.constant 0 : i32
    return %arg0, %c0_i32, %c0_i32_0 : i32, i32, i32
  }
}

module attributes {stable_mosaic.version = 11 : i64} {
  func.func @_ffn2_res_ln_kernel(%arg0: i32, %arg1: i32, %arg2: memref<16x64xbf16, #tpu.memory_space<vmem>>, %arg3: memref<64x32xbf16, #tpu.memory_space<vmem>>, %arg4: memref<1x32xf32, #tpu.memory_space<vmem>>, %arg5: memref<16x32xbf16, #tpu.memory_space<vmem>>, %arg6: memref<1x32xf32, #tpu.memory_space<vmem>>, %arg7: memref<1x32xf32, #tpu.memory_space<vmem>>, %arg8: memref<16x1xf32, #tpu.memory_space<vmem>>, %arg9: memref<16x32xbf16, #tpu.memory_space<vmem>>, %arg10: memref<16x32xf32, #tpu.memory_space<vmem>>) attributes {dimension_semantics = [#tpu.dimension_semantics<parallel>, #tpu.dimension_semantics<arbitrary>], iteration_bounds = array<i64: 1, 1>, scalar_prefetch = 0 : i64, scratch_operands = 1 : i64, tpu.core_type = #tpu.core_type<tc>, window_params = [{transform_indices = @transform_0, window_bounds = array<i64: 16, 64>}, {transform_indices = @transform_1, window_bounds = array<i64: 64, 32>}, {pipeline_mode = #tpu.pipeline_mode<synchronous>, transform_indices = @transform_2, window_bounds = array<i64: 1, 32>}, {transform_indices = @transform_3, window_bounds = array<i64: 16, 32>}, {pipeline_mode = #tpu.pipeline_mode<synchronous>, transform_indices = @transform_4, window_bounds = array<i64: 1, 32>}, {pipeline_mode = #tpu.pipeline_mode<synchronous>, transform_indices = @transform_5, window_bounds = array<i64: 1, 32>}, {transform_indices = @transform_6, window_bounds = array<i64: 16, 1>}, {transform_indices = @transform_7, window_bounds = array<i64: 16, 32>}]} {
    %c0_i32 = arith.constant 0 : i32
    %0 = arith.cmpi eq, %arg1, %c0_i32 : i32
    %1 = arith.extui %0 : i1 to i32
    %c0_i32_0 = arith.constant 0 : i32
    %2 = arith.cmpi ne, %1, %c0_i32_0 : i32
    scf.if %2 {
      %cst_10 = arith.constant 0.000000e+00 : f32
      %12 = vector.broadcast %cst_10 : f32 to vector<16x32xf32>
      %c0_11 = arith.constant 0 : index
      %c0_12 = arith.constant 0 : index
      %13 = vector.load %arg10[%c0_11, %c0_12] : memref<16x32xf32, #tpu.memory_space<vmem>>, vector<16x32xf32>
      tpu.vector_store %arg10[%c0_11, %c0_12], %12 {strides = array<i32>} : memref<16x32xf32, #tpu.memory_space<vmem>>, vector<16x32xf32>,
    } else {
    }
    %c0 = arith.constant 0 : index
    %c0_1 = arith.constant 0 : index
    %3 = vector.load %arg10[%c0, %c0_1] : memref<16x32xf32, #tpu.memory_space<vmem>>, vector<16x32xf32>
    %c0_2 = arith.constant 0 : index
    %c0_3 = arith.constant 0 : index
    %4 = vector.load %arg2[%c0_2, %c0_3] : memref<16x64xbf16, #tpu.memory_space<vmem>>, vector<16x64xbf16>
    %c0_4 = arith.constant 0 : index
    %c0_5 = arith.constant 0 : index
    %5 = vector.load %arg3[%c0_4, %c0_5] : memref<64x32xbf16, #tpu.memory_space<vmem>>, vector<64x32xbf16>
    %cst = arith.constant dense<0.000000e+00> : vector<16x32xf32>
    %6 = tpu.matmul %4, %5, %cst {dimension_numbers = #tpu.dot_dimension_numbers<[1], [0], [0], [1], [0, 0, 1, 1], [], []>} : vector<16x64xbf16>, vector<64x32xbf16>, vector<16x32xf32> -> vector<16x32xf32>
    %7 = arith.addf %3, %6 : vector<16x32xf32>
    %c0_6 = arith.constant 0 : index
    %c0_7 = arith.constant 0 : index
    %8 = vector.load %arg10[%c0_6, %c0_7] : memref<16x32xf32, #tpu.memory_space<vmem>>, vector<16x32xf32>
    tpu.vector_store %arg10[%c0_6, %c0_7], %7 {strides = array<i32>} : memref<16x32xf32, #tpu.memory_space<vmem>>, vector<16x32xf32>,
    %c0_i32_8 = arith.constant 0 : i32
    %9 = arith.cmpi eq, %arg1, %c0_i32_8 : i32
    %10 = arith.extui %9 : i1 to i32
    %c0_i32_9 = arith.constant 0 : i32
    %11 = arith.cmpi ne, %10, %c0_i32_9 : i32
    scf.if %11 {
      %c0_10 = arith.constant 0 : index
      %c0_11 = arith.constant 0 : index
      %12 = vector.load %arg10[%c0_10, %c0_11] : memref<16x32xf32, #tpu.memory_space<vmem>>, vector<16x32xf32>
      %c0_12 = arith.constant 0 : index
      %c0_13 = arith.constant 0 : index
      %13 = vector.load %arg4[%c0_12, %c0_13] : memref<1x32xf32, #tpu.memory_space<vmem>>, vector<1x32xf32>
      %14 = vector.broadcast %13 : vector<1x32xf32> to vector<16x32xf32>
      %15 = arith.addf %12, %14 : vector<16x32xf32>
      %c0_14 = arith.constant 0 : index
      %c0_15 = arith.constant 0 : index
      %16 = vector.load %arg5[%c0_14, %c0_15] : memref<16x32xbf16, #tpu.memory_space<vmem>>, vector<16x32xbf16>
      %17 = arith.extf %16 : vector<16x32xbf16> to vector<16x32xf32>
      %18 = arith.addf %15, %17 : vector<16x32xf32>
      %cst_16 = arith.constant dense<0.000000e+00> : vector<16xf32>
      %19 = vector.multi_reduction <add>, %18, %cst_16 [1] : vector<16x32xf32> to vector<16xf32>
      %20 = vector.shape_cast %19 : vector<16xf32> to vector<16x1xf32>
      %cst_17 = arith.constant 3.200000e+01 : f32
      %21 = vector.broadcast %cst_17 : f32 to vector<16x1xf32>
      %22 = arith.divf %20, %21 : vector<16x1xf32>
      %23 = vector.broadcast %22 : vector<16x1xf32> to vector<16x32xf32>
      %24 = arith.subf %18, %23 : vector<16x32xf32>
      %25 = arith.mulf %24, %24 : vector<16x32xf32>
      %cst_18 = arith.constant dense<0.000000e+00> : vector<16xf32>
      %26 = vector.multi_reduction <add>, %25, %cst_18 [1] : vector<16x32xf32> to vector<16xf32>
      %27 = vector.shape_cast %26 : vector<16xf32> to vector<16x1xf32>
      %cst_19 = arith.constant 3.200000e+01 : f32
      %28 = vector.broadcast %cst_19 : f32 to vector<16x1xf32>
      %29 = arith.divf %27, %28 : vector<16x1xf32>
      %30 = vector.broadcast %22 : vector<16x1xf32> to vector<16x32xf32>
      %31 = arith.subf %18, %30 : vector<16x32xf32>
      %cst_20 = arith.constant 9.99999974E-6 : f32
      %32 = vector.broadcast %cst_20 : f32 to vector<16x1xf32>
      %33 = arith.addf %29, %32 : vector<16x1xf32>
      %34 = math.rsqrt %33 : vector<16x1xf32>
      %35 = vector.broadcast %34 : vector<16x1xf32> to vector<16x32xf32>
      %36 = arith.mulf %31, %35 : vector<16x32xf32>
      %c0_21 = arith.constant 0 : index
      %c0_22 = arith.constant 0 : index
      %37 = vector.load %arg6[%c0_21, %c0_22] : memref<1x32xf32, #tpu.memory_space<vmem>>, vector<1x32xf32>
      %38 = vector.broadcast %37 : vector<1x32xf32> to vector<16x32xf32>
      %39 = arith.mulf %36, %38 : vector<16x32xf32>
      %c0_23 = arith.constant 0 : index
      %c0_24 = arith.constant 0 : index
      %40 = vector.load %arg7[%c0_23, %c0_24] : memref<1x32xf32, #tpu.memory_space<vmem>>, vector<1x32xf32>
      %41 = vector.broadcast %40 : vector<1x32xf32> to vector<16x32xf32>
      %42 = arith.addf %39, %41 : vector<16x32xf32>
      %43 = arith.truncf %42 : vector<16x32xf32> to vector<16x32xbf16>
      %c0_25 = arith.constant 0 : index
      %c0_26 = arith.constant 0 : index
      %44 = vector.load %arg9[%c0_25, %c0_26] : memref<16x32xbf16, #tpu.memory_space<vmem>>, vector<16x32xbf16>
      tpu.vector_store %arg9[%c0_25, %c0_26], %43 {strides = array<i32>} : memref<16x32xbf16, #tpu.memory_space<vmem>>, vector<16x32xbf16>,
    } else {
    }
    return
  }
  func.func @transform_0(%arg0: i32, %arg1: i32) -> (i32, i32) {
    %c0_i32 = arith.constant 0 : i32
    return %arg0, %arg1 : i32, i32
  }
  func.func @transform_1(%arg0: i32, %arg1: i32) -> (i32, i32) {
    %c0_i32 = arith.constant 0 : i32
    %c0_i32_0 = arith.constant 0 : i32
    return %arg1, %c0_i32 : i32, i32
  }
  func.func @transform_2(%arg0: i32, %arg1: i32) -> (i32, i32) {
    %c0_i32 = arith.constant 0 : i32
    %c0_i32_0 = arith.constant 0 : i32
    %c0_i32_1 = arith.constant 0 : i32
    return %c0_i32, %c0_i32_0 : i32, i32
  }
  func.func @transform_3(%arg0: i32, %arg1: i32) -> (i32, i32) {
    %c0_i32 = arith.constant 0 : i32
    %c0_i32_0 = arith.constant 0 : i32
    return %arg0, %c0_i32 : i32, i32
  }
  func.func @transform_4(%arg0: i32, %arg1: i32) -> (i32, i32) {
    %c0_i32 = arith.constant 0 : i32
    %c0_i32_0 = arith.constant 0 : i32
    %c0_i32_1 = arith.constant 0 : i32
    return %c0_i32, %c0_i32_0 : i32, i32
  }
  func.func @transform_5(%arg0: i32, %arg1: i32) -> (i32, i32) {
    %c0_i32 = arith.constant 0 : i32
    %c0_i32_0 = arith.constant 0 : i32
    %c0_i32_1 = arith.constant 0 : i32
    return %c0_i32, %c0_i32_0 : i32, i32
  }
  func.func @transform_6(%arg0: i32, %arg1: i32) -> (i32, i32) {
    %c0_i32 = arith.constant 0 : i32
    %c0_i32_0 = arith.constant 0 : i32
    return %arg0, %c0_i32 : i32, i32
  }
  func.func @transform_7(%arg0: i32, %arg1: i32) -> (i32, i32) {
    %c0_i32 = arith.constant 0 : i32
    %c0_i32_0 = arith.constant 0 : i32
    return %arg0, %c0_i32 : i32, i32
  }
}

module attributes {stable_mosaic.version = 11 : i64} {
  func.func @_matmul_kernel(%arg0: i32, %arg1: i32, %arg2: i32, %arg3: memref<16x32xbf16, #tpu.memory_space<vmem>>, %arg4: memref<32x64xbf16, #tpu.memory_space<vmem>>, %arg5: memref<1x64xf32, #tpu.memory_space<vmem>>, %arg6: memref<16x64xbf16, #tpu.memory_space<vmem>>, %arg7: memref<16x64xf32, #tpu.memory_space<vmem>>) attributes {dimension_semantics = [#tpu.dimension_semantics<parallel>, #tpu.dimension_semantics<parallel>, #tpu.dimension_semantics<arbitrary>], iteration_bounds = array<i64: 1, 1, 1>, scalar_prefetch = 0 : i64, scratch_operands = 1 : i64, tpu.core_type = #tpu.core_type<tc>, window_params = [{transform_indices = @transform_0, window_bounds = array<i64: 16, 32>}, {transform_indices = @transform_1, window_bounds = array<i64: 32, 64>}, {transform_indices = @transform_2, window_bounds = array<i64: 1, 64>}, {transform_indices = @transform_3, window_bounds = array<i64: 16, 64>}]} {
    %c0_i32 = arith.constant 0 : i32
    %0 = arith.cmpi eq, %arg2, %c0_i32 : i32
    %1 = arith.extui %0 : i1 to i32
    %c0_i32_0 = arith.constant 0 : i32
    %2 = arith.cmpi ne, %1, %c0_i32_0 : i32
    scf.if %2 {
      %cst_10 = arith.constant 0.000000e+00 : f32
      %12 = vector.broadcast %cst_10 : f32 to vector<16x64xf32>
      %c0_11 = arith.constant 0 : index
      %c0_12 = arith.constant 0 : index
      %13 = vector.load %arg7[%c0_11, %c0_12] : memref<16x64xf32, #tpu.memory_space<vmem>>, vector<16x64xf32>
      tpu.vector_store %arg7[%c0_11, %c0_12], %12 {strides = array<i32>} : memref<16x64xf32, #tpu.memory_space<vmem>>, vector<16x64xf32>,
    } else {
    }
    %c0 = arith.constant 0 : index
    %c0_1 = arith.constant 0 : index
    %3 = vector.load %arg7[%c0, %c0_1] : memref<16x64xf32, #tpu.memory_space<vmem>>, vector<16x64xf32>
    %c0_2 = arith.constant 0 : index
    %c0_3 = arith.constant 0 : index
    %4 = vector.load %arg3[%c0_2, %c0_3] : memref<16x32xbf16, #tpu.memory_space<vmem>>, vector<16x32xbf16>
    %c0_4 = arith.constant 0 : index
    %c0_5 = arith.constant 0 : index
    %5 = vector.load %arg4[%c0_4, %c0_5] : memref<32x64xbf16, #tpu.memory_space<vmem>>, vector<32x64xbf16>
    %cst = arith.constant dense<0.000000e+00> : vector<16x64xf32>
    %6 = tpu.matmul %4, %5, %cst {dimension_numbers = #tpu.dot_dimension_numbers<[1], [0], [0], [1], [0, 0, 1, 1], [], []>} : vector<16x32xbf16>, vector<32x64xbf16>, vector<16x64xf32> -> vector<16x64xf32>
    %7 = arith.addf %3, %6 : vector<16x64xf32>
    %c0_6 = arith.constant 0 : index
    %c0_7 = arith.constant 0 : index
    %8 = vector.load %arg7[%c0_6, %c0_7] : memref<16x64xf32, #tpu.memory_space<vmem>>, vector<16x64xf32>
    tpu.vector_store %arg7[%c0_6, %c0_7], %7 {strides = array<i32>} : memref<16x64xf32, #tpu.memory_space<vmem>>, vector<16x64xf32>,
    %c0_i32_8 = arith.constant 0 : i32
    %9 = arith.cmpi eq, %arg2, %c0_i32_8 : i32
    %10 = arith.extui %9 : i1 to i32
    %c0_i32_9 = arith.constant 0 : i32
    %11 = arith.cmpi ne, %10, %c0_i32_9 : i32
    scf.if %11 {
      %c0_10 = arith.constant 0 : index
      %c0_11 = arith.constant 0 : index
      %12 = vector.load %arg7[%c0_10, %c0_11] : memref<16x64xf32, #tpu.memory_space<vmem>>, vector<16x64xf32>
      %c0_12 = arith.constant 0 : index
      %c0_13 = arith.constant 0 : index
      %13 = vector.load %arg5[%c0_12, %c0_13] : memref<1x64xf32, #tpu.memory_space<vmem>>, vector<1x64xf32>
      %14 = vector.broadcast %13 : vector<1x64xf32> to vector<16x64xf32>
      %15 = arith.addf %12, %14 : vector<16x64xf32>
      %16 = arith.truncf %15 : vector<16x64xf32> to vector<16x64xbf16>
      %c0_14 = arith.constant 0 : index
      %c0_15 = arith.constant 0 : index
      %17 = vector.load %arg6[%c0_14, %c0_15] : memref<16x64xbf16, #tpu.memory_space<vmem>>, vector<16x64xbf16>
      tpu.vector_store %arg6[%c0_14, %c0_15], %16 {strides = array<i32>} : memref<16x64xbf16, #tpu.memory_space<vmem>>, vector<16x64xbf16>,
    } else {
    }
    return
  }
  func.func @transform_0(%arg0: i32, %arg1: i32, %arg2: i32) -> (i32, i32) {
    %c0_i32 = arith.constant 0 : i32
    return %arg0, %arg2 : i32, i32
  }
  func.func @transform_1(%arg0: i32, %arg1: i32, %arg2: i32) -> (i32, i32) {
    %c0_i32 = arith.constant 0 : i32
    return %arg2, %arg1 : i32, i32
  }
  func.func @transform_2(%arg0: i32, %arg1: i32, %arg2: i32) -> (i32, i32) {
    %c0_i32 = arith.constant 0 : i32
    %c0_i32_0 = arith.constant 0 : i32
    return %c0_i32, %arg1 : i32, i32
  }
  func.func @transform_3(%arg0: i32, %arg1: i32, %arg2: i32) -> (i32, i32) {
    %c0_i32 = arith.constant 0 : i32
    return %arg0, %arg1 : i32, i32
  }
}

module attributes {stable_mosaic.version = 11 : i64} {
  func.func @_mha_kernel(%arg0: i32, %arg1: memref<1x8x32xbf16, #tpu.memory_space<vmem>>, %arg2: memref<1x10x64xbf16, #tpu.memory_space<vmem>>, %arg3: memref<1x8x64xbf16, #tpu.memory_space<vmem>>, %arg4: memref<1x1x10xf32, #tpu.memory_space<vmem>>, %arg5: memref<1x8x32xbf16, #tpu.memory_space<vmem>>, %arg6: memref<32x32xbf16, #tpu.memory_space<vmem>>, %arg7: memref<1x32xf32, #tpu.memory_space<vmem>>, %arg8: memref<1x32xf32, #tpu.memory_space<vmem>>, %arg9: memref<1x32xf32, #tpu.memory_space<vmem>>, %arg10: memref<1x8x1xf32, #tpu.memory_space<vmem>>, %arg11: memref<1x8x32xbf16, #tpu.memory_space<vmem>>, %arg12: memref<8x32xf32, #tpu.memory_space<vmem>>) attributes {dimension_semantics = [#tpu.dimension_semantics<parallel>], iteration_bounds = array<i64: 2>, scalar_prefetch = 0 : i64, scratch_operands = 1 : i64, tpu.core_type = #tpu.core_type<tc>, window_params = [{transform_indices = @transform_0, window_bounds = array<i64: 1, 8, 32>}, {transform_indices = @transform_1, window_bounds = array<i64: 1, 10, 64>}, {transform_indices = @transform_2, window_bounds = array<i64: 1, 8, 64>}, {transform_indices = @transform_3, window_bounds = array<i64: 1, 1, 10>}, {transform_indices = @transform_4, window_bounds = array<i64: 1, 8, 32>}, {pipeline_mode = #tpu.pipeline_mode<synchronous>, transform_indices = @transform_5, window_bounds = array<i64: 32, 32>}, {pipeline_mode = #tpu.pipeline_mode<synchronous>, transform_indices = @transform_6, window_bounds = array<i64: 1, 32>}, {pipeline_mode = #tpu.pipeline_mode<synchronous>, transform_indices = @transform_7, window_bounds = array<i64: 1, 32>}, {pipeline_mode = #tpu.pipeline_mode<synchronous>, transform_indices = @transform_8, window_bounds = array<i64: 1, 32>}, {transform_indices = @transform_9, window_bounds = array<i64: 1, 8, 1>}, {transform_indices = @transform_10, window_bounds = array<i64: 1, 8, 32>}]} {
    %c0 = arith.constant 0 : index
    %c0_0 = arith.constant 0 : index
    %c0_1 = arith.constant 0 : index
    %0 = vector.load %arg1[%c0, %c0_0, %c0_1] : memref<1x8x32xbf16, #tpu.memory_space<vmem>>, vector<1x8x32xbf16>
    %1 = vector.shape_cast %0 : vector<1x8x32xbf16> to vector<8x32xbf16>
    %c0_2 = arith.constant 0 : index
    %c0_3 = arith.constant 0 : index
    %c0_4 = arith.constant 0 : index
    %2 = vector.load %arg2[%c0_2, %c0_3, %c0_4] : memref<1x10x64xbf16, #tpu.memory_space<vmem>>, vector<1x10x64xbf16>
    %3 = vector.shape_cast %2 : vector<1x10x64xbf16> to vector<10x64xbf16>
    %4 = vector.extract_strided_slice %3 {offsets = [0, 0], sizes = [10, 32], strides = [1, 1]} : vector<10x64xbf16> to vector<10x32xbf16>
    %5 = vector.extract_strided_slice %3 {offsets = [0, 32], sizes = [10, 32], strides = [1, 1]} : vector<10x64xbf16> to vector<10x32xbf16>
    %c0_5 = arith.constant 0 : index
    %c0_6 = arith.constant 0 : index
    %c0_7 = arith.constant 0 : index
    %6 = vector.load %arg3[%c0_5, %c0_6, %c0_7] : memref<1x8x64xbf16, #tpu.memory_space<vmem>>, vector<1x8x64xbf16>
    %7 = vector.shape_cast %6 : vector<1x8x64xbf16> to vector<8x64xbf16>
    %8 = vector.extract_strided_slice %7 {offsets = [0, 0], sizes = [8, 32], strides = [1, 1]} : vector<8x64xbf16> to vector<8x32xbf16>
    %9 = vector.extract_strided_slice %7 {offsets = [0, 32], sizes = [8, 32], strides = [1, 1]} : vector<8x64xbf16> to vector<8x32xbf16>
    %c0_8 = arith.constant 0 : index
    %c0_9 = arith.constant 0 : index
    %c0_10 = arith.constant 0 : index
    %10 = vector.load %arg4[%c0_8, %c0_9, %c0_10] : memref<1x1x10xf32, #tpu.memory_space<vmem>>, vector<1x1x10xf32>
    %11 = vector.shape_cast %10 : vector<1x1x10xf32> to vector<1x10xf32>
    %cst = arith.constant 5.000000e-01 : f32
    %12 = vector.broadcast %cst : f32 to vector<1x10xf32>
    %13 = arith.cmpf ogt, %11, %12 : vector<1x10xf32>
    %cst_11 = arith.constant -1.000000e+30 : f32
    %cst_12 = arith.constant 0.000000e+00 : f32
    %14 = vector.broadcast %cst_11 : f32 to vector<1x10xf32>
    %15 = vector.broadcast %cst_12 : f32 to vector<1x10xf32>
    %16 = arith.select %13, %14, %15 : vector<1x10xi1>, vector<1x10xf32>
    %17 = vector.shape_cast %16 : vector<1x10xf32> to vector<1x10xf32>
    %18 = vector.broadcast %17 : vector<1x10xf32> to vector<8x10xf32>
    %19 = vector.extract_strided_slice %1 {offsets = [0, 0], sizes = [8, 8], strides = [1, 1]} : vector<8x32xbf16> to vector<8x8xbf16>
    %20 = arith.extf %19 : vector<8x8xbf16> to vector<8x8xf32>
    %cst_13 = arith.constant 0.353553385 : f32
    %21 = vector.broadcast %cst_13 : f32 to vector<8x8xf32>
    %22 = arith.mulf %20, %21 : vector<8x8xf32>
    %23 = vector.extract_strided_slice %4 {offsets = [0, 0], sizes = [10, 8], strides = [1, 1]} : vector<10x32xbf16> to vector<10x8xbf16>
    %24 = vector.extract_strided_slice %5 {offsets = [0, 0], sizes = [10, 8], strides = [1, 1]} : vector<10x32xbf16> to vector<10x8xbf16>
    %25 = arith.truncf %22 : vector<8x8xf32> to vector<8x8xbf16>
    %cst_14 = arith.constant dense<0.000000e+00> : vector<8x10xf32>
    %26 = tpu.matmul %25, %23, %cst_14 {dimension_numbers = #tpu.dot_dimension_numbers<[1], [1], [0], [0], [0, 0, 1, 0], [], []>} : vector<8x8xbf16>, vector<10x8xbf16>, vector<8x10xf32> -> vector<8x10xf32>
    %27 = arith.addf %26, %18 : vector<8x10xf32>
    %28 = vector.extract_strided_slice %8 {offsets = [0, 0], sizes = [8, 8], strides = [1, 1]} : vector<8x32xbf16> to vector<8x8xbf16>
    %29 = arith.extf %28 : vector<8x8xbf16> to vector<8x8xf32>
    %30 = vector.extract_strided_slice %9 {offsets = [0, 0], sizes = [8, 8], strides = [1, 1]} : vector<8x32xbf16> to vector<8x8xbf16>
    %31 = arith.extf %30 : vector<8x8xbf16> to vector<8x8xf32>
    %32 = arith.mulf %22, %29 : vector<8x8xf32>
    %cst_15 = arith.constant dense<0.000000e+00> : vector<8xf32>
    %33 = vector.multi_reduction <add>, %32, %cst_15 [1] : vector<8x8xf32> to vector<8xf32>
    %34 = vector.shape_cast %33 : vector<8xf32> to vector<8x1xf32>
    %cst_16 = arith.constant dense<0xFF800000> : vector<8xf32>
    %35 = vector.multi_reduction <maximumf>, %27, %cst_16 [1] : vector<8x10xf32> to vector<8xf32>
    %36 = vector.shape_cast %35 : vector<8xf32> to vector<8x1xf32>
    %37 = arith.maximumf %36, %34 : vector<8x1xf32>
    %38 = vector.broadcast %37 : vector<8x1xf32> to vector<8x10xf32>
    %39 = arith.subf %27, %38 : vector<8x10xf32>
    %40 = math.exp %39 : vector<8x10xf32>
    %41 = arith.subf %34, %37 : vector<8x1xf32>
    %42 = math.exp %41 : vector<8x1xf32>
    %cst_17 = arith.constant dense<0.000000e+00> : vector<8xf32>
    %43 = vector.multi_reduction <add>, %40, %cst_17 [1] : vector<8x10xf32> to vector<8xf32>
    %44 = vector.shape_cast %43 : vector<8xf32> to vector<8x1xf32>
    %45 = arith.addf %44, %42 : vector<8x1xf32>
    %cst_18 = arith.constant 1.000000e+00 : f32
    %46 = vector.broadcast %cst_18 : f32 to vector<8x1xf32>
    %47 = arith.divf %46, %45 : vector<8x1xf32>
    %48 = arith.truncf %40 : vector<8x10xf32> to vector<8x10xbf16>
    %cst_19 = arith.constant dense<0.000000e+00> : vector<8x8xf32>
    %49 = tpu.matmul %48, %24, %cst_19 {dimension_numbers = #tpu.dot_dimension_numbers<[1], [0], [0], [1], [0, 0, 1, 1], [], []>} : vector<8x10xbf16>, vector<10x8xbf16>, vector<8x8xf32> -> vector<8x8xf32>
    %50 = vector.broadcast %42 : vector<8x1xf32> to vector<8x8xf32>
    %51 = arith.mulf %50, %31 : vector<8x8xf32>
    %52 = arith.addf %49, %51 : vector<8x8xf32>
    %53 = vector.broadcast %47 : vector<8x1xf32> to vector<8x8xf32>
    %54 = arith.mulf %52, %53 : vector<8x8xf32>
    %c0_20 = arith.constant 0 : index
    %c0_21 = arith.constant 0 : index
    %55 = vector.load %arg12[%c0_20, %c0_21] : memref<8x32xf32, #tpu.memory_space<vmem>>, vector<8x8xf32>
    tpu.vector_store %arg12[%c0_20, %c0_21], %54 {strides = array<i32>} : memref<8x32xf32, #tpu.memory_space<vmem>>, vector<8x8xf32>,
    %56 = vector.extract_strided_slice %1 {offsets = [0, 8], sizes = [8, 8], strides = [1, 1]} : vector<8x32xbf16> to vector<8x8xbf16>
    %57 = arith.extf %56 : vector<8x8xbf16> to vector<8x8xf32>
    %cst_22 = arith.constant 0.353553385 : f32
    %58 = vector.broadcast %cst_22 : f32 to vector<8x8xf32>
    %59 = arith.mulf %57, %58 : vector<8x8xf32>
    %60 = vector.extract_strided_slice %4 {offsets = [0, 8], sizes = [10, 8], strides = [1, 1]} : vector<10x32xbf16> to vector<10x8xbf16>
    %61 = vector.extract_strided_slice %5 {offsets = [0, 8], sizes = [10, 8], strides = [1, 1]} : vector<10x32xbf16> to vector<10x8xbf16>
    %62 = arith.truncf %59 : vector<8x8xf32> to vector<8x8xbf16>
    %cst_23 = arith.constant dense<0.000000e+00> : vector<8x10xf32>
    %63 = tpu.matmul %62, %60, %cst_23 {dimension_numbers = #tpu.dot_dimension_numbers<[1], [1], [0], [0], [0, 0, 1, 0], [], []>} : vector<8x8xbf16>, vector<10x8xbf16>, vector<8x10xf32> -> vector<8x10xf32>
    %64 = arith.addf %63, %18 : vector<8x10xf32>
    %65 = vector.extract_strided_slice %8 {offsets = [0, 8], sizes = [8, 8], strides = [1, 1]} : vector<8x32xbf16> to vector<8x8xbf16>
    %66 = arith.extf %65 : vector<8x8xbf16> to vector<8x8xf32>
    %67 = vector.extract_strided_slice %9 {offsets = [0, 8], sizes = [8, 8], strides = [1, 1]} : vector<8x32xbf16> to vector<8x8xbf16>
    %68 = arith.extf %67 : vector<8x8xbf16> to vector<8x8xf32>
    %69 = arith.mulf %59, %66 : vector<8x8xf32>
    %cst_24 = arith.constant dense<0.000000e+00> : vector<8xf32>
    %70 = vector.multi_reduction <add>, %69, %cst_24 [1] : vector<8x8xf32> to vector<8xf32>
    %71 = vector.shape_cast %70 : vector<8xf32> to vector<8x1xf32>
    %cst_25 = arith.constant dense<0xFF800000> : vector<8xf32>
    %72 = vector.multi_reduction <maximumf>, %64, %cst_25 [1] : vector<8x10xf32> to vector<8xf32>
    %73 = vector.shape_cast %72 : vector<8xf32> to vector<8x1xf32>
    %74 = arith.maximumf %73, %71 : vector<8x1xf32>
    %75 = vector.broadcast %74 : vector<8x1xf32> to vector<8x10xf32>
    %76 = arith.subf %64, %75 : vector<8x10xf32>
    %77 = math.exp %76 : vector<8x10xf32>
    %78 = arith.subf %71, %74 : vector<8x1xf32>
    %79 = math.exp %78 : vector<8x1xf32>
    %cst_26 = arith.constant dense<0.000000e+00> : vector<8xf32>
    %80 = vector.multi_reduction <add>, %77, %cst_26 [1] : vector<8x10xf32> to vector<8xf32>
    %81 = vector.shape_cast %80 : vector<8xf32> to vector<8x1xf32>
    %82 = arith.addf %81, %79 : vector<8x1xf32>
    %cst_27 = arith.constant 1.000000e+00 : f32
    %83 = vector.broadcast %cst_27 : f32 to vector<8x1xf32>
    %84 = arith.divf %83, %82 : vector<8x1xf32>
    %85 = arith.truncf %77 : vector<8x10xf32> to vector<8x10xbf16>
    %cst_28 = arith.constant dense<0.000000e+00> : vector<8x8xf32>
    %86 = tpu.matmul %85, %61, %cst_28 {dimension_numbers = #tpu.dot_dimension_numbers<[1], [0], [0], [1], [0, 0, 1, 1], [], []>} : vector<8x10xbf16>, vector<10x8xbf16>, vector<8x8xf32> -> vector<8x8xf32>
    %87 = vector.broadcast %79 : vector<8x1xf32> to vector<8x8xf32>
    %88 = arith.mulf %87, %68 : vector<8x8xf32>
    %89 = arith.addf %86, %88 : vector<8x8xf32>
    %90 = vector.broadcast %84 : vector<8x1xf32> to vector<8x8xf32>
    %91 = arith.mulf %89, %90 : vector<8x8xf32>
    %c0_29 = arith.constant 0 : index
    %c8 = arith.constant 8 : index
    %92 = vector.load %arg12[%c0_29, %c8] : memref<8x32xf32, #tpu.memory_space<vmem>>, vector<8x8xf32>
    tpu.vector_store %arg12[%c0_29, %c8], %91 {strides = array<i32>} : memref<8x32xf32, #tpu.memory_space<vmem>>, vector<8x8xf32>,
    %93 = vector.extract_strided_slice %1 {offsets = [0, 16], sizes = [8, 8], strides = [1, 1]} : vector<8x32xbf16> to vector<8x8xbf16>
    %94 = arith.extf %93 : vector<8x8xbf16> to vector<8x8xf32>
    %cst_30 = arith.constant 0.353553385 : f32
    %95 = vector.broadcast %cst_30 : f32 to vector<8x8xf32>
    %96 = arith.mulf %94, %95 : vector<8x8xf32>
    %97 = vector.extract_strided_slice %4 {offsets = [0, 16], sizes = [10, 8], strides = [1, 1]} : vector<10x32xbf16> to vector<10x8xbf16>
    %98 = vector.extract_strided_slice %5 {offsets = [0, 16], sizes = [10, 8], strides = [1, 1]} : vector<10x32xbf16> to vector<10x8xbf16>
    %99 = arith.truncf %96 : vector<8x8xf32> to vector<8x8xbf16>
    %cst_31 = arith.constant dense<0.000000e+00> : vector<8x10xf32>
    %100 = tpu.matmul %99, %97, %cst_31 {dimension_numbers = #tpu.dot_dimension_numbers<[1], [1], [0], [0], [0, 0, 1, 0], [], []>} : vector<8x8xbf16>, vector<10x8xbf16>, vector<8x10xf32> -> vector<8x10xf32>
    %101 = arith.addf %100, %18 : vector<8x10xf32>
    %102 = vector.extract_strided_slice %8 {offsets = [0, 16], sizes = [8, 8], strides = [1, 1]} : vector<8x32xbf16> to vector<8x8xbf16>
    %103 = arith.extf %102 : vector<8x8xbf16> to vector<8x8xf32>
    %104 = vector.extract_strided_slice %9 {offsets = [0, 16], sizes = [8, 8], strides = [1, 1]} : vector<8x32xbf16> to vector<8x8xbf16>
    %105 = arith.extf %104 : vector<8x8xbf16> to vector<8x8xf32>
    %106 = arith.mulf %96, %103 : vector<8x8xf32>
    %cst_32 = arith.constant dense<0.000000e+00> : vector<8xf32>
    %107 = vector.multi_reduction <add>, %106, %cst_32 [1] : vector<8x8xf32> to vector<8xf32>
    %108 = vector.shape_cast %107 : vector<8xf32> to vector<8x1xf32>
    %cst_33 = arith.constant dense<0xFF800000> : vector<8xf32>
    %109 = vector.multi_reduction <maximumf>, %101, %cst_33 [1] : vector<8x10xf32> to vector<8xf32>
    %110 = vector.shape_cast %109 : vector<8xf32> to vector<8x1xf32>
    %111 = arith.maximumf %110, %108 : vector<8x1xf32>
    %112 = vector.broadcast %111 : vector<8x1xf32> to vector<8x10xf32>
    %113 = arith.subf %101, %112 : vector<8x10xf32>
    %114 = math.exp %113 : vector<8x10xf32>
    %115 = arith.subf %108, %111 : vector<8x1xf32>
    %116 = math.exp %115 : vector<8x1xf32>
    %cst_34 = arith.constant dense<0.000000e+00> : vector<8xf32>
    %117 = vector.multi_reduction <add>, %114, %cst_34 [1] : vector<8x10xf32> to vector<8xf32>
    %118 = vector.shape_cast %117 : vector<8xf32> to vector<8x1xf32>
    %119 = arith.addf %118, %116 : vector<8x1xf32>
    %cst_35 = arith.constant 1.000000e+00 : f32
    %120 = vector.broadcast %cst_35 : f32 to vector<8x1xf32>
    %121 = arith.divf %120, %119 : vector<8x1xf32>
    %122 = arith.truncf %114 : vector<8x10xf32> to vector<8x10xbf16>
    %cst_36 = arith.constant dense<0.000000e+00> : vector<8x8xf32>
    %123 = tpu.matmul %122, %98, %cst_36 {dimension_numbers = #tpu.dot_dimension_numbers<[1], [0], [0], [1], [0, 0, 1, 1], [], []>} : vector<8x10xbf16>, vector<10x8xbf16>, vector<8x8xf32> -> vector<8x8xf32>
    %124 = vector.broadcast %116 : vector<8x1xf32> to vector<8x8xf32>
    %125 = arith.mulf %124, %105 : vector<8x8xf32>
    %126 = arith.addf %123, %125 : vector<8x8xf32>
    %127 = vector.broadcast %121 : vector<8x1xf32> to vector<8x8xf32>
    %128 = arith.mulf %126, %127 : vector<8x8xf32>
    %c0_37 = arith.constant 0 : index
    %c16 = arith.constant 16 : index
    %129 = vector.load %arg12[%c0_37, %c16] : memref<8x32xf32, #tpu.memory_space<vmem>>, vector<8x8xf32>
    tpu.vector_store %arg12[%c0_37, %c16], %128 {strides = array<i32>} : memref<8x32xf32, #tpu.memory_space<vmem>>, vector<8x8xf32>,
    %130 = vector.extract_strided_slice %1 {offsets = [0, 24], sizes = [8, 8], strides = [1, 1]} : vector<8x32xbf16> to vector<8x8xbf16>
    %131 = arith.extf %130 : vector<8x8xbf16> to vector<8x8xf32>
    %cst_38 = arith.constant 0.353553385 : f32
    %132 = vector.broadcast %cst_38 : f32 to vector<8x8xf32>
    %133 = arith.mulf %131, %132 : vector<8x8xf32>
    %134 = vector.extract_strided_slice %4 {offsets = [0, 24], sizes = [10, 8], strides = [1, 1]} : vector<10x32xbf16> to vector<10x8xbf16>
    %135 = vector.extract_strided_slice %5 {offsets = [0, 24], sizes = [10, 8], strides = [1, 1]} : vector<10x32xbf16> to vector<10x8xbf16>
    %136 = arith.truncf %133 : vector<8x8xf32> to vector<8x8xbf16>
    %cst_39 = arith.constant dense<0.000000e+00> : vector<8x10xf32>
    %137 = tpu.matmul %136, %134, %cst_39 {dimension_numbers = #tpu.dot_dimension_numbers<[1], [1], [0], [0], [0, 0, 1, 0], [], []>} : vector<8x8xbf16>, vector<10x8xbf16>, vector<8x10xf32> -> vector<8x10xf32>
    %138 = arith.addf %137, %18 : vector<8x10xf32>
    %139 = vector.extract_strided_slice %8 {offsets = [0, 24], sizes = [8, 8], strides = [1, 1]} : vector<8x32xbf16> to vector<8x8xbf16>
    %140 = arith.extf %139 : vector<8x8xbf16> to vector<8x8xf32>
    %141 = vector.extract_strided_slice %9 {offsets = [0, 24], sizes = [8, 8], strides = [1, 1]} : vector<8x32xbf16> to vector<8x8xbf16>
    %142 = arith.extf %141 : vector<8x8xbf16> to vector<8x8xf32>
    %143 = arith.mulf %133, %140 : vector<8x8xf32>
    %cst_40 = arith.constant dense<0.000000e+00> : vector<8xf32>
    %144 = vector.multi_reduction <add>, %143, %cst_40 [1] : vector<8x8xf32> to vector<8xf32>
    %145 = vector.shape_cast %144 : vector<8xf32> to vector<8x1xf32>
    %cst_41 = arith.constant dense<0xFF800000> : vector<8xf32>
    %146 = vector.multi_reduction <maximumf>, %138, %cst_41 [1] : vector<8x10xf32> to vector<8xf32>
    %147 = vector.shape_cast %146 : vector<8xf32> to vector<8x1xf32>
    %148 = arith.maximumf %147, %145 : vector<8x1xf32>
    %149 = vector.broadcast %148 : vector<8x1xf32> to vector<8x10xf32>
    %150 = arith.subf %138, %149 : vector<8x10xf32>
    %151 = math.exp %150 : vector<8x10xf32>
    %152 = arith.subf %145, %148 : vector<8x1xf32>
    %153 = math.exp %152 : vector<8x1xf32>
    %cst_42 = arith.constant dense<0.000000e+00> : vector<8xf32>
    %154 = vector.multi_reduction <add>, %151, %cst_42 [1] : vector<8x10xf32> to vector<8xf32>
    %155 = vector.shape_cast %154 : vector<8xf32> to vector<8x1xf32>
    %156 = arith.addf %155, %153 : vector<8x1xf32>
    %cst_43 = arith.constant 1.000000e+00 : f32
    %157 = vector.broadcast %cst_43 : f32 to vector<8x1xf32>
    %158 = arith.divf %157, %156 : vector<8x1xf32>
    %159 = arith.truncf %151 : vector<8x10xf32> to vector<8x10xbf16>
    %cst_44 = arith.constant dense<0.000000e+00> : vector<8x8xf32>
    %160 = tpu.matmul %159, %135, %cst_44 {dimension_numbers = #tpu.dot_dimension_numbers<[1], [0], [0], [1], [0, 0, 1, 1], [], []>} : vector<8x10xbf16>, vector<10x8xbf16>, vector<8x8xf32> -> vector<8x8xf32>
    %161 = vector.broadcast %153 : vector<8x1xf32> to vector<8x8xf32>
    %162 = arith.mulf %161, %142 : vector<8x8xf32>
    %163 = arith.addf %160, %162 : vector<8x8xf32>
    %164 = vector.broadcast %158 : vector<8x1xf32> to vector<8x8xf32>
    %165 = arith.mulf %163, %164 : vector<8x8xf32>
    %c0_45 = arith.constant 0 : index
    %c24 = arith.constant 24 : index
    %166 = vector.load %arg12[%c0_45, %c24] : memref<8x32xf32, #tpu.memory_space<vmem>>, vector<8x8xf32>
    tpu.vector_store %arg12[%c0_45, %c24], %165 {strides = array<i32>} : memref<8x32xf32, #tpu.memory_space<vmem>>, vector<8x8xf32>,
    %c0_46 = arith.constant 0 : index
    %c0_47 = arith.constant 0 : index
    %167 = vector.load %arg12[%c0_46, %c0_47] : memref<8x32xf32, #tpu.memory_space<vmem>>, vector<8x32xf32>
    %168 = arith.truncf %167 : vector<8x32xf32> to vector<8x32xbf16>
    %c0_48 = arith.constant 0 : index
    %c0_49 = arith.constant 0 : index
    %169 = vector.load %arg6[%c0_48, %c0_49] : memref<32x32xbf16, #tpu.memory_space<vmem>>, vector<32x32xbf16>
    %cst_50 = arith.constant dense<0.000000e+00> : vector<8x32xf32>
    %170 = tpu.matmul %168, %169, %cst_50 {dimension_numbers = #tpu.dot_dimension_numbers<[1], [0], [0], [1], [0, 0, 1, 1], [], []>} : vector<8x32xbf16>, vector<32x32xbf16>, vector<8x32xf32> -> vector<8x32xf32>
    %c0_51 = arith.constant 0 : index
    %c0_52 = arith.constant 0 : index
    %171 = vector.load %arg7[%c0_51, %c0_52] : memref<1x32xf32, #tpu.memory_space<vmem>>, vector<1x32xf32>
    %172 = vector.broadcast %171 : vector<1x32xf32> to vector<8x32xf32>
    %173 = arith.addf %170, %172 : vector<8x32xf32>
    %c0_53 = arith.constant 0 : index
    %c0_54 = arith.constant 0 : index
    %c0_55 = arith.constant 0 : index
    %174 = vector.load %arg5[%c0_53, %c0_54, %c0_55] : memref<1x8x32xbf16, #tpu.memory_space<vmem>>, vector<1x8x32xbf16>
    %175 = vector.shape_cast %174 : vector<1x8x32xbf16> to vector<8x32xbf16>
    %176 = arith.extf %175 : vector<8x32xbf16> to vector<8x32xf32>
    %177 = arith.addf %173, %176 : vector<8x32xf32>
    %cst_56 = arith.constant dense<0.000000e+00> : vector<8xf32>
    %178 = vector.multi_reduction <add>, %177, %cst_56 [1] : vector<8x32xf32> to vector<8xf32>
    %179 = vector.shape_cast %178 : vector<8xf32> to vector<8x1xf32>
    %cst_57 = arith.constant 3.200000e+01 : f32
    %180 = vector.broadcast %cst_57 : f32 to vector<8x1xf32>
    %181 = arith.divf %179, %180 : vector<8x1xf32>
    %182 = vector.broadcast %181 : vector<8x1xf32> to vector<8x32xf32>
    %183 = arith.subf %177, %182 : vector<8x32xf32>
    %184 = arith.mulf %183, %183 : vector<8x32xf32>
    %cst_58 = arith.constant dense<0.000000e+00> : vector<8xf32>
    %185 = vector.multi_reduction <add>, %184, %cst_58 [1] : vector<8x32xf32> to vector<8xf32>
    %186 = vector.shape_cast %185 : vector<8xf32> to vector<8x1xf32>
    %cst_59 = arith.constant 3.200000e+01 : f32
    %187 = vector.broadcast %cst_59 : f32 to vector<8x1xf32>
    %188 = arith.divf %186, %187 : vector<8x1xf32>
    %189 = vector.broadcast %181 : vector<8x1xf32> to vector<8x32xf32>
    %190 = arith.subf %177, %189 : vector<8x32xf32>
    %cst_60 = arith.constant 9.99999974E-6 : f32
    %191 = vector.broadcast %cst_60 : f32 to vector<8x1xf32>
    %192 = arith.addf %188, %191 : vector<8x1xf32>
    %193 = math.rsqrt %192 : vector<8x1xf32>
    %194 = vector.broadcast %193 : vector<8x1xf32> to vector<8x32xf32>
    %195 = arith.mulf %190, %194 : vector<8x32xf32>
    %c0_61 = arith.constant 0 : index
    %c0_62 = arith.constant 0 : index
    %196 = vector.load %arg8[%c0_61, %c0_62] : memref<1x32xf32, #tpu.memory_space<vmem>>, vector<1x32xf32>
    %197 = vector.broadcast %196 : vector<1x32xf32> to vector<8x32xf32>
    %198 = arith.mulf %195, %197 : vector<8x32xf32>
    %c0_63 = arith.constant 0 : index
    %c0_64 = arith.constant 0 : index
    %199 = vector.load %arg9[%c0_63, %c0_64] : memref<1x32xf32, #tpu.memory_space<vmem>>, vector<1x32xf32>
    %200 = vector.broadcast %199 : vector<1x32xf32> to vector<8x32xf32>
    %201 = arith.addf %198, %200 : vector<8x32xf32>
    %c0_65 = arith.constant 0 : index
    %c0_66 = arith.constant 0 : index
    %c0_67 = arith.constant 0 : index
    %202 = vector.load %arg10[%c0_65, %c0_66, %c0_67] : memref<1x8x1xf32, #tpu.memory_space<vmem>>, vector<1x8x1xf32>
    %203 = vector.shape_cast %202 : vector<1x8x1xf32> to vector<8x1xf32>
    %cst_68 = arith.constant 1.000000e+00 : f32
    %204 = vector.broadcast %cst_68 : f32 to vector<8x1xf32>
    %205 = arith.subf %204, %203 : vector<8x1xf32>
    %206 = vector.broadcast %205 : vector<8x1xf32> to vector<8x32xf32>
    %207 = arith.mulf %201, %206 : vector<8x32xf32>
    %208 = arith.truncf %207 : vector<8x32xf32> to vector<8x32xbf16>
    %c0_69 = arith.constant 0 : index
    %c0_70 = arith.constant 0 : index
    %c0_71 = arith.constant 0 : index
    %209 = vector.load %arg11[%c0_69, %c0_70, %c0_71] : memref<1x8x32xbf16, #tpu.memory_space<vmem>>, vector<1x8x32xbf16>
    %210 = vector.shape_cast %209 : vector<1x8x32xbf16> to vector<8x32xbf16>
    %211 = vector.shape_cast %208 : vector<8x32xbf16> to vector<1x8x32xbf16>
    tpu.vector_store %arg11[%c0_69, %c0_70, %c0_71], %211 {strides = array<i32>} : memref<1x8x32xbf16, #tpu.memory_space<vmem>>, vector<1x8x32xbf16>,
    return
  }
  func.func @transform_0(%arg0: i32) -> (i32, i32, i32) {
    %c0_i32 = arith.constant 0 : i32
    %c0_i32_0 = arith.constant 0 : i32
    %c0_i32_1 = arith.constant 0 : i32
    return %arg0, %c0_i32, %c0_i32_0 : i32, i32, i32
  }
  func.func @transform_1(%arg0: i32) -> (i32, i32, i32) {
    %c0_i32 = arith.constant 0 : i32
    %c0_i32_0 = arith.constant 0 : i32
    %c0_i32_1 = arith.constant 0 : i32
    return %arg0, %c0_i32, %c0_i32_0 : i32, i32, i32
  }
  func.func @transform_2(%arg0: i32) -> (i32, i32, i32) {
    %c0_i32 = arith.constant 0 : i32
    %c0_i32_0 = arith.constant 0 : i32
    %c0_i32_1 = arith.constant 0 : i32
    return %arg0, %c0_i32, %c0_i32_0 : i32, i32, i32
  }
  func.func @transform_3(%arg0: i32) -> (i32, i32, i32) {
    %c0_i32 = arith.constant 0 : i32
    %c0_i32_0 = arith.constant 0 : i32
    %c0_i32_1 = arith.constant 0 : i32
    return %arg0, %c0_i32, %c0_i32_0 : i32, i32, i32
  }
  func.func @transform_4(%arg0: i32) -> (i32, i32, i32) {
    %c0_i32 = arith.constant 0 : i32
    %c0_i32_0 = arith.constant 0 : i32
    %c0_i32_1 = arith.constant 0 : i32
    return %arg0, %c0_i32, %c0_i32_0 : i32, i32, i32
  }
  func.func @transform_5(%arg0: i32) -> (i32, i32) {
    %c0_i32 = arith.constant 0 : i32
    %c0_i32_0 = arith.constant 0 : i32
    %c0_i32_1 = arith.constant 0 : i32
    return %c0_i32, %c0_i32_0 : i32, i32
  }
  func.func @transform_6(%arg0: i32) -> (i32, i32) {
    %c0_i32 = arith.constant 0 : i32
    %c0_i32_0 = arith.constant 0 : i32
    %c0_i32_1 = arith.constant 0 : i32
    return %c0_i32, %c0_i32_0 : i32, i32
  }
  func.func @transform_7(%arg0: i32) -> (i32, i32) {
    %c0_i32 = arith.constant 0 : i32
    %c0_i32_0 = arith.constant 0 : i32
    %c0_i32_1 = arith.constant 0 : i32
    return %c0_i32, %c0_i32_0 : i32, i32
  }
  func.func @transform_8(%arg0: i32) -> (i32, i32) {
    %c0_i32 = arith.constant 0 : i32
    %c0_i32_0 = arith.constant 0 : i32
    %c0_i32_1 = arith.constant 0 : i32
    return %c0_i32, %c0_i32_0 : i32, i32
  }
  func.func @transform_9(%arg0: i32) -> (i32, i32, i32) {
    %c0_i32 = arith.constant 0 : i32
    %c0_i32_0 = arith.constant 0 : i32
    %c0_i32_1 = arith.constant 0 : i32
    return %arg0, %c0_i32, %c0_i32_0 : i32, i32, i32
  }
  func.func @transform_10(%arg0: i32) -> (i32, i32, i32) {
    %c0_i32 = arith.constant 0 : i32
    %c0_i32_0 = arith.constant 0 : i32
    %c0_i32_1 = arith.constant 0 : i32
    return %arg0, %c0_i32, %c0_i32_0 : i32, i32, i32
  }
}

module attributes {stable_mosaic.version = 11 : i64} {
  func.func @_ffn2_res_ln_kernel(%arg0: i32, %arg1: i32, %arg2: memref<16x64xbf16, #tpu.memory_space<vmem>>, %arg3: memref<64x32xbf16, #tpu.memory_space<vmem>>, %arg4: memref<1x32xf32, #tpu.memory_space<vmem>>, %arg5: memref<16x32xbf16, #tpu.memory_space<vmem>>, %arg6: memref<1x32xf32, #tpu.memory_space<vmem>>, %arg7: memref<1x32xf32, #tpu.memory_space<vmem>>, %arg8: memref<16x1xf32, #tpu.memory_space<vmem>>, %arg9: memref<16x32xbf16, #tpu.memory_space<vmem>>, %arg10: memref<16x32xf32, #tpu.memory_space<vmem>>) attributes {dimension_semantics = [#tpu.dimension_semantics<parallel>, #tpu.dimension_semantics<arbitrary>], iteration_bounds = array<i64: 1, 1>, scalar_prefetch = 0 : i64, scratch_operands = 1 : i64, tpu.core_type = #tpu.core_type<tc>, window_params = [{transform_indices = @transform_0, window_bounds = array<i64: 16, 64>}, {transform_indices = @transform_1, window_bounds = array<i64: 64, 32>}, {pipeline_mode = #tpu.pipeline_mode<synchronous>, transform_indices = @transform_2, window_bounds = array<i64: 1, 32>}, {transform_indices = @transform_3, window_bounds = array<i64: 16, 32>}, {pipeline_mode = #tpu.pipeline_mode<synchronous>, transform_indices = @transform_4, window_bounds = array<i64: 1, 32>}, {pipeline_mode = #tpu.pipeline_mode<synchronous>, transform_indices = @transform_5, window_bounds = array<i64: 1, 32>}, {transform_indices = @transform_6, window_bounds = array<i64: 16, 1>}, {transform_indices = @transform_7, window_bounds = array<i64: 16, 32>}]} {
    %c0_i32 = arith.constant 0 : i32
    %0 = arith.cmpi eq, %arg1, %c0_i32 : i32
    %1 = arith.extui %0 : i1 to i32
    %c0_i32_0 = arith.constant 0 : i32
    %2 = arith.cmpi ne, %1, %c0_i32_0 : i32
    scf.if %2 {
      %cst_10 = arith.constant 0.000000e+00 : f32
      %12 = vector.broadcast %cst_10 : f32 to vector<16x32xf32>
      %c0_11 = arith.constant 0 : index
      %c0_12 = arith.constant 0 : index
      %13 = vector.load %arg10[%c0_11, %c0_12] : memref<16x32xf32, #tpu.memory_space<vmem>>, vector<16x32xf32>
      tpu.vector_store %arg10[%c0_11, %c0_12], %12 {strides = array<i32>} : memref<16x32xf32, #tpu.memory_space<vmem>>, vector<16x32xf32>,
    } else {
    }
    %c0 = arith.constant 0 : index
    %c0_1 = arith.constant 0 : index
    %3 = vector.load %arg10[%c0, %c0_1] : memref<16x32xf32, #tpu.memory_space<vmem>>, vector<16x32xf32>
    %c0_2 = arith.constant 0 : index
    %c0_3 = arith.constant 0 : index
    %4 = vector.load %arg2[%c0_2, %c0_3] : memref<16x64xbf16, #tpu.memory_space<vmem>>, vector<16x64xbf16>
    %c0_4 = arith.constant 0 : index
    %c0_5 = arith.constant 0 : index
    %5 = vector.load %arg3[%c0_4, %c0_5] : memref<64x32xbf16, #tpu.memory_space<vmem>>, vector<64x32xbf16>
    %cst = arith.constant dense<0.000000e+00> : vector<16x32xf32>
    %6 = tpu.matmul %4, %5, %cst {dimension_numbers = #tpu.dot_dimension_numbers<[1], [0], [0], [1], [0, 0, 1, 1], [], []>} : vector<16x64xbf16>, vector<64x32xbf16>, vector<16x32xf32> -> vector<16x32xf32>
    %7 = arith.addf %3, %6 : vector<16x32xf32>
    %c0_6 = arith.constant 0 : index
    %c0_7 = arith.constant 0 : index
    %8 = vector.load %arg10[%c0_6, %c0_7] : memref<16x32xf32, #tpu.memory_space<vmem>>, vector<16x32xf32>
    tpu.vector_store %arg10[%c0_6, %c0_7], %7 {strides = array<i32>} : memref<16x32xf32, #tpu.memory_space<vmem>>, vector<16x32xf32>,
    %c0_i32_8 = arith.constant 0 : i32
    %9 = arith.cmpi eq, %arg1, %c0_i32_8 : i32
    %10 = arith.extui %9 : i1 to i32
    %c0_i32_9 = arith.constant 0 : i32
    %11 = arith.cmpi ne, %10, %c0_i32_9 : i32
    scf.if %11 {
      %c0_10 = arith.constant 0 : index
      %c0_11 = arith.constant 0 : index
      %12 = vector.load %arg10[%c0_10, %c0_11] : memref<16x32xf32, #tpu.memory_space<vmem>>, vector<16x32xf32>
      %c0_12 = arith.constant 0 : index
      %c0_13 = arith.constant 0 : index
      %13 = vector.load %arg4[%c0_12, %c0_13] : memref<1x32xf32, #tpu.memory_space<vmem>>, vector<1x32xf32>
      %14 = vector.broadcast %13 : vector<1x32xf32> to vector<16x32xf32>
      %15 = arith.addf %12, %14 : vector<16x32xf32>
      %c0_14 = arith.constant 0 : index
      %c0_15 = arith.constant 0 : index
      %16 = vector.load %arg5[%c0_14, %c0_15] : memref<16x32xbf16, #tpu.memory_space<vmem>>, vector<16x32xbf16>
      %17 = arith.extf %16 : vector<16x32xbf16> to vector<16x32xf32>
      %18 = arith.addf %15, %17 : vector<16x32xf32>
      %cst_16 = arith.constant dense<0.000000e+00> : vector<16xf32>
      %19 = vector.multi_reduction <add>, %18, %cst_16 [1] : vector<16x32xf32> to vector<16xf32>
      %20 = vector.shape_cast %19 : vector<16xf32> to vector<16x1xf32>
      %cst_17 = arith.constant 3.200000e+01 : f32
      %21 = vector.broadcast %cst_17 : f32 to vector<16x1xf32>
      %22 = arith.divf %20, %21 : vector<16x1xf32>
      %23 = vector.broadcast %22 : vector<16x1xf32> to vector<16x32xf32>
      %24 = arith.subf %18, %23 : vector<16x32xf32>
      %25 = arith.mulf %24, %24 : vector<16x32xf32>
      %cst_18 = arith.constant dense<0.000000e+00> : vector<16xf32>
      %26 = vector.multi_reduction <add>, %25, %cst_18 [1] : vector<16x32xf32> to vector<16xf32>
      %27 = vector.shape_cast %26 : vector<16xf32> to vector<16x1xf32>
      %cst_19 = arith.constant 3.200000e+01 : f32
      %28 = vector.broadcast %cst_19 : f32 to vector<16x1xf32>
      %29 = arith.divf %27, %28 : vector<16x1xf32>
      %30 = vector.broadcast %22 : vector<16x1xf32> to vector<16x32xf32>
      %31 = arith.subf %18, %30 : vector<16x32xf32>
      %cst_20 = arith.constant 9.99999974E-6 : f32
      %32 = vector.broadcast %cst_20 : f32 to vector<16x1xf32>
      %33 = arith.addf %29, %32 : vector<16x1xf32>
      %34 = math.rsqrt %33 : vector<16x1xf32>
      %35 = vector.broadcast %34 : vector<16x1xf32> to vector<16x32xf32>
      %36 = arith.mulf %31, %35 : vector<16x32xf32>
      %c0_21 = arith.constant 0 : index
      %c0_22 = arith.constant 0 : index
      %37 = vector.load %arg6[%c0_21, %c0_22] : memref<1x32xf32, #tpu.memory_space<vmem>>, vector<1x32xf32>
      %38 = vector.broadcast %37 : vector<1x32xf32> to vector<16x32xf32>
      %39 = arith.mulf %36, %38 : vector<16x32xf32>
      %c0_23 = arith.constant 0 : index
      %c0_24 = arith.constant 0 : index
      %40 = vector.load %arg7[%c0_23, %c0_24] : memref<1x32xf32, #tpu.memory_space<vmem>>, vector<1x32xf32>
      %41 = vector.broadcast %40 : vector<1x32xf32> to vector<16x32xf32>
      %42 = arith.addf %39, %41 : vector<16x32xf32>
      %c0_25 = arith.constant 0 : index
      %c0_26 = arith.constant 0 : index
      %43 = vector.load %arg8[%c0_25, %c0_26] : memref<16x1xf32, #tpu.memory_space<vmem>>, vector<16x1xf32>
      %cst_27 = arith.constant 1.000000e+00 : f32
      %44 = vector.broadcast %cst_27 : f32 to vector<16x1xf32>
      %45 = arith.subf %44, %43 : vector<16x1xf32>
      %46 = vector.broadcast %45 : vector<16x1xf32> to vector<16x32xf32>
      %47 = arith.mulf %42, %46 : vector<16x32xf32>
      %48 = arith.truncf %47 : vector<16x32xf32> to vector<16x32xbf16>
      %c0_28 = arith.constant 0 : index
      %c0_29 = arith.constant 0 : index
      %49 = vector.load %arg9[%c0_28, %c0_29] : memref<16x32xbf16, #tpu.memory_space<vmem>>, vector<16x32xbf16>
      tpu.vector_store %arg9[%c0_28, %c0_29], %48 {strides = array<i32>} : memref<16x32xbf16, #tpu.memory_space<vmem>>, vector<16x32xbf16>,
    } else {
    }
    return
  }
  func.func @transform_0(%arg0: i32, %arg1: i32) -> (i32, i32) {
    %c0_i32 = arith.constant 0 : i32
    return %arg0, %arg1 : i32, i32
  }
  func.func @transform_1(%arg0: i32, %arg1: i32) -> (i32, i32) {
    %c0_i32 = arith.constant 0 : i32
    %c0_i32_0 = arith.constant 0 : i32
    return %arg1, %c0_i32 : i32, i32
  }
  func.func @transform_2(%arg0: i32, %arg1: i32) -> (i32, i32) {
    %c0_i32 = arith.constant 0 : i32
    %c0_i32_0 = arith.constant 0 : i32
    %c0_i32_1 = arith.constant 0 : i32
    return %c0_i32, %c0_i32_0 : i32, i32
  }
  func.func @transform_3(%arg0: i32, %arg1: i32) -> (i32, i32) {
    %c0_i32 = arith.constant 0 : i32
    %c0_i32_0 = arith.constant 0 : i32
    return %arg0, %c0_i32 : i32, i32
  }
  func.func @transform_4(%arg0: i32, %arg1: i32) -> (i32, i32) {
    %c0_i32 = arith.constant 0 : i32
    %c0_i32_0 = arith.constant 0 : i32
    %c0_i32_1 = arith.constant 0 : i32
    return %c0_i32, %c0_i32_0 : i32, i32
  }
  func.func @transform_5(%arg0: i32, %arg1: i32) -> (i32, i32) {
    %c0_i32 = arith.constant 0 : i32
    %c0_i32_0 = arith.constant 0 : i32
    %c0_i32_1 = arith.constant 0 : i32
    return %c0_i32, %c0_i32_0 : i32, i32
  }
  func.func @transform_6(%arg0: i32, %arg1: i32) -> (i32, i32) {
    %c0_i32 = arith.constant 0 : i32
    %c0_i32_0 = arith.constant 0 : i32
    return %arg0, %c0_i32 : i32, i32
  }
  func.func @transform_7(%arg0: i32, %arg1: i32) -> (i32, i32) {
    %c0_i32 = arith.constant 0 : i32
    %c0_i32_0 = arith.constant 0 : i32
    return %arg0, %c0_i32 : i32, i32
  }
}

module attributes {stable_mosaic.version = 11 : i64} {
  func.func @_logits_lse_kernel(%arg0: i32, %arg1: i32, %arg2: memref<16x32xbf16, #tpu.memory_space<vmem>>, %arg3: memref<32x50xbf16, #tpu.memory_space<vmem>>, %arg4: memref<16x50xf32, #tpu.memory_space<vmem>>, %arg5: memref<16x1xf32, #tpu.memory_space<vmem>>, %arg6: memref<16x1xf32, #tpu.memory_space<vmem>>, %arg7: memref<16x1xf32, #tpu.memory_space<vmem>>) attributes {dimension_semantics = [#tpu.dimension_semantics<parallel>, #tpu.dimension_semantics<arbitrary>], iteration_bounds = array<i64: 1, 1>, scalar_prefetch = 0 : i64, scratch_operands = 2 : i64, tpu.core_type = #tpu.core_type<tc>, window_params = [{transform_indices = @transform_0, window_bounds = array<i64: 16, 32>}, {transform_indices = @transform_1, window_bounds = array<i64: 32, 50>}, {transform_indices = @transform_2, window_bounds = array<i64: 16, 50>}, {transform_indices = @transform_3, window_bounds = array<i64: 16, 1>}]} {
    %c0_i32 = arith.constant 0 : i32
    %0 = arith.cmpi eq, %arg1, %c0_i32 : i32
    %1 = arith.extui %0 : i1 to i32
    %c0_i32_0 = arith.constant 0 : i32
    %2 = arith.cmpi ne, %1, %c0_i32_0 : i32
    scf.if %2 {
      %cst_18 = arith.constant 0xFF800000 : f32
      %26 = vector.broadcast %cst_18 : f32 to vector<16x1xf32>
      %c0_19 = arith.constant 0 : index
      %c0_20 = arith.constant 0 : index
      %27 = vector.load %arg6[%c0_19, %c0_20] : memref<16x1xf32, #tpu.memory_space<vmem>>, vector<16x1xf32>
      tpu.vector_store %arg6[%c0_19, %c0_20], %26 {strides = array<i32>} : memref<16x1xf32, #tpu.memory_space<vmem>>, vector<16x1xf32>,
      %cst_21 = arith.constant 0.000000e+00 : f32
      %28 = vector.broadcast %cst_21 : f32 to vector<16x1xf32>
      %c0_22 = arith.constant 0 : index
      %c0_23 = arith.constant 0 : index
      %29 = vector.load %arg7[%c0_22, %c0_23] : memref<16x1xf32, #tpu.memory_space<vmem>>, vector<16x1xf32>
      tpu.vector_store %arg7[%c0_22, %c0_23], %28 {strides = array<i32>} : memref<16x1xf32, #tpu.memory_space<vmem>>, vector<16x1xf32>,
    } else {
    }
    %c0 = arith.constant 0 : index
    %c0_1 = arith.constant 0 : index
    %3 = vector.load %arg2[%c0, %c0_1] : memref<16x32xbf16, #tpu.memory_space<vmem>>, vector<16x32xbf16>
    %c0_2 = arith.constant 0 : index
    %c0_3 = arith.constant 0 : index
    %4 = vector.load %arg3[%c0_2, %c0_3] : memref<32x50xbf16, #tpu.memory_space<vmem>>, vector<32x50xbf16>
    %cst = arith.constant dense<0.000000e+00> : vector<16x50xf32>
    %5 = tpu.matmul %3, %4, %cst {dimension_numbers = #tpu.dot_dimension_numbers<[1], [0], [0], [1], [0, 0, 1, 1], [], []>} : vector<16x32xbf16>, vector<32x50xbf16>, vector<16x50xf32> -> vector<16x50xf32>
    %c0_4 = arith.constant 0 : index
    %c0_5 = arith.constant 0 : index
    %6 = vector.load %arg4[%c0_4, %c0_5] : memref<16x50xf32, #tpu.memory_space<vmem>>, vector<16x50xf32>
    tpu.vector_store %arg4[%c0_4, %c0_5], %5 {strides = array<i32>} : memref<16x50xf32, #tpu.memory_space<vmem>>, vector<16x50xf32>,
    %c0_6 = arith.constant 0 : index
    %c0_7 = arith.constant 0 : index
    %7 = vector.load %arg6[%c0_6, %c0_7] : memref<16x1xf32, #tpu.memory_space<vmem>>, vector<16x1xf32>
    %cst_8 = arith.constant dense<0xFF800000> : vector<16xf32>
    %8 = vector.multi_reduction <maximumf>, %5, %cst_8 [1] : vector<16x50xf32> to vector<16xf32>
    %9 = vector.shape_cast %8 : vector<16xf32> to vector<16x1xf32>
    %10 = arith.maximumf %7, %9 : vector<16x1xf32>
    %c0_9 = arith.constant 0 : index
    %c0_10 = arith.constant 0 : index
    %11 = vector.load %arg7[%c0_9, %c0_10] : memref<16x1xf32, #tpu.memory_space<vmem>>, vector<16x1xf32>
    %12 = arith.subf %7, %10 : vector<16x1xf32>
    %13 = math.exp %12 : vector<16x1xf32>
    %14 = arith.mulf %11, %13 : vector<16x1xf32>
    %15 = vector.broadcast %10 : vector<16x1xf32> to vector<16x50xf32>
    %16 = arith.subf %5, %15 : vector<16x50xf32>
    %17 = math.exp %16 : vector<16x50xf32>
    %cst_11 = arith.constant dense<0.000000e+00> : vector<16xf32>
    %18 = vector.multi_reduction <add>, %17, %cst_11 [1] : vector<16x50xf32> to vector<16xf32>
    %19 = vector.shape_cast %18 : vector<16xf32> to vector<16x1xf32>
    %20 = arith.addf %14, %19 : vector<16x1xf32>
    %c0_12 = arith.constant 0 : index
    %c0_13 = arith.constant 0 : index
    %21 = vector.load %arg7[%c0_12, %c0_13] : memref<16x1xf32, #tpu.memory_space<vmem>>, vector<16x1xf32>
    tpu.vector_store %arg7[%c0_12, %c0_13], %20 {strides = array<i32>} : memref<16x1xf32, #tpu.memory_space<vmem>>, vector<16x1xf32>,
    %c0_14 = arith.constant 0 : index
    %c0_15 = arith.constant 0 : index
    %22 = vector.load %arg6[%c0_14, %c0_15] : memref<16x1xf32, #tpu.memory_space<vmem>>, vector<16x1xf32>
    tpu.vector_store %arg6[%c0_14, %c0_15], %10 {strides = array<i32>} : memref<16x1xf32, #tpu.memory_space<vmem>>, vector<16x1xf32>,
    %c0_i32_16 = arith.constant 0 : i32
    %23 = arith.cmpi eq, %arg1, %c0_i32_16 : i32
    %24 = arith.extui %23 : i1 to i32
    %c0_i32_17 = arith.constant 0 : i32
    %25 = arith.cmpi ne, %24, %c0_i32_17 : i32
    scf.if %25 {
      %c0_18 = arith.constant 0 : index
      %c0_19 = arith.constant 0 : index
      %26 = vector.load %arg6[%c0_18, %c0_19] : memref<16x1xf32, #tpu.memory_space<vmem>>, vector<16x1xf32>
      %c0_20 = arith.constant 0 : index
      %c0_21 = arith.constant 0 : index
      %27 = vector.load %arg7[%c0_20, %c0_21] : memref<16x1xf32, #tpu.memory_space<vmem>>, vector<16x1xf32>
      %28 = math.log %27 : vector<16x1xf32>
      %29 = arith.addf %26, %28 : vector<16x1xf32>
      %c0_22 = arith.constant 0 : index
      %c0_23 = arith.constant 0 : index
      %30 = vector.load %arg5[%c0_22, %c0_23] : memref<16x1xf32, #tpu.memory_space<vmem>>, vector<16x1xf32>
      tpu.vector_store %arg5[%c0_22, %c0_23], %29 {strides = array<i32>} : memref<16x1xf32, #tpu.memory_space<vmem>>, vector<16x1xf32>,
    } else {
    }
    return
  }
  func.func @transform_0(%arg0: i32, %arg1: i32) -> (i32, i32) {
    %c0_i32 = arith.constant 0 : i32
    %c0_i32_0 = arith.constant 0 : i32
    return %arg0, %c0_i32 : i32, i32
  }
  func.func @transform_1(%arg0: i32, %arg1: i32) -> (i32, i32) {
    %c0_i32 = arith.constant 0 : i32
    %c0_i32_0 = arith.constant 0 : i32
    return %c0_i32, %arg1 : i32, i32
  }
  func.func @transform_2(%arg0: i32, %arg1: i32) -> (i32, i32) {
    %c0_i32 = arith.constant 0 : i32
    return %arg0, %arg1 : i32, i32
  }
  func.func @transform_3(%arg0: i32, %arg1: i32) -> (i32, i32) {
    %c0_i32 = arith.constant 0 : i32
    %c0_i32_0 = arith.constant 0 : i32
    return %arg0, %c0_i32 : i32, i32
  }
}

module attributes {stable_mosaic.version = 11 : i64} {
  func.func @_sub_lse_kernel(%arg0: i32, %arg1: i32, %arg2: memref<16x50xf32, #tpu.memory_space<vmem>>, %arg3: memref<16x1xf32, #tpu.memory_space<vmem>>, %arg4: memref<16x50xf32, #tpu.memory_space<vmem>>) attributes {dimension_semantics = [#tpu.dimension_semantics<parallel>, #tpu.dimension_semantics<parallel>], iteration_bounds = array<i64: 1, 1>, scalar_prefetch = 0 : i64, scratch_operands = 0 : i64, tpu.core_type = #tpu.core_type<tc>, window_params = [{transform_indices = @transform_0, window_bounds = array<i64: 16, 50>}, {transform_indices = @transform_1, window_bounds = array<i64: 16, 1>}, {transform_indices = @transform_2, window_bounds = array<i64: 16, 50>}]} {
    %c0 = arith.constant 0 : index
    %c0_0 = arith.constant 0 : index
    %0 = vector.load %arg2[%c0, %c0_0] : memref<16x50xf32, #tpu.memory_space<vmem>>, vector<16x50xf32>
    %c0_1 = arith.constant 0 : index
    %c0_2 = arith.constant 0 : index
    %1 = vector.load %arg3[%c0_1, %c0_2] : memref<16x1xf32, #tpu.memory_space<vmem>>, vector<16x1xf32>
    %2 = vector.broadcast %1 : vector<16x1xf32> to vector<16x50xf32>
    %3 = arith.subf %0, %2 : vector<16x50xf32>
    %c0_3 = arith.constant 0 : index
    %c0_4 = arith.constant 0 : index
    %4 = vector.load %arg4[%c0_3, %c0_4] : memref<16x50xf32, #tpu.memory_space<vmem>>, vector<16x50xf32>
    tpu.vector_store %arg4[%c0_3, %c0_4], %3 {strides = array<i32>} : memref<16x50xf32, #tpu.memory_space<vmem>>, vector<16x50xf32>,
    return
  }
  func.func @transform_0(%arg0: i32, %arg1: i32) -> (i32, i32) {
    %c0_i32 = arith.constant 0 : i32
    return %arg0, %arg1 : i32, i32
  }
  func.func @transform_1(%arg0: i32, %arg1: i32) -> (i32, i32) {
    %c0_i32 = arith.constant 0 : i32
    %c0_i32_0 = arith.constant 0 : i32
    return %arg0, %c0_i32 : i32, i32
  }
  func.func @transform_2(%arg0: i32, %arg1: i32) -> (i32, i32) {
    %c0_i32 = arith.constant 0 : i32
    return %arg0, %arg1 : i32, i32
  }
}

</mosaic_0001>

<bundles_post_ra>
// kernel: adaptive_decoder_forward.28
= control target key start
LH: loop header
LB: loop body
LE: loop exit
PB: predicated region body
PF: predicated region fallthrough
CT: control target
= control target key end

     0   :  { %vm19_vm0 = vcmask 261120   ;;  %v150_v0 = vmov 0.0   ;;  %vm151_vm1 = vmmov 0   ;;  %vm118_vm2 = vcmask 257024   ;;  %s195_s1 = inlined_call_operand.vmem [shape: bf16[32,32], index: 1, kind: input, shape index: {}]   ;;  %s196_s0 = inlined_call_operand.vmem [shape: bf16[16,32], index: 0, kind: input, shape index: {}]   ;;  %s197_s2 = inlined_call_operand.vmem [shape: f32[1,32], index: 2, kind: input, shape index: {}]   ;;  %s198_s3 = inlined_call_operand.vmem [shape: bf16[16,32], index: 3, kind: output, shape index: {}]  }
   0x1   :  { %137 = vmatprep.subr.bf16.mxu0 %v150_v0  ;;  %v147_v1 = vld [vmem:[%s195_s1] sm:$0xff]   ;;  %141 = vmatprep.mubr.msk.bf16.mxu0 %vm151_vm1, %v150_v0  ;;  %20 = vst.msk [vmem:[#allocation2] sm:$0xff] %vm19_vm0, %v150_v0  ;;  %21 = vst.msk [vmem:[#allocation2 + $0x8] sm:$0xff] %vm19_vm0, %v150_v0  ;;  %v148_v2 = vld [vmem:[%s195_s1 + $0x8] sm:$0xff]  }
   0x2   :  { %138 = vmatpush3.bf16.msra.mxu0 %v147_v1  ;;  %v149_v3 = vld [vmem:[%s196_s0] sm:$0xff]  }
   0x3   :  { %139 = vmatprep.subr.bf16.mxu0 %v150_v0  ;;  %v129_v12 = vld [vmem:[%s197_s2] ss:$0 sm:$0xff] }
   0x6   :  { %140 = vmatpush3.bf16.msra.mxu0 %v148_v2 }
   0x8   :  { %v22_v4 = vld [vmem:[#allocation2] sm:$0xff]  ;;  %v23_v6 = vld [vmem:[#allocation2 + $0x8] sm:$0xff] }
   0x9   :  { %142 = vmatmul.mubr.msk.bf16.vlgmr.msra.gmra.mrb[0].mxu0 %vm19_vm0, %v149_v3 }
  0xdc   :  { %v85_v5 = vpop.f32.mrb[0].mxu0 }
  0xdd   :  { %v92_v7 = vadd.f32 %v85_v5, %v22_v4  ;;  %v143_v8 = vpop.f32.mrb[1].mxu0 }
  0xde   :  { %v88_v9 = vpop.f32.mrb[2].mxu0 }
  0xdf   :  { %94 = vst.msk [vmem:[#allocation2] sm:$0xff] %vm19_vm0, %v92_v7  ;;  %v93_v10 = vadd.f32 %v88_v9, %v23_v6  ;;  %v144_v11 = vpop.f32.mrb[3].mxu0 }
  0xe1   :  { %95 = vst.msk [vmem:[#allocation2 + $0x8] sm:$0xff] %vm19_vm0, %v93_v10 }
  0xe6   :  { %v99_v13 = vld [vmem:[#allocation2] sm:$0xff] }
  0xe7   :  { %v108_v14 = vadd.f32 %v129_v12, %v99_v13 }
  0xe8   :  { %v100_v15 = vld [vmem:[#allocation2 + $0x8] sm:$0xff] }
  0xe9   :  { %v132_v16 = vpack.c.bf16 %v108_v14, %v108_v14  ;;  %v109_v17 = vadd.f32 %v129_v12, %v100_v15 }
  0xeb   :  { %119 = vst.msk [vmem:[%s198_s3] sm:$0xf] %vm118_vm2, %v132_v16  ;;  %v133_v18 = vpack.c.bf16 %v109_v17, %v109_v17 }
  0xed   :  { %120 = vst.msk [vmem:[%s198_s3 + $0x4] sm:$0xf] %vm118_vm2, %v133_v18 }

// kernel: adaptive_decoder_forward.26
= control target key start
LH: loop header
LB: loop body
LE: loop exit
PB: predicated region body
PF: predicated region fallthrough
CT: control target
= control target key end

     0   :  { %vm19_vm0 = vcmask 785408   ;;  %v151_v0 = vmov 0.0   ;;  %vm152_vm1 = vmmov 0   ;;  %vm47_vm2 = vcmask 261120   ;;  %s195_s1 = inlined_call_operand.vmem [shape: bf16[32,96], index: 1, kind: input, shape index: {}]   ;;  %s196_s0 = inlined_call_operand.vmem [shape: bf16[16,32], index: 0, kind: input, shape index: {}]   ;;  %s197_s2 = inlined_call_operand.vmem [shape: f32[1,96], index: 2, kind: input, shape index: {}]   ;;  %s198_s3 = inlined_call_operand.vmem [shape: bf16[16,96], index: 3, kind: output, shape index: {}]  }
   0x1   :  { %138 = vmatprep.subr.bf16.mxu0 %v151_v0  ;;  %v148_v1 = vld [vmem:[%s195_s1] sm:$0xff]   ;;  %142 = vmatprep.mubr.msk.bf16.mxu0 %vm152_vm1, %v151_v0  ;;  %20 = vst.msk [vmem:[#allocation2] sm:$0xff] %vm19_vm0, %v151_v0  ;;  %21 = vst.msk [vmem:[#allocation2 + $0x8] sm:$0xff] %vm19_vm0, %v151_v0  ;;  %v149_v2 = vld [vmem:[%s195_s1 + $0x8] sm:$0xff]   ;;  %vm119_vm3 = vcmask 781312  }
   0x2   :  { %139 = vmatpush3.bf16.msra.mxu0 %v148_v1  ;;  %v150_v3 = vld [vmem:[%s196_s0] sm:$0xff]  }
   0x3   :  { %140 = vmatprep.subr.bf16.mxu0 %v151_v0  ;;  %v130_v12 = vld [vmem:[%s197_s2] ss:$0 sm:$0xff] }
   0x6   :  { %141 = vmatpush3.bf16.msra.mxu0 %v149_v2 }
   0x8   :  { %v22_v4 = vld [vmem:[#allocation2] sm:$0xff]  ;;  %v23_v6 = vld [vmem:[#allocation2 + $0x8] sm:$0xff] }
   0x9   :  { %143 = vmatmul.mubr.msk.bf16.vlgmr.msra.gmra.mrb[0].mxu0 %vm47_vm2, %v150_v3 }
  0xdc   :  { %v85_v5 = vpop.f32.mrb[0].mxu0 }
  0xdd   :  { %v92_v7 = vadd.f32 %v85_v5, %v22_v4  ;;  %v144_v8 = vpop.f32.mrb[1].mxu0 }
  0xde   :  { %v88_v9 = vpop.f32.mrb[2].mxu0 }
  0xdf   :  { %95 = vst.msk [vmem:[#allocation2] sm:$0xff] %vm19_vm0, %v92_v7  ;;  %v93_v10 = vadd.f32 %v88_v9, %v23_v6  ;;  %v145_v11 = vpop.f32.mrb[3].mxu0 }
  0xe1   :  { %96 = vst.msk [vmem:[#allocation2 + $0x8] sm:$0xff] %vm19_vm0, %v93_v10 }
  0xe6   :  { %v100_v13 = vld [vmem:[#allocation2] sm:$0xff] }
  0xe7   :  { %v109_v14 = vadd.f32 %v130_v12, %v100_v13 }
  0xe8   :  { %v101_v15 = vld [vmem:[#allocation2 + $0x8] sm:$0xff] }
  0xe9   :  { %v133_v16 = vpack.c.bf16 %v109_v14, %v109_v14  ;;  %v110_v17 = vadd.f32 %v130_v12, %v101_v15 }
  0xeb   :  { %120 = vst.msk [vmem:[%s198_s3] sm:$0xf] %vm119_vm3, %v133_v16  ;;  %v134_v18 = vpack.c.bf16 %v110_v17, %v110_v17 }
  0xed   :  { %121 = vst.msk [vmem:[%s198_s3 + $0x4] sm:$0xf] %vm119_vm3, %v134_v18 }

// kernel: adaptive_decoder_forward.29
= control target key start
LH: loop header
LB: loop body
LE: loop exit
PB: predicated region body
PF: predicated region fallthrough
CT: control target
= control target key end

     0   :  { %vm22_vm0 = vcmask 519168   ;;  %v184_v1 = vmov 0.0   ;;  %vm54_vm1 = vcmask 261120   ;;  %vm19_vm2 = vcmask 523264   ;;  %s237_s1 = inlined_call_operand.vmem [shape: bf16[32,64], index: 1, kind: input, shape index: {}]   ;;  %s238_s0 = inlined_call_operand.vmem [shape: bf16[20,32], index: 0, kind: input, shape index: {}]   ;;  %s239_s2 = inlined_call_operand.vmem [shape: f32[1,64], index: 2, kind: input, shape index: {}]   ;;  %s240_s3 = inlined_call_operand.vmem [shape: bf16[20,64], index: 3, kind: output, shape index: {}]  }
   0x1   :  { %v180_v0 = vld [vmem:[%s237_s1] sm:$0xff]   ;;  %23 = vst.msk [vmem:[#allocation2 + $0x10] sm:$0xf] %vm22_vm0, %v184_v1  ;;  %v181_v2 = vld [vmem:[%s237_s1 + $0x8] sm:$0xff]   ;;  %vm148_vm3 = vcmask 517120  }
   0x2   :  { %171 = vmatprep.subr.bf16.mxu0 %v180_v0  ;;  %v182_v3 = vld [vmem:[%s238_s0] sm:$0xff]   ;;  %v183_v4 = vld [vmem:[%s238_s0 + $0x8] ss:$0 sps:$4 sm:$0x33]   ;;  %20 = vst.msk [vmem:[#allocation2] sm:$0xff] %vm19_vm2, %v184_v1  ;;  %21 = vst.msk [vmem:[#allocation2 + $0x8] sm:$0xff] %vm19_vm2, %v184_v1 }
   0x3   :  { %172 = vmatpush3.bf16.msra.mxu0 %v180_v0  ;;  %175 = vmatprep.mubr.msk.bf16.mxu0 %vm54_vm1, %v182_v3  ;;  %v160_v15 = vld [vmem:[%s239_s2] ss:$0 sm:$0xff] }
   0x4   :  { %173 = vmatprep.subr.bf16.mxu0 %v181_v2 }
   0x7   :  { %174 = vmatpush3.bf16.msra.mxu0 %v181_v2 }
   0x8   :  { %v26_v5 = vld [vmem:[#allocation2 + $0x10] sm:$0xf] }
   0x9   :  { %v24_v6 = vld [vmem:[#allocation2] sm:$0xff]  ;;  %v25_v10 = vld [vmem:[#allocation2 + $0x8] sm:$0xff] }
   0xa   :  { %176 = vmatmul.mubr.msk.bf16.vlgmr.msra.gmra.mrb[0].mxu0 %vm54_vm1, %v183_v4 }
  0xdd   :  { %v177_v7 = vpop.f32.mrb[0].mxu0 }
  0xde   :  { %v111_v8 = vadd.f32 %v177_v7, %v26_v5  ;;  %v95_v9 = vpop.f32.mrb[1].mxu0 }
  0xdf   :  { %v109_v11 = vadd.f32 %v95_v9, %v24_v6  ;;  %v178_v12 = vpop.f32.mrb[2].mxu0 }
  0xe0   :  { %116 = vst.msk [vmem:[#allocation2 + $0x10] sm:$0xf] %vm22_vm0, %v111_v8  ;;  %v98_v13 = vpop.f32.mrb[3].mxu0 }
  0xe1   :  { %113 = vst.msk [vmem:[#allocation2] sm:$0xff] %vm19_vm2, %v109_v11  ;;  %v110_v14 = vadd.f32 %v98_v13, %v25_v10 }
  0xe3   :  { %114 = vst.msk [vmem:[#allocation2 + $0x8] sm:$0xff] %vm19_vm2, %v110_v14 }
  0xe7   :  { %v122_v16 = vld [vmem:[#allocation2 + $0x10] sm:$0xf] }
  0xe8   :  { %v132_v17 = vadd.f32 %v160_v15, %v122_v16  ;;  %v120_v18 = vld [vmem:[#allocation2] sm:$0xff] }
  0xe9   :  { %v130_v19 = vadd.f32 %v160_v15, %v120_v18 }
  0xea   :  { %v166_v20 = vpack.c.bf16 %v132_v17, %v132_v17  ;;  %v121_v21 = vld [vmem:[#allocation2 + $0x8] sm:$0xff] }
  0xeb   :  { %v164_v22 = vpack.c.bf16 %v130_v19, %v130_v19  ;;  %v131_v23 = vadd.f32 %v160_v15, %v121_v21 }
  0xec   :  { %149 = vst.msk [vmem:[%s240_s3 + $0x8] sm:$0x3] %vm148_vm3, %v166_v20 }
  0xed   :  { %146 = vst.msk [vmem:[%s240_s3] sm:$0xf] %vm22_vm0, %v164_v22  ;;  %v165_v24 = vpack.c.bf16 %v131_v23, %v131_v23 }
  0xef   :  { %147 = vst.msk [vmem:[%s240_s3 + $0x4] sm:$0xf] %vm22_vm0, %v165_v24 }

// kernel: adaptive_decoder_forward.27
= control target key start
LH: loop header
LB: loop body
LE: loop exit
PB: predicated region body
PF: predicated region fallthrough
CT: control target
= control target key end

     0   :  { %s1253_s27 = smov 0   ;;  %s1385_s0 = inlined_call_operand.vmem [shape: bf16[2,8,96], index: 0, kind: input, shape index: {}]   ;;  %s1386_s1 = inlined_call_operand.vmem [shape: f32[2,1,8], index: 1, kind: input, shape index: {}]   ;;  %s1387_s2 = inlined_call_operand.vmem [shape: bf16[2,8,32], index: 2, kind: input, shape index: {}]   ;;  %s1388_s3 = inlined_call_operand.vmem [shape: bf16[32,32], index: 3, kind: input, shape index: {}]   ;;  %s1389_s4 = inlined_call_operand.vmem [shape: f32[1,32], index: 4, kind: input, shape index: {}]   ;;  %s1390_s5 = inlined_call_operand.vmem [shape: f32[1,32], index: 5, kind: input, shape index: {}]   ;;  %s1391_s6 = inlined_call_operand.vmem [shape: f32[1,32], index: 6, kind: input, shape index: {}]   ;;  %s1392_s7 = inlined_call_operand.vmem [shape: f32[2,8,1], index: 7, kind: input, shape index: {}]   ;;  %s1393_s8 = inlined_call_operand.vmem [shape: bf16[2,8,32], index: 8, kind: output, shape index: {}]  }
   0x1 LB: > { %s1035_s28 = sadd.s32 4294967295, %s1189_s27   ;;  %p1039_p0 = scmp.ge.s32.totalorder %s1189_s27, 1  ;;  %s1189_s27 = sphi %s1253_s27, %s18_s27  }
   0x2   : > { %p287_p1 = scmp.lt.s32.totalorder %s1189_s27, 3 }
   0x4   : > { %p288_p2 = pnand %p1039_p0, %p287_p1 }
   0x5   : > { %p330_p3 = scmp.lt.s32.totalorder (!%p288_p2), %s1035_s28, 1  ;;  %v1191_v0 = vmov (!%p288_p2), 0.0   ;;  %vm1192_vm0 = vmmov (!%p288_p2), 0   ;;  %s1193_s11 = smov (!%p288_p2), 96   ;;  %vm374_vm1 = vcmask (!%p288_p2), 64512   ;;  %v355_v8 = vlaneseq (!%p288_p2) }
   0x6   : > { %291 = sbr.rel (%p288_p2) target bundleno = 1787 (0x6fb), region = 52  ;;  %1080 = vmatprep.subr.bf16.mxu0 (!%p288_p2), %v1191_v0  ;;  %1082 = vmatprep.mubr.msk.bf16.mxu0 (!%p288_p2), %vm1192_vm0, %v1191_v0  ;;  %s1194_s12 = smov (!%p288_p2), 64   ;;  %vm438_vm4 = vcmask (!%p288_p2), 1043456   ;;  %vm600_vm5 = vcmask (!%p288_p2), 130112   ;;  %vm717_vm6 = vcmask (!%p288_p2), 195712   ;;  %vm834_vm7 = vcmask (!%p288_p2), 261312  }
   0x7   : > { %1086 = vmatprep.subr.bf16.mxu1 (!%p288_p2), %v1191_v0  ;;  %1088 = vmatprep.mubr.msk.bf16.mxu1 (!%p288_p2), %vm1192_vm0, %v1191_v0  ;;  %s1195_s13 = smov (!%p288_p2), 88   ;;  %s1196_s14 = smov (!%p288_p2), 120   ;;  %v356_v10 = vshrl.u32 (!%p288_p2), %v355_v8, 7  ;;  %v363_v13 = vand.u32 (!%p288_p2), 127, %v355_v8  ;;  %vm861_vm8 = vcmask (!%p288_p2), 261120   ;;  %vm947_vm9 = vcmask (!%p288_p2), 257024  }
   0x8   : > { %s1197_s15 = smov (!%p288_p2), 80   ;;  %s1198_s16 = smov (!%p288_p2), 112  }
   0x9   : > { %s1199_s17 = smov (!%p288_p2), 72   ;;  %s1200_s18 = smov (!%p288_p2), 104   ;;  %v357_v11 = vsub.s32 (!%p288_p2), 0, %v356_v10  ;;  %vm364_vm3 = vcmp.gt.s32.totalorder (!%p288_p2), %v363_v13, %v356_v10 }
   0xa   : > { %s1201_s22 = smov (!%p288_p2), 56   ;;  %s1202_s23 = smov (!%p288_p2), 48  }
   0xb   : > { %s1203_s24 = smov (!%p288_p2), 40   ;;  %s1204_s25 = smov (!%p288_p2), 8  }
   0xd   : > { %s1395_s28 = smov (!%p330_p3, %s1035_s28), 1 }
   0xe   : > { %s1270_s29 = sshll.u32 %s1395_s28, 2  ;;  %s336_s21 = scalar_lea.vmem %s1386_s1, %s1395_s28 }
   0xf   : > { %s333_s10 = scalar_lea.vmem %s1385_s0, %s1270_s29  ;;  %v351_v9 = vld [vmem:[%s336_s21] sm:$0x1]  ;;  %s348_s30 = scalar_lea.vmem %s1393_s8, %s1270_s29 }
  0x10   : > { %v350_v1 = vld [vmem:[%s333_s10] sm:$0xf]  ;;  %vm352_vm2 = vcmp.gt.f32.partialorder %v351_v9, 0.5 }
  0x11   : > { %v1276_v2 = vcombine.low %v350_v1, %v350_v1  ;;  %v366_v3 = vunpack.c.l.bf16 %v350_v1  ;;  %v353_v12 = vsel %vm352_vm2, -1e+30, %v1191_v0 }
  0x12   : > { %v358_v14 = vrot.slane %v353_v12, %v357_v11 }
  0x13   : > { %372 = vrot.lane.b32.xlu0 %v1276_v2, %s1193_s11  ;;  %v367_v6 = vmul.f32 0.35355338, %v366_v3  ;;  %433 = vrot.lane.b32.xlu1 %v1276_v2, %s1194_s12  ;;  %s1205_s11 = smov 16   ;;  %s1206_s12 = smov 24  }
  0x14   : > { %v1293_v15 = vsel %vm364_vm3, -1e+30, %v358_v14 }
  0x15   : > { %v368_v7 = vpack.c.bf16 %v367_v6, %v367_v6 }
  0x17   : > { %487 = vrot.lane.b32.xlu1 %v1276_v2, %s1195_s13 }
  0x1b   : > { %485 = vrot.lane.b32.xlu1 %v368_v7, %s1196_s14 }
  0x1f   : > { %604 = vrot.lane.b32.xlu1 %v1276_v2, %s1197_s15  ;;  %s340_s15 = scalar_lea.vmem %s1387_s2, %s1270_s29 }
  0x23   : > { %602 = vrot.lane.b32.xlu1 %v368_v7, %s1198_s16 }
  0x27   : > { %721 = vrot.lane.b32.xlu1 %v1276_v2, %s1199_s17 }
  0x2b   : > { %719 = vrot.lane.b32.xlu1 %v368_v7, %s1200_s18  ;;  %s1042_s18 = sshll.u32 %s1395_s28, 3 }
  0x2c   : > { %s344_s21 = scalar_lea.vmem %s1392_s7, %s1042_s18 }
  0x85   : > { %v373_v4 = vpop.permute.xlu0 %372  ;;  %v434_v22 = vpop.permute.xlu1 %433 }
  0x86   : > { %v379_v5 = vsel %vm374_vm1, %v373_v4, 0  ;;  %v440_v23 = vsel %vm438_vm4, %v434_v22, 0 }
  0x87   : > { %1081 = vmatpush3.bf16.xpose.msra.mxu0 %v379_v5  ;;  %1087 = vmatpush3.bf16.msra.mxu1 %v440_v23 }
  0x88   : > { %1098 = vmatprep.subr.bf16.mxu0 %v1191_v0  ;;  %1092 = vmatprep.subr.bf16.mxu1 %v1191_v0 }
  0x89   : > { %v488_v27 = vpop.permute.xlu1 %487 }
  0x8a   : > { %v493_v30 = vsel %vm374_vm1, %v488_v27, 0 }
  0x8d   : > { %v486_v28 = vpop.permute.xlu1 %485 }
  0x8e   : > { %1083 = vmatmul.mubr.msk.bf16.vlgmr.msra.gmra.mrb[0].mxu0 %vm374_vm1, %v368_v7 }
  0x8f   : > { %1100 = vmatprep.mubr.msk.bf16.mxu0 %vm1192_vm0, %v1191_v0 }
  0x91   : > { %v605_v32 = vpop.permute.xlu1 %604 }
  0x92   : > { %v610_v34 = vsel %vm374_vm1, %v605_v32, 0 }
  0x95   : > { %v603_v33 = vpop.permute.xlu1 %602 }
  0x99   : > { %v722_v35 = vpop.permute.xlu1 %721 }
  0x9a   : > { %v727_v36 = vsel %vm374_vm1, %v722_v35, 0 }
  0x9d   : > { %v720_v37 = vpop.permute.xlu1 %719 }
 0x161   : > { %v415_v16 = vpop.f32.mrb[0].mxu0 }
 0x162   : > { %v416_v17 = vadd.f32 %v415_v16, %v1293_v15  ;;  %v1084_v18 = vpop.f32.mrb[1].mxu0 }
 0x163   : > { %v418_v19 = vpop.f32.mrb[2].mxu0 }
 0x164   : > { %v1085_v20 = vpop.f32.mrb[3].mxu0  ;;  %v421_v21 = vsel %vm374_vm1, %v416_v17, -inf }
 0x165   : > { %422 = vmax.xlane.f32.xlu0 %v421_v21 }
 0x17b   : > { %547 = vrot.lane.b32.xlu0 %v1276_v2, %s1201_s22 }
 0x1f2   : > { %v423_v24 = vpop.xlane.xlu0 %422 }
 0x1f3   : > { %v424_v25 = vsub.f32 %v416_v17, %v423_v24 }
 0x1f5   : > { %v425_v26 = vmul.f32 1.442695, %v424_v25 }
 0x1f6   : > { %v548_v38 = vpop.permute.xlu0 %547 }
 0x1f7   : > { %1165 = vpow2.f32 %v425_v26  ;;  %v553_v39 = vsel %vm438_vm4, %v548_v38, 0 }
 0x1f8   : > { %1099 = vmatpush3.bf16.msra.mxu0 %v553_v39 }
 0x1f9   : > { %1110 = vmatprep.subr.bf16.mxu0 %v1191_v0 }
 0x201   : > { %v1300_v29 = vpop.eup %1165 }
 0x202   : > { %v432_v31 = vpack.c.bf16 %v1300_v29, %v1300_v29  ;;  %v427_v21 = vsel %vm374_vm1, %v1300_v29, 0.0 }
 0x204   : > { %1089 = vmatmul.mubr.msk.bf16.vlgmr.msra.gmra.mrb[0].mxu1 %vm374_vm1, %v432_v31 }
 0x205   : > { %1093 = vmatpush3.bf16.xpose.msra.mxu1 %v493_v30  ;;  %1094 = vmatprep.mubr.msk.bf16.mxu1 %vm1192_vm0, %v1191_v0 }
 0x206   : > { %1104 = vmatprep.subr.bf16.mxu1 %v1191_v0 }
 0x20c   : > { %1095 = vmatmul.mubr.msk.bf16.vlgmr.msra.gmra.mrb[4].mxu1 %vm374_vm1, %v486_v28 }
 0x20d   : > { %1105 = vmatpush3.bf16.xpose.msra.mxu1 %v610_v34  ;;  %1106 = vmatprep.mubr.msk.bf16.mxu1 %vm1192_vm0, %v1191_v0  ;;  %v1163_v34 = vld [vmem:[%s1388_s3] sm:$0xff]  }
 0x20e   : > { %1116 = vmatprep.subr.bf16.mxu1 %v1191_v0 }
 0x214   : > { %1107 = vmatmul.mubr.msk.bf16.vlgmr.msra.gmra.mrb[8].mxu1 %vm374_vm1, %v603_v33 }
 0x215   : > { %1117 = vmatpush3.bf16.xpose.msra.mxu1 %v727_v36  ;;  %1118 = vmatprep.mubr.msk.bf16.mxu1 %vm1192_vm0, %v1191_v0 }
 0x216   : > { %1128 = vmatprep.subr.bf16.mxu1 %v1191_v0 }
 0x21c   : > { %1119 = vmatmul.mubr.msk.bf16.vlgmr.msra.gmra.mrb[12].mxu1 %vm374_vm1, %v720_v37  ;;  %v1164_v37 = vld [vmem:[%s1388_s3 + $0x8] sm:$0xff]  }
 0x21d   : > { %1132 = vmatprep.mubr.msk.bf16.mxu1 %vm1192_vm0, %v1191_v0  ;;  %1129 = vmatpush3.bf16.msra.mxu1 %v1163_v34 }
 0x21e   : > { %1130 = vmatprep.subr.bf16.mxu1 %v1191_v0 }
 0x221   : > { %1131 = vmatpush3.bf16.msra.mxu1 %v1164_v37 }
 0x2d7   : > { %v1324_v40 = vpop.f32.mrb[0].mxu1 }
 0x2d8   : > { %v1090_v41 = vpop.f32.mrb[1].mxu1 }
 0x2d9   : > { %v479_v42 = vpop.f32.mrb[2].mxu1 }
 0x2da   : > { %v1091_v43 = vpop.f32.mrb[3].mxu1 }
 0x2df   : > { %v529_v44 = vpop.f32.mrb[4].mxu1 }
 0x2e0   : > { %v530_v45 = vadd.f32 %v529_v44, %v1293_v15  ;;  %v1096_v46 = vpop.f32.mrb[5].mxu1 }
 0x2e1   : > { %v532_v47 = vpop.f32.mrb[6].mxu1 }
 0x2e2   : > { %v1097_v48 = vpop.f32.mrb[7].mxu1  ;;  %v535_v49 = vsel %vm374_vm1, %v530_v45, -inf }
 0x2e3   : > { %536 = vmax.xlane.f32.xlu1 %v535_v49 }
 0x2e7   : > { %v646_v50 = vpop.f32.mrb[8].mxu1 }
 0x2e8   : > { %v647_v51 = vadd.f32 %v646_v50, %v1293_v15  ;;  %v1108_v52 = vpop.f32.mrb[9].mxu1 }
 0x2e9   : > { %v649_v53 = vpop.f32.mrb[10].mxu1  ;;  %v905_v52 = vld [vmem:[%s340_s15] sm:$0xf] }
 0x2ea   : > { %v1109_v54 = vpop.f32.mrb[11].mxu1  ;;  %v652_v55 = vsel %vm374_vm1, %v647_v51, -inf  ;;  %v1053_v53 = vld [vmem:[%s1389_s4] ss:$0 sm:$0xff] }
 0x2eb   : > { %653 = vmax.xlane.f32.xlu0 %v652_v55  ;;  %v906_v54 = vunpack.c.l.bf16 %v905_v52 }
 0x2ef   : > { %v763_v56 = vpop.f32.mrb[12].mxu1 }
 0x2f0   : > { %v764_v57 = vadd.f32 %v763_v56, %v1293_v15  ;;  %v1120_v58 = vpop.f32.mrb[13].mxu1 }
 0x2f1   : > { %v766_v59 = vpop.f32.mrb[14].mxu1 }
 0x2f2   : > { %v1121_v60 = vpop.f32.mrb[15].mxu1  ;;  %v769_v61 = vsel %vm374_vm1, %v764_v57, -inf }
 0x2f3   : > { %770 = vmax.xlane.f32.xlu0 %v769_v61 }
 0x2f4   : > { %664 = vrot.lane.b32.xlu1 %v1276_v2, %s1202_s23 }
 0x309   : > { %781 = vrot.lane.b32.xlu0 %v1276_v2, %s1203_s24 }
 0x370   : > { %v537_v62 = vpop.xlane.xlu1 %536 }
 0x371   : > { %v538_v63 = vsub.f32 %v530_v45, %v537_v62  ;;  %v1207_v62 = vmov 0  }
 0x372   : > { %1161 = vset.pattern.permute.xlu0 %v1207_v62 }
 0x373   : > { %v539_v1 = vmul.f32 1.442695, %v538_v63  ;;  %v938_v63 = vld [vmem:[%s344_s21] sm:$0xff] }
 0x374   : > { %v665_v6 = vpop.permute.xlu1 %664 }
 0x375   : > { %1167 = vpow2.f32 %v539_v1  ;;  %v670_v8 = vsel %vm438_vm4, %v665_v6, 0  ;;  %v939_v1 = vsub.f32 1.0, %v938_v63 }
 0x378   : > { %v654_v3 = vpop.xlane.xlu0 %653 }
 0x379   : > { %v655_v4 = vsub.f32 %v647_v51, %v654_v3 }
 0x37b   : > { %v656_v5 = vmul.f32 1.442695, %v655_v4 }
 0x37d   : > { %1169 = vpow2.f32 %v656_v5 }
 0x37f   : > { %v1168_v7 = vpop.eup %1167 }
 0x380   : > { %v771_v9 = vpop.xlane.xlu0 %770  ;;  %v541_v10 = vsel %vm374_vm1, %v1168_v7, 0.0  ;;  %v546_v11 = vpack.c.bf16 %v1168_v7, %v1168_v7 }
 0x381   : > { %v772_v12 = vsub.f32 %v764_v57, %v771_v9  ;;  %542 = vadd.xlane.f32.xlu0 %v541_v10 }
 0x382   : > { %1101 = vmatmul.mubr.msk.bf16.vlgmr.msra.gmra.mrb[4].mxu0 %vm374_vm1, %v546_v11 }
 0x383   : > { %v773_v2 = vmul.f32 1.442695, %v772_v12  ;;  %1111 = vmatpush3.bf16.msra.mxu0 %v670_v8  ;;  %1112 = vmatprep.mubr.msk.bf16.mxu0 %vm1192_vm0, %v1191_v0  ;;  %v1057_v12 = vld [vmem:[%s1390_s5] ss:$0 sm:$0xff] }
 0x384   : > { %1122 = vmatprep.subr.bf16.mxu0 %v1191_v0  ;;  %v782_v13 = vpop.permute.xlu0 %781 }
 0x385   : > { %1171 = vpow2.f32 %v773_v2  ;;  %v787_v15 = vsel %vm438_vm4, %v782_v13, 0  ;;  %v1058_v13 = vld [vmem:[%s1391_s6] ss:$0 sm:$0xff] }
 0x387   : > { %v1170_v14 = vpop.eup %1169 }
 0x388   : > { %v658_v16 = vsel %vm374_vm1, %v1170_v14, 0.0  ;;  %v663_v17 = vpack.c.bf16 %v1170_v14, %v1170_v14 }
 0x389   : > { %659 = vadd.xlane.f32.xlu1 %v658_v16 }
 0x38a   : > { %1113 = vmatmul.mubr.msk.bf16.vlgmr.msra.gmra.mrb[8].mxu0 %vm374_vm1, %v663_v17 }
 0x38b   : > { %1123 = vmatpush3.bf16.msra.mxu0 %v787_v15  ;;  %1124 = vmatprep.mubr.msk.bf16.mxu0 %vm1192_vm0, %v1191_v0 }
 0x38f   : > { %v1172_v18 = vpop.eup %1171 }
 0x390   : > { %v775_v19 = vsel %vm374_vm1, %v1172_v18, 0.0  ;;  %v780_v20 = vpack.c.bf16 %v1172_v18, %v1172_v18 }
 0x391   : > { %776 = vadd.xlane.f32.xlu0 %v775_v19 }
 0x392   : > { %1125 = vmatmul.mubr.msk.bf16.vlgmr.msra.gmra.mrb[12].mxu0 %vm374_vm1, %v780_v20 }
 0x395   : > { %428 = vadd.xlane.f32.xlu0 %v427_v21 }
 0x40e   : > { %v543_v22 = vpop.xlane.xlu0 %542 }
 0x416   : > { %v660_v27 = vpop.xlane.xlu1 %659 }
 0x41e   : > { %v777_v23 = vpop.xlane.xlu0 %776 }
 0x422   : > { %v429_v24 = vpop.xlane.xlu0 %428 }
 0x423   : > { %1173 = vrcp.f32 %v429_v24 }
 0x424   : > { %1175 = vrcp.f32 %v543_v22 }
 0x425   : > { %1177 = vrcp.f32 %v660_v27 }
 0x426   : > { %1179 = vrcp.f32 %v777_v23 }
 0x42d   : > { %v1174_v25 = vpop.eup %1173 }
 0x42e   : > { %v482_v26 = vmul.f32 %v1174_v25, %v1324_v40  ;;  %v1176_v28 = vpop.eup %1175 }
 0x42f   : > { %v1178_v35 = vpop.eup %1177 }
 0x430   : > { %483 = vst.msk [vmem:[#allocation2] sm:$0xff] %vm374_vm1, %v482_v26  ;;  %v1180_v42 = vpop.eup %1179 }
 0x455   : > { %v589_v30 = vpop.f32.mrb[4].mxu0 }
 0x456   : > { %v595_v31 = vmul.f32 %v1176_v28, %v589_v30  ;;  %v1102_v32 = vpop.f32.mrb[5].mxu0 }
 0x457   : > { %v592_v33 = vpop.f32.mrb[6].mxu0 }
 0x458   : > { %597 = vrot.lane.b32.xlu0 %v595_v31, %s1204_s25  ;;  %v1103_v29 = vpop.f32.mrb[7].mxu0 }
 0x45d   : > { %v706_v36 = vpop.f32.mrb[8].mxu0 }
 0x45e   : > { %v712_v38 = vmul.f32 %v1178_v35, %v706_v36  ;;  %v1114_v39 = vpop.f32.mrb[9].mxu0 }
 0x45f   : > { %v709_v40 = vpop.f32.mrb[10].mxu0 }
 0x460   : > { %714 = vrot.lane.b32.xlu1 %v712_v38, %s1205_s11  ;;  %v1115_v41 = vpop.f32.mrb[11].mxu0 }
 0x465   : > { %v823_v43 = vpop.f32.mrb[12].mxu0 }
 0x466   : > { %v829_v44 = vmul.f32 %v1180_v42, %v823_v43  ;;  %v1126_v45 = vpop.f32.mrb[13].mxu0 }
 0x467   : > { %v826_v46 = vpop.f32.mrb[14].mxu0 }
 0x468   : > { %831 = vrot.lane.b32.xlu0 %v829_v44, %s1206_s12  ;;  %v1127_v47 = vpop.f32.mrb[15].mxu0 }
 0x4ca   : > { %v598_v48 = vpop.permute.xlu0 %597 }
 0x4cb   : > { %601 = vst.msk [vmem:[#allocation2] sm:$0xff] %vm600_vm5, %v598_v48 }
 0x4d2   : > { %v715_v49 = vpop.permute.xlu1 %714 }
 0x4d3   : > { %718 = vst.msk [vmem:[#allocation2] sm:$0xff] %vm717_vm6, %v715_v49 }
 0x4da   : > { %v832_v0 = vpop.permute.xlu0 %831 }
 0x4db   : > { %835 = vst.msk [vmem:[#allocation2] sm:$0xff] %vm834_vm7, %v832_v0 }
 0x4e2   : > { %v836_v50 = vld [vmem:[#allocation2] sm:$0xff] }
 0x4e3   : > { %v837_v51 = vpack.c.bf16 %v836_v50, %v836_v50 }
 0x4e5   : > { %1133 = vmatmul.mubr.msk.bf16.vlgmr.msra.gmra.mrb[16].mxu1 %vm861_vm8, %v837_v51 }
 0x5b8   : > { %v899_v55 = vpop.f32.mrb[16].mxu1 }
 0x5b9   : > { %v900_v56 = vadd.f32 %v1053_v53, %v899_v55  ;;  %v1134_v57 = vpop.f32.mrb[17].mxu1 }
 0x5ba   : > { %v902_v58 = vpop.f32.mrb[18].mxu1 }
 0x5bb   : > { %v1135_v59 = vpop.f32.mrb[19].mxu1  ;;  %v907_v60 = vadd.f32 %v906_v54, %v900_v56 }
 0x5bd   : > { %v908_v61 = vsel %vm861_vm8, %v907_v60, 0.0 }
 0x5be   : > { %909 = vadd.xlane.f32.xlu0 %v908_v61 }
 0x5d4   : > { %942 = vperm.xlu0 %1161, %v939_v1  }
 0x64b   : > { %v910_v3 = vpop.xlane.xlu0 %909 }
 0x64c   : > { %v912_v4 = vmul.f32 0.03125, %v910_v3 }
 0x64e   : > { %v913_v5 = vsub.f32 %v907_v60, %v912_v4 }
 0x650   : > { %v914_v6 = vmul.f32 %v913_v5, %v913_v5 }
 0x652   : > { %v915_v7 = vsel %vm861_vm8, %v914_v6, 0.0 }
 0x653   : > { %916 = vadd.xlane.f32.xlu1 %v915_v7  ;;  %v943_v15 = vpop.permute.xlu0 %942 }
 0x6e0   : > { %v917_v8 = vpop.xlane.xlu1 %916 }
 0x6e1   : > { %v918_v9 = vmul.f32 0.03125, %v917_v8 }
 0x6e3   : > { %v919_v10 = vadd.f32 1e-05, %v918_v9 }
 0x6e5   : > { %1181 = vrsqrt.f32 %v919_v10 }
 0x6ef   : > { %v1182_v11 = vpop.eup %1181 }
 0x6f0   : > { %v921_v2 = vmul.f32 %v1182_v11, %v913_v5 }
 0x6f2   : > { %v929_v14 = vmul.f32 %v1057_v12, %v921_v2 }
 0x6f4   : > { %v937_v16 = vadd.f32 %v1058_v13, %v929_v14 }
 0x6f6   : > { %v945_v17 = vmul.f32 %v943_v15, %v937_v16 }
 0x6f8   : > { %v946_v18 = vpack.c.bf16 %v945_v17, %v945_v17 }
 0x6fa   : > { %948 = vst.msk [vmem:[%s348_s30] sm:$0xf] %vm947_vm9, %v946_v18 }
 0x6fb PF: > { %s18_s27 = sadd.s32 1, %s1189_s27  }
 0x6fc   : > { %p15_p4 = scmp.ge.s32.totalorder %s18_s27, 4  }
 0x6fe   :  { %17 = sbr.rel (!%p15_p4) target bundleno = 1 (0x1), region = 91 }

// kernel: adaptive_decoder_forward.31
= control target key start
LH: loop header
LB: loop body
LE: loop exit
PB: predicated region body
PF: predicated region fallthrough
CT: control target
= control target key end

     0   :  { %vm19_vm0 = vcmask 523264   ;;  %v153_v0 = vmov 0.0   ;;  %vm154_vm1 = vmmov 0   ;;  %vm47_vm2 = vcmask 261120   ;;  %s197_s1 = inlined_call_operand.vmem [shape: bf16[32,64], index: 1, kind: input, shape index: {}]   ;;  %s198_s0 = inlined_call_operand.vmem [shape: bf16[16,32], index: 0, kind: input, shape index: {}]   ;;  %s199_s2 = inlined_call_operand.vmem [shape: f32[1,64], index: 2, kind: input, shape index: {}]   ;;  %s200_s3 = inlined_call_operand.vmem [shape: bf16[16,64], index: 3, kind: output, shape index: {}]  }
   0x1   :  { %140 = vmatprep.subr.bf16.mxu0 %v153_v0  ;;  %v150_v1 = vld [vmem:[%s197_s1] sm:$0xff]   ;;  %144 = vmatprep.mubr.msk.bf16.mxu0 %vm154_vm1, %v153_v0  ;;  %20 = vst.msk [vmem:[#allocation2] sm:$0xff] %vm19_vm0, %v153_v0  ;;  %21 = vst.msk [vmem:[#allocation2 + $0x8] sm:$0xff] %vm19_vm0, %v153_v0  ;;  %v151_v2 = vld [vmem:[%s197_s1 + $0x8] sm:$0xff]   ;;  %vm121_vm3 = vcmask 519168  }
   0x2   :  { %141 = vmatpush3.bf16.msra.mxu0 %v150_v1  ;;  %v152_v3 = vld [vmem:[%s198_s0] sm:$0xff]  }
   0x3   :  { %142 = vmatprep.subr.bf16.mxu0 %v153_v0  ;;  %v132_v12 = vld [vmem:[%s199_s2] ss:$0 sm:$0xff] }
   0x6   :  { %143 = vmatpush3.bf16.msra.mxu0 %v151_v2 }
   0x8   :  { %v22_v4 = vld [vmem:[#allocation2] sm:$0xff]  ;;  %v23_v6 = vld [vmem:[#allocation2 + $0x8] sm:$0xff] }
   0x9   :  { %145 = vmatmul.mubr.msk.bf16.vlgmr.msra.gmra.mrb[0].mxu0 %vm47_vm2, %v152_v3 }
  0xdc   :  { %v85_v5 = vpop.f32.mrb[0].mxu0 }
  0xdd   :  { %v92_v7 = vadd.f32 %v85_v5, %v22_v4  ;;  %v146_v8 = vpop.f32.mrb[1].mxu0 }
  0xde   :  { %v88_v9 = vpop.f32.mrb[2].mxu0 }
  0xdf   :  { %95 = vst.msk [vmem:[#allocation2] sm:$0xff] %vm19_vm0, %v92_v7  ;;  %v93_v10 = vadd.f32 %v88_v9, %v23_v6  ;;  %v147_v11 = vpop.f32.mrb[3].mxu0 }
  0xe1   :  { %96 = vst.msk [vmem:[#allocation2 + $0x8] sm:$0xff] %vm19_vm0, %v93_v10 }
  0xe6   :  { %v100_v13 = vld [vmem:[#allocation2] sm:$0xff] }
  0xe7   :  { %v109_v14 = vadd.f32 %v132_v12, %v100_v13 }
  0xe8   :  { %v101_v15 = vld [vmem:[#allocation2 + $0x8] sm:$0xff] }
  0xe9   :  { %v111_v16 = vmax.f32 %v109_v14, 0.0  ;;  %v110_v17 = vadd.f32 %v132_v12, %v101_v15 }
  0xeb   :  { %v135_v18 = vpack.c.bf16 %v111_v16, %v111_v16  ;;  %v112_v19 = vmax.f32 %v110_v17, 0.0 }
  0xed   :  { %122 = vst.msk [vmem:[%s200_s3] sm:$0xf] %vm121_vm3, %v135_v18  ;;  %v136_v20 = vpack.c.bf16 %v112_v19, %v112_v19 }
  0xef   :  { %123 = vst.msk [vmem:[%s200_s3 + $0x4] sm:$0xf] %vm121_vm3, %v136_v20 }

// kernel: adaptive_decoder_forward.32
= control target key start
LH: loop header
LB: loop body
LE: loop exit
PB: predicated region body
PF: predicated region fallthrough
CT: control target
= control target key end

     0   :  { %vm31_vm0 = vcmask 261120   ;;  %v250_v0 = vmov 0.0   ;;  %vm251_vm1 = vmmov 0   ;;  %vm75_vm2 = vcmask 523264   ;;  %s333_s6 = inlined_call_operand.vmem [shape: f32[16,1], index: 6, kind: input, shape index: {}]   ;;  %s334_s1 = inlined_call_operand.vmem [shape: bf16[64,32], index: 1, kind: input, shape index: {}]   ;;  %s335_s0 = inlined_call_operand.vmem [shape: bf16[16,64], index: 0, kind: input, shape index: {}]   ;;  %s336_s3 = inlined_call_operand.vmem [shape: bf16[16,32], index: 3, kind: input, shape index: {}]   ;;  %s337_s2 = inlined_call_operand.vmem [shape: f32[1,32], index: 2, kind: input, shape index: {}]   ;;  %s338_s4 = inlined_call_operand.vmem [shape: f32[1,32], index: 4, kind: input, shape index: {}]   ;;  %s339_s5 = inlined_call_operand.vmem [shape: f32[1,32], index: 5, kind: input, shape index: {}]   ;;  %s340_s7 = inlined_call_operand.vmem [shape: bf16[16,32], index: 7, kind: output, shape index: {}]  }
   0x1   :  { %227 = vmatprep.subr.bf16.mxu0 %v250_v0  ;;  %v241_v1 = vld [vmem:[%s334_s1] sm:$0xff]   ;;  %235 = vmatprep.mubr.msk.bf16.mxu0 %vm251_vm1, %v250_v0  ;;  %32 = vst.msk [vmem:[#allocation2] sm:$0xff] %vm31_vm0, %v250_v0  ;;  %33 = vst.msk [vmem:[#allocation2 + $0x8] sm:$0xff] %vm31_vm0, %v250_v0  ;;  %v242_v2 = vld [vmem:[%s334_s1 + $0x8] sm:$0xff]   ;;  %vm198_vm3 = vcmask 257024  }
   0x2   :  { %228 = vmatpush3.bf16.msra.mxu0 %v241_v1  ;;  %v243_v3 = vld [vmem:[%s334_s1 + $0x10] sm:$0xff]   ;;  %v244_v4 = vld [vmem:[%s334_s1 + $0x18] sm:$0xff]   ;;  %v245_v5 = vld [vmem:[%s335_s0] sm:$0xff]  }
   0x3   :  { %229 = vmatprep.subr.bf16.mxu0 %v250_v0  ;;  %v219_v14 = vld [vmem:[%s336_s3] sm:$0xff]  }
   0x4   :  { %v211_v15 = vld [vmem:[%s337_s2] ss:$0 sm:$0xff]  ;;  %v220_v16 = vunpack.c.l.bf16 %v219_v14  ;;  %v221_v19 = vunpack.c.h.bf16 %v219_v14 }
   0x5   :  { %v212_v43 = vld [vmem:[%s338_s4] ss:$0 sm:$0xff] }
   0x6   :  { %230 = vmatpush3.bf16.msra.mxu0 %v242_v2  ;;  %v213_v45 = vld [vmem:[%s339_s5] ss:$0 sm:$0xff] }
   0x7   :  { %231 = vmatprep.subr.bf16.mxu0 %v250_v0 }
   0x8   :  { %v34_v6 = vld [vmem:[#allocation2] sm:$0xff]  ;;  %v35_v8 = vld [vmem:[#allocation2 + $0x8] sm:$0xff] }
   0xa   :  { %232 = vmatpush3.bf16.msra.mxu0 %v243_v3 }
   0xb   :  { %233 = vmatprep.subr.bf16.mxu0 %v250_v0 }
   0xe   :  { %234 = vmatpush3.bf16.msra.mxu0 %v244_v4 }
  0x11   :  { %236 = vmatmul.mubr.msk.bf16.vlgmr.msra.gmra.mrb[0].mxu0 %vm75_vm2, %v245_v5 }
  0xe4   :  { %v113_v7 = vpop.f32.mrb[0].mxu0 }
  0xe5   :  { %v120_v9 = vadd.f32 %v113_v7, %v34_v6  ;;  %v237_v10 = vpop.f32.mrb[1].mxu0 }
  0xe6   :  { %v116_v11 = vpop.f32.mrb[2].mxu0 }
  0xe7   :  { %123 = vst.msk [vmem:[#allocation2] sm:$0xff] %vm31_vm0, %v120_v9  ;;  %v121_v12 = vadd.f32 %v116_v11, %v35_v8  ;;  %v238_v13 = vpop.f32.mrb[3].mxu0 }
  0xe9   :  { %124 = vst.msk [vmem:[#allocation2 + $0x8] sm:$0xff] %vm31_vm0, %v121_v12 }
  0xee   :  { %v128_v17 = vld [vmem:[#allocation2] sm:$0xff] }
  0xef   :  { %v137_v18 = vadd.f32 %v211_v15, %v128_v17 }
  0xf0   :  { %v129_v20 = vld [vmem:[#allocation2 + $0x8] sm:$0xff] }
  0xf1   :  { %v143_v21 = vadd.f32 %v220_v16, %v137_v18  ;;  %v138_v22 = vadd.f32 %v211_v15, %v129_v20 }
  0xf3   :  { %v145_v23 = vsel %vm31_vm0, %v143_v21, 0.0  ;;  %v144_v24 = vadd.f32 %v221_v19, %v138_v22 }
  0xf4   :  { %146 = vadd.xlane.f32.xlu0 %v145_v23 }
  0xf5   :  { %v148_v25 = vsel %vm31_vm0, %v144_v24, 0.0 }
  0xf8   :  { %149 = vadd.xlane.f32.xlu0 %v148_v25 }
 0x181   :  { %v147_v26 = vpop.xlane.xlu0 %146 }
 0x182   :  { %v152_v27 = vmul.f32 0.03125, %v147_v26 }
 0x184   :  { %v154_v28 = vsub.f32 %v143_v21, %v152_v27 }
 0x185   :  { %v150_v29 = vpop.xlane.xlu0 %149 }
 0x186   :  { %v153_v30 = vmul.f32 0.03125, %v150_v29  ;;  %v156_v31 = vmul.f32 %v154_v28, %v154_v28 }
 0x188   :  { %v155_v32 = vsub.f32 %v144_v24, %v153_v30  ;;  %v158_v33 = vsel %vm31_vm0, %v156_v31, 0.0 }
 0x189   :  { %159 = vadd.xlane.f32.xlu1 %v158_v33 }
 0x18a   :  { %v157_v34 = vmul.f32 %v155_v32, %v155_v32 }
 0x18c   :  { %v161_v35 = vsel %vm31_vm0, %v157_v34, 0.0 }
 0x18d   :  { %162 = vadd.xlane.f32.xlu1 %v161_v35 }
 0x216   :  { %v160_v36 = vpop.xlane.xlu1 %159 }
 0x217   :  { %v164_v37 = vmul.f32 0.03125, %v160_v36 }
 0x219   :  { %v166_v38 = vadd.f32 1e-05, %v164_v37 }
 0x21a   :  { %v163_v39 = vpop.xlane.xlu1 %162 }
 0x21b   :  { %246 = vrsqrt.f32 %v166_v38  ;;  %v165_v40 = vmul.f32 0.03125, %v163_v39 }
 0x21d   :  { %v167_v41 = vadd.f32 1e-05, %v165_v40 }
 0x21f   :  { %248 = vrsqrt.f32 %v167_v41 }
 0x225   :  { %v247_v42 = vpop.eup %246 }
 0x226   :  { %v170_v44 = vmul.f32 %v247_v42, %v154_v28 }
 0x228   :  { %v179_v46 = vmul.f32 %v212_v43, %v170_v44 }
 0x229   :  { %v249_v47 = vpop.eup %248 }
 0x22a   :  { %v188_v48 = vadd.f32 %v213_v45, %v179_v46  ;;  %v171_v49 = vmul.f32 %v249_v47, %v155_v32 }
 0x22c   :  { %v216_v50 = vpack.c.bf16 %v188_v48, %v188_v48  ;;  %v180_v51 = vmul.f32 %v212_v43, %v171_v49 }
 0x22e   :  { %199 = vst.msk [vmem:[%s340_s7] sm:$0xf] %vm198_vm3, %v216_v50  ;;  %v189_v52 = vadd.f32 %v213_v45, %v180_v51 }
 0x230   :  { %v217_v53 = vpack.c.bf16 %v189_v52, %v189_v52 }
 0x232   :  { %200 = vst.msk [vmem:[%s340_s7 + $0x4] sm:$0xf] %vm198_vm3, %v217_v53 }

// kernel: adaptive_decoder_forward.44
= control target key start
LH: loop header
LB: loop body
LE: loop exit
PB: predicated region body
PF: predicated region fallthrough
CT: control target
= control target key end

     0   :  { %vm19_vm0 = vcmask 523264   ;;  %v151_v0 = vmov 0.0   ;;  %vm152_vm1 = vmmov 0   ;;  %vm47_vm2 = vcmask 261120   ;;  %s195_s1 = inlined_call_operand.vmem [shape: bf16[32,64], index: 1, kind: input, shape index: {}]   ;;  %s196_s0 = inlined_call_operand.vmem [shape: bf16[16,32], index: 0, kind: input, shape index: {}]   ;;  %s197_s2 = inlined_call_operand.vmem [shape: f32[1,64], index: 2, kind: input, shape index: {}]   ;;  %s198_s3 = inlined_call_operand.vmem [shape: bf16[16,64], index: 3, kind: output, shape index: {}]  }
   0x1   :  { %138 = vmatprep.subr.bf16.mxu0 %v151_v0  ;;  %v148_v1 = vld [vmem:[%s195_s1] sm:$0xff]   ;;  %142 = vmatprep.mubr.msk.bf16.mxu0 %vm152_vm1, %v151_v0  ;;  %20 = vst.msk [vmem:[#allocation2] sm:$0xff] %vm19_vm0, %v151_v0  ;;  %21 = vst.msk [vmem:[#allocation2 + $0x8] sm:$0xff] %vm19_vm0, %v151_v0  ;;  %v149_v2 = vld [vmem:[%s195_s1 + $0x8] sm:$0xff]   ;;  %vm119_vm3 = vcmask 519168  }
   0x2   :  { %139 = vmatpush3.bf16.msra.mxu0 %v148_v1  ;;  %v150_v3 = vld [vmem:[%s196_s0] sm:$0xff]  }
   0x3   :  { %140 = vmatprep.subr.bf16.mxu0 %v151_v0  ;;  %v130_v12 = vld [vmem:[%s197_s2] ss:$0 sm:$0xff] }
   0x6   :  { %141 = vmatpush3.bf16.msra.mxu0 %v149_v2 }
   0x8   :  { %v22_v4 = vld [vmem:[#allocation2] sm:$0xff]  ;;  %v23_v6 = vld [vmem:[#allocation2 + $0x8] sm:$0xff] }
   0x9   :  { %143 = vmatmul.mubr.msk.bf16.vlgmr.msra.gmra.mrb[0].mxu0 %vm47_vm2, %v150_v3 }
  0xdc   :  { %v85_v5 = vpop.f32.mrb[0].mxu0 }
  0xdd   :  { %v92_v7 = vadd.f32 %v85_v5, %v22_v4  ;;  %v144_v8 = vpop.f32.mrb[1].mxu0 }
  0xde   :  { %v88_v9 = vpop.f32.mrb[2].mxu0 }
  0xdf   :  { %95 = vst.msk [vmem:[#allocation2] sm:$0xff] %vm19_vm0, %v92_v7  ;;  %v93_v10 = vadd.f32 %v88_v9, %v23_v6  ;;  %v145_v11 = vpop.f32.mrb[3].mxu0 }
  0xe1   :  { %96 = vst.msk [vmem:[#allocation2 + $0x8] sm:$0xff] %vm19_vm0, %v93_v10 }
  0xe6   :  { %v100_v13 = vld [vmem:[#allocation2] sm:$0xff] }
  0xe7   :  { %v109_v14 = vadd.f32 %v130_v12, %v100_v13 }
  0xe8   :  { %v101_v15 = vld [vmem:[#allocation2 + $0x8] sm:$0xff] }
  0xe9   :  { %v133_v16 = vpack.c.bf16 %v109_v14, %v109_v14  ;;  %v110_v17 = vadd.f32 %v130_v12, %v101_v15 }
  0xeb   :  { %120 = vst.msk [vmem:[%s198_s3] sm:$0xf] %vm119_vm3, %v133_v16  ;;  %v134_v18 = vpack.c.bf16 %v110_v17, %v110_v17 }
  0xed   :  { %121 = vst.msk [vmem:[%s198_s3 + $0x4] sm:$0xf] %vm119_vm3, %v134_v18 }

// kernel: adaptive_decoder_forward.30
= control target key start
LH: loop header
LB: loop body
LE: loop exit
PB: predicated region body
PF: predicated region fallthrough
CT: control target
= control target key end

     0   :  { %s1309_s30 = smov 0   ;;  %s1448_s0 = inlined_call_operand.vmem [shape: bf16[2,8,32], index: 0, kind: input, shape index: {}]   ;;  %s1449_s1 = inlined_call_operand.vmem [shape: bf16[2,10,64], index: 1, kind: input, shape index: {}]   ;;  %s1450_s2 = inlined_call_operand.vmem [shape: f32[2,1,10], index: 2, kind: input, shape index: {}]   ;;  %s1451_s3 = inlined_call_operand.vmem [shape: bf16[2,8,32], index: 3, kind: input, shape index: {}]   ;;  %s1452_s4 = inlined_call_operand.vmem [shape: bf16[32,32], index: 4, kind: input, shape index: {}]   ;;  %s1453_s5 = inlined_call_operand.vmem [shape: f32[1,32], index: 5, kind: input, shape index: {}]   ;;  %s1454_s6 = inlined_call_operand.vmem [shape: f32[1,32], index: 6, kind: input, shape index: {}]   ;;  %s1455_s7 = inlined_call_operand.vmem [shape: f32[1,32], index: 7, kind: input, shape index: {}]   ;;  %s1456_s8 = inlined_call_operand.vmem [shape: f32[2,8,1], index: 8, kind: input, shape index: {}]   ;;  %s1457_s9 = inlined_call_operand.vmem [shape: bf16[2,8,32], index: 9, kind: output, shape index: {}]  }
   0x1 LB: > { %s1091_s10 = sadd.s32 4294967295, %s1244_s30   ;;  %p1095_p0 = scmp.ge.s32.totalorder %s1244_s30, 1  ;;  %s1244_s30 = sphi %s1309_s30, %s19_s30  }
   0x2   : > { %p322_p1 = scmp.lt.s32.totalorder %s1244_s30, 3 }
   0x4   : > { %p323_p2 = pnand %p1095_p0, %p322_p1 }
   0x5   : > { %p372_p3 = scmp.lt.s32.totalorder (!%p323_p2), %s1091_s10, 1  ;;  %v1246_v0 = vmov (!%p323_p2), 0.0   ;;  %vm1247_vm0 = vmmov (!%p323_p2), 0   ;;  %vm417_vm1 = vcmask (!%p323_p2), 64512   ;;  %s1248_s19 = smov (!%p323_p2), 120   ;;  %v404_v7 = vlaneseq (!%p323_p2) }
   0x6   : > { %326 = sbr.rel (%p323_p2) target bundleno = 1670 (0x686), region = 56  ;;  %1139 = vmatprep.subr.bf16.mxu0 (!%p323_p2), %v1246_v0  ;;  %1141 = vmatprep.mubr.msk.bf16.mxu0 (!%p323_p2), %vm1247_vm0, %v1246_v0  ;;  %s1249_s20 = smov (!%p323_p2), 112   ;;  %vm464_vm3 = vcmask (!%p323_p2), 80896   ;;  %vm482_vm4 = vcmask (!%p323_p2), 1044480   ;;  %vm644_vm5 = vcmask (!%p323_p2), 130112   ;;  %vm761_vm6 = vcmask (!%p323_p2), 195712  }
   0x7   : > { %1145 = vmatprep.subr.bf16.mxu1 (!%p323_p2), %v1246_v0  ;;  %1147 = vmatprep.mubr.msk.bf16.mxu1 (!%p323_p2), %vm1247_vm0, %v1246_v0  ;;  %s1250_s21 = smov (!%p323_p2), 104   ;;  %v405_v9 = vshrl.u32 (!%p323_p2), %v404_v7, 7  ;;  %s1251_s25 = smov (!%p323_p2), 96   ;;  %vm878_vm7 = vcmask (!%p323_p2), 261312   ;;  %vm905_vm8 = vcmask (!%p323_p2), 261120   ;;  %vm991_vm9 = vcmask (!%p323_p2), 257024  }
   0x8   : > { %s1252_s26 = smov (!%p323_p2), 88   ;;  %s1253_s27 = smov (!%p323_p2), 72  }
   0x9   : > { %v406_v10 = vsub.s32 (!%p323_p2), 0, %v405_v9  ;;  %s1254_s28 = smov (!%p323_p2), 80   ;;  %s1255_s29 = smov (!%p323_p2), 8  }
   0xa   : > { %s1256_s17 = smov (!%p323_p2), 16  }
   0xd   : > { %s1459_s10 = smov (!%p372_p3, %s1091_s10), 1 }
   0xe   : > { %s1119_s11 = sshll.u32 %s1459_s10, 3  ;;  %s1327_s12 = sshll.u32 %s1459_s10, 2 }
   0xf   : > { %s380_s15 = scalar_lea.vmem %s1449_s1, %s1119_s11  ;;  %s375_s18 = scalar_lea.vmem %s1448_s0, %s1327_s12 }
  0x10   : > { %v1338_v1 = vld [vmem:[%s380_s15] sm:$0x1f]   ;;  %s383_s24 = scalar_lea.vmem %s1450_s2, %s1459_s10  ;;  %s395_s14 = scalar_lea.vmem %s1457_s9, %s1327_s12 }
  0x11   : > { %v397_v2 = vld [vmem:[%s375_s18] sm:$0xf]  ;;  %v422_v3 = vsel %vm417_vm1, %v1338_v1, 0  ;;  %531 = vrot.lane.b32.xlu1 %v1338_v1, %s1248_s19  ;;  %s1257_s18 = smov 24  }
  0x12   : > { %v409_v4 = vunpack.c.l.bf16 %v397_v2  ;;  %1140 = vmatpush3.bf16.xpose.msra.mxu0 %v422_v3  ;;  %v400_v8 = vld [vmem:[%s383_s24] sm:$0x1] }
  0x13   : > { %1157 = vmatprep.subr.bf16.mxu0 %v1246_v0  ;;  %vm401_vm2 = vcmp.gt.f32.partialorder %v400_v8, 0.5 }
  0x14   : > { %v410_v5 = vmul.f32 0.35355338, %v409_v4  ;;  %v402_v11 = vsel %vm401_vm2, -1e+30, %v1246_v0 }
  0x15   : > { %v1354_v12 = vrot.slane %v402_v11, %v406_v10 }
  0x16   : > { %v411_v6 = vpack.c.bf16 %v410_v5, %v410_v5 }
  0x18   : > { %529 = vrot.lane.b32.xlu1 %v411_v6, %s1248_s19 }
  0x19   : > { %1142 = vmatmul.mubr.msk.bf16.vlgmr.msra.gmra.mrb[0].mxu0 %vm417_vm1, %v411_v6 }
  0x1a   : > { %1159 = vmatprep.mubr.msk.bf16.mxu0 %vm1247_vm0, %v1246_v0 }
  0x1c   : > { %648 = vrot.lane.b32.xlu1 %v1338_v1, %s1249_s20 }
  0x20   : > { %646 = vrot.lane.b32.xlu1 %v411_v6, %s1249_s20 }
  0x24   : > { %765 = vrot.lane.b32.xlu1 %v1338_v1, %s1250_s21 }
  0x28   : > { %763 = vrot.lane.b32.xlu1 %v411_v6, %s1250_s21  ;;  %s387_s21 = scalar_lea.vmem %s1451_s3, %s1327_s12 }
  0x83   : > { %v532_v24 = vpop.permute.xlu1 %531 }
  0x84   : > { %v537_v27 = vsel %vm417_vm1, %v532_v24, 0 }
  0x8a   : > { %v530_v25 = vpop.permute.xlu1 %529 }
  0x8e   : > { %v649_v29 = vpop.permute.xlu1 %648 }
  0x8f   : > { %v654_v31 = vsel %vm417_vm1, %v649_v29, 0 }
  0x92   : > { %v647_v30 = vpop.permute.xlu1 %646 }
  0x96   : > { %v766_v32 = vpop.permute.xlu1 %765 }
  0x97   : > { %v771_v33 = vsel %vm417_vm1, %v766_v32, 0 }
  0x9a   : > { %v764_v34 = vpop.permute.xlu1 %763 }
  0xec   : > { %v458_v13 = vpop.f32.mrb[0].mxu0 }
  0xed   : > { %v459_v14 = vadd.f32 %v458_v13, %v1354_v12  ;;  %v1143_v15 = vpop.f32.mrb[1].mxu0 }
  0xee   : > { %v461_v16 = vpop.f32.mrb[2].mxu0 }
  0xef   : > { %v1144_v17 = vpop.f32.mrb[3].mxu0  ;;  %v465_v18 = vsel %vm464_vm3, %v459_v14, -inf }
  0xf0   : > { %466 = vmax.xlane.f32.xlu0 %v465_v18 }
 0x106   : > { %477 = vrot.lane.b32.xlu0 %v1338_v1, %s1251_s25 }
 0x17d   : > { %v467_v19 = vpop.xlane.xlu0 %466 }
 0x17e   : > { %v468_v20 = vsub.f32 %v459_v14, %v467_v19 }
 0x180   : > { %v469_v21 = vmul.f32 1.442695, %v468_v20 }
 0x181   : > { %v478_v22 = vpop.permute.xlu0 %477 }
 0x182   : > { %1220 = vpow2.f32 %v469_v21  ;;  %v484_v23 = vsel %vm482_vm4, %v478_v22, 0 }
 0x183   : > { %1146 = vmatpush3.bf16.msra.mxu1 %v484_v23 }
 0x184   : > { %1151 = vmatprep.subr.bf16.mxu1 %v1246_v0 }
 0x18c   : > { %v1361_v26 = vpop.eup %1220 }
 0x18d   : > { %v476_v28 = vpack.c.bf16 %v1361_v26, %v1361_v26  ;;  %v471_v9 = vsel %vm464_vm3, %v1361_v26, 0.0 }
 0x18f   : > { %1148 = vmatmul.mubr.msk.bf16.vlgmr.msra.gmra.mrb[0].mxu1 %vm464_vm3, %v476_v28 }
 0x190   : > { %1152 = vmatpush3.bf16.xpose.msra.mxu1 %v537_v27  ;;  %1153 = vmatprep.mubr.msk.bf16.mxu1 %vm1247_vm0, %v1246_v0 }
 0x191   : > { %1163 = vmatprep.subr.bf16.mxu1 %v1246_v0 }
 0x197   : > { %1154 = vmatmul.mubr.msk.bf16.vlgmr.msra.gmra.mrb[4].mxu1 %vm417_vm1, %v530_v25 }
 0x198   : > { %1164 = vmatpush3.bf16.xpose.msra.mxu1 %v654_v31  ;;  %1165 = vmatprep.mubr.msk.bf16.mxu1 %vm1247_vm0, %v1246_v0  ;;  %v1218_v31 = vld [vmem:[%s1452_s4] sm:$0xff]  }
 0x199   : > { %1175 = vmatprep.subr.bf16.mxu1 %v1246_v0 }
 0x19f   : > { %1166 = vmatmul.mubr.msk.bf16.vlgmr.msra.gmra.mrb[8].mxu1 %vm417_vm1, %v647_v30 }
 0x1a0   : > { %1176 = vmatpush3.bf16.xpose.msra.mxu1 %v771_v33  ;;  %1177 = vmatprep.mubr.msk.bf16.mxu1 %vm1247_vm0, %v1246_v0 }
 0x1a1   : > { %1187 = vmatprep.subr.bf16.mxu1 %v1246_v0 }
 0x1a7   : > { %1178 = vmatmul.mubr.msk.bf16.vlgmr.msra.gmra.mrb[12].mxu1 %vm417_vm1, %v764_v34  ;;  %v1219_v34 = vld [vmem:[%s1452_s4 + $0x8] sm:$0xff]  }
 0x1a8   : > { %1191 = vmatprep.mubr.msk.bf16.mxu1 %vm1247_vm0, %v1246_v0  ;;  %1188 = vmatpush3.bf16.msra.mxu1 %v1218_v31 }
 0x1a9   : > { %1189 = vmatprep.subr.bf16.mxu1 %v1246_v0 }
 0x1ac   : > { %1190 = vmatpush3.bf16.msra.mxu1 %v1219_v34 }
 0x262   : > { %v1383_v35 = vpop.f32.mrb[0].mxu1 }
 0x263   : > { %v1149_v36 = vpop.f32.mrb[1].mxu1 }
 0x264   : > { %v523_v37 = vpop.f32.mrb[2].mxu1 }
 0x265   : > { %v1150_v38 = vpop.f32.mrb[3].mxu1 }
 0x26a   : > { %v573_v39 = vpop.f32.mrb[4].mxu1 }
 0x26b   : > { %v574_v40 = vadd.f32 %v573_v39, %v1354_v12  ;;  %v1155_v41 = vpop.f32.mrb[5].mxu1 }
 0x26c   : > { %v576_v42 = vpop.f32.mrb[6].mxu1 }
 0x26d   : > { %v1156_v43 = vpop.f32.mrb[7].mxu1  ;;  %v579_v44 = vsel %vm464_vm3, %v574_v40, -inf }
 0x26e   : > { %580 = vmax.xlane.f32.xlu1 %v579_v44 }
 0x272   : > { %v690_v45 = vpop.f32.mrb[8].mxu1 }
 0x273   : > { %v691_v46 = vadd.f32 %v690_v45, %v1354_v12  ;;  %v1167_v47 = vpop.f32.mrb[9].mxu1 }
 0x274   : > { %v693_v48 = vpop.f32.mrb[10].mxu1 }
 0x275   : > { %v1168_v49 = vpop.f32.mrb[11].mxu1  ;;  %v696_v50 = vsel %vm464_vm3, %v691_v46, -inf }
 0x276   : > { %697 = vmax.xlane.f32.xlu0 %v696_v50  ;;  %v949_v49 = vld [vmem:[%s387_s21] sm:$0xf] }
 0x277   : > { %v1111_v50 = vld [vmem:[%s1453_s5] ss:$0 sm:$0xff] }
 0x27a   : > { %v807_v51 = vpop.f32.mrb[12].mxu1 }
 0x27b   : > { %v808_v52 = vadd.f32 %v807_v51, %v1354_v12  ;;  %v1179_v53 = vpop.f32.mrb[13].mxu1  ;;  %v950_v51 = vunpack.c.l.bf16 %v949_v49 }
 0x27c   : > { %v810_v54 = vpop.f32.mrb[14].mxu1 }
 0x27d   : > { %v1180_v55 = vpop.f32.mrb[15].mxu1  ;;  %v813_v56 = vsel %vm464_vm3, %v808_v52, -inf }
 0x27e   : > { %814 = vmax.xlane.f32.xlu0 %v813_v56 }
 0x27f   : > { %591 = vrot.lane.b32.xlu1 %v1338_v1, %s1252_s26  ;;  %s391_s26 = scalar_lea.vmem %s1456_s8, %s1119_s11 }
 0x283   : > { %825 = vrot.lane.b32.xlu1 %v1338_v1, %s1253_s27 }
 0x294   : > { %708 = vrot.lane.b32.xlu0 %v1338_v1, %s1254_s28 }
 0x2fb   : > { %v581_v57 = vpop.xlane.xlu1 %580 }
 0x2fc   : > { %v582_v58 = vsub.f32 %v574_v40, %v581_v57 }
 0x2fe   : > { %v583_v59 = vmul.f32 1.442695, %v582_v58 }
 0x2ff   : > { %v592_v60 = vpop.permute.xlu1 %591 }
 0x300   : > { %1222 = vpow2.f32 %v583_v59  ;;  %v597_v61 = vsel %vm482_vm4, %v592_v60, 0  ;;  %v1258_v59 = vmov 0   ;;  %v982_v60 = vld [vmem:[%s391_s26] sm:$0xff] }
 0x301   : > { %1158 = vmatpush3.bf16.msra.mxu0 %v597_v61  ;;  %1216 = vset.pattern.permute.xlu0 %v1258_v59  ;;  %v983_v61 = vsub.f32 1.0, %v982_v60 }
 0x302   : > { %1169 = vmatprep.subr.bf16.mxu0 %v1246_v0 }
 0x303   : > { %v698_v62 = vpop.xlane.xlu0 %697  ;;  %v826_v11 = vpop.permute.xlu1 %825 }
 0x304   : > { %v699_v63 = vsub.f32 %v691_v46, %v698_v62  ;;  %v831_v15 = vsel %vm482_vm4, %v826_v11, 0 }
 0x306   : > { %v700_v2 = vmul.f32 1.442695, %v699_v63 }
 0x308   : > { %1224 = vpow2.f32 %v700_v2 }
 0x30a   : > { %v1223_v3 = vpop.eup %1222 }
 0x30b   : > { %v815_v4 = vpop.xlane.xlu0 %814  ;;  %v585_v5 = vsel %vm464_vm3, %v1223_v3, 0.0  ;;  %v590_v6 = vpack.c.bf16 %v1223_v3, %v1223_v3 }
 0x30c   : > { %v816_v1 = vsub.f32 %v808_v52, %v815_v4  ;;  %586 = vadd.xlane.f32.xlu1 %v585_v5 }
 0x30d   : > { %1160 = vmatmul.mubr.msk.bf16.vlgmr.msra.gmra.mrb[4].mxu0 %vm464_vm3, %v590_v6 }
 0x30e   : > { %v817_v7 = vmul.f32 1.442695, %v816_v1  ;;  %1171 = vmatprep.mubr.msk.bf16.mxu0 %vm1247_vm0, %v1246_v0 }
 0x30f   : > { %v709_v8 = vpop.permute.xlu0 %708 }
 0x310   : > { %1226 = vpow2.f32 %v817_v7  ;;  %v714_v10 = vsel %vm482_vm4, %v709_v8, 0  ;;  %472 = vadd.xlane.f32.xlu1 %v471_v9  ;;  %v1115_v8 = vld [vmem:[%s1454_s6] ss:$0 sm:$0xff] }
 0x311   : > { %1170 = vmatpush3.bf16.msra.mxu0 %v714_v10  ;;  %v1116_v10 = vld [vmem:[%s1455_s7] ss:$0 sm:$0xff] }
 0x312   : > { %v1225_v12 = vpop.eup %1224  ;;  %1181 = vmatprep.subr.bf16.mxu0 %v1246_v0 }
 0x313   : > { %v702_v13 = vsel %vm464_vm3, %v1225_v12, 0.0  ;;  %v707_v14 = vpack.c.bf16 %v1225_v12, %v1225_v12 }
 0x314   : > { %703 = vadd.xlane.f32.xlu0 %v702_v13 }
 0x315   : > { %1172 = vmatmul.mubr.msk.bf16.vlgmr.msra.gmra.mrb[8].mxu0 %vm464_vm3, %v707_v14 }
 0x316   : > { %1182 = vmatpush3.bf16.msra.mxu0 %v831_v15  ;;  %1183 = vmatprep.mubr.msk.bf16.mxu0 %vm1247_vm0, %v1246_v0 }
 0x31a   : > { %v1227_v16 = vpop.eup %1226 }
 0x31b   : > { %v819_v17 = vsel %vm464_vm3, %v1227_v16, 0.0  ;;  %v824_v18 = vpack.c.bf16 %v1227_v16, %v1227_v16 }
 0x31c   : > { %820 = vadd.xlane.f32.xlu0 %v819_v17 }
 0x31d   : > { %1184 = vmatmul.mubr.msk.bf16.vlgmr.msra.gmra.mrb[12].mxu0 %vm464_vm3, %v824_v18 }
 0x399   : > { %v587_v19 = vpop.xlane.xlu1 %586 }
 0x39d   : > { %v473_v20 = vpop.xlane.xlu1 %472 }
 0x39e   : > { %1228 = vrcp.f32 %v473_v20 }
 0x39f   : > { %1230 = vrcp.f32 %v587_v19 }
 0x3a1   : > { %v704_v23 = vpop.xlane.xlu0 %703 }
 0x3a2   : > { %1232 = vrcp.f32 %v704_v23 }
 0x3a8   : > { %v1229_v21 = vpop.eup %1228 }
 0x3a9   : > { %v526_v22 = vmul.f32 %v1229_v21, %v1383_v35  ;;  %v1231_v24 = vpop.eup %1230  ;;  %v821_v29 = vpop.xlane.xlu0 %820 }
 0x3aa   : > { %1234 = vrcp.f32 %v821_v29 }
 0x3ab   : > { %527 = vst.msk [vmem:[#allocation2] sm:$0xff] %vm417_vm1, %v526_v22 }
 0x3ac   : > { %v1233_v32 = vpop.eup %1232 }
 0x3b4   : > { %v1235_v39 = vpop.eup %1234 }
 0x3e0   : > { %v633_v25 = vpop.f32.mrb[4].mxu0 }
 0x3e1   : > { %v639_v26 = vmul.f32 %v1231_v24, %v633_v25  ;;  %v1161_v27 = vpop.f32.mrb[5].mxu0 }
 0x3e2   : > { %v636_v28 = vpop.f32.mrb[6].mxu0 }
 0x3e3   : > { %641 = vrot.lane.b32.xlu0 %v639_v26, %s1255_s29  ;;  %v1162_v30 = vpop.f32.mrb[7].mxu0 }
 0x3e8   : > { %v750_v33 = vpop.f32.mrb[8].mxu0 }
 0x3e9   : > { %v756_v35 = vmul.f32 %v1233_v32, %v750_v33  ;;  %v1173_v36 = vpop.f32.mrb[9].mxu0 }
 0x3ea   : > { %v753_v37 = vpop.f32.mrb[10].mxu0 }
 0x3eb   : > { %758 = vrot.lane.b32.xlu1 %v756_v35, %s1256_s17  ;;  %v1174_v38 = vpop.f32.mrb[11].mxu0 }
 0x3f0   : > { %v867_v40 = vpop.f32.mrb[12].mxu0 }
 0x3f1   : > { %v873_v41 = vmul.f32 %v1235_v39, %v867_v40  ;;  %v1185_v42 = vpop.f32.mrb[13].mxu0 }
 0x3f2   : > { %v870_v43 = vpop.f32.mrb[14].mxu0 }
 0x3f3   : > { %875 = vrot.lane.b32.xlu1 %v873_v41, %s1257_s18  ;;  %v1186_v44 = vpop.f32.mrb[15].mxu0 }
 0x455   : > { %v642_v45 = vpop.permute.xlu0 %641 }
 0x456   : > { %645 = vst.msk [vmem:[#allocation2] sm:$0xff] %vm644_vm5, %v642_v45 }
 0x45d   : > { %v759_v46 = vpop.permute.xlu1 %758 }
 0x45e   : > { %762 = vst.msk [vmem:[#allocation2] sm:$0xff] %vm761_vm6, %v759_v46 }
 0x465   : > { %v876_v0 = vpop.permute.xlu1 %875 }
 0x466   : > { %879 = vst.msk [vmem:[#allocation2] sm:$0xff] %vm878_vm7, %v876_v0 }
 0x46d   : > { %v880_v47 = vld [vmem:[#allocation2] sm:$0xff] }
 0x46e   : > { %v881_v48 = vpack.c.bf16 %v880_v47, %v880_v47 }
 0x470   : > { %1192 = vmatmul.mubr.msk.bf16.vlgmr.msra.gmra.mrb[16].mxu1 %vm905_vm8, %v881_v48 }
 0x543   : > { %v943_v52 = vpop.f32.mrb[16].mxu1 }
 0x544   : > { %v944_v53 = vadd.f32 %v1111_v50, %v943_v52  ;;  %v1193_v54 = vpop.f32.mrb[17].mxu1 }
 0x545   : > { %v946_v55 = vpop.f32.mrb[18].mxu1 }
 0x546   : > { %v1194_v56 = vpop.f32.mrb[19].mxu1  ;;  %v951_v57 = vadd.f32 %v950_v51, %v944_v53 }
 0x548   : > { %v952_v58 = vsel %vm905_vm8, %v951_v57, 0.0 }
 0x549   : > { %953 = vadd.xlane.f32.xlu0 %v952_v58 }
 0x55f   : > { %986 = vperm.xlu0 %1216, %v983_v61  }
 0x5d6   : > { %v954_v62 = vpop.xlane.xlu0 %953 }
 0x5d7   : > { %v956_v63 = vmul.f32 0.03125, %v954_v62 }
 0x5d9   : > { %v957_v2 = vsub.f32 %v951_v57, %v956_v63 }
 0x5db   : > { %v958_v3 = vmul.f32 %v957_v2, %v957_v2 }
 0x5dd   : > { %v959_v4 = vsel %vm905_vm8, %v958_v3, 0.0 }
 0x5de   : > { %960 = vadd.xlane.f32.xlu1 %v959_v4  ;;  %v987_v12 = vpop.permute.xlu0 %986 }
 0x66b   : > { %v961_v5 = vpop.xlane.xlu1 %960 }
 0x66c   : > { %v962_v6 = vmul.f32 0.03125, %v961_v5 }
 0x66e   : > { %v963_v1 = vadd.f32 1e-05, %v962_v6 }
 0x670   : > { %1236 = vrsqrt.f32 %v963_v1 }
 0x67a   : > { %v1237_v7 = vpop.eup %1236 }
 0x67b   : > { %v965_v9 = vmul.f32 %v1237_v7, %v957_v2 }
 0x67d   : > { %v973_v11 = vmul.f32 %v1115_v8, %v965_v9 }
 0x67f   : > { %v981_v13 = vadd.f32 %v1116_v10, %v973_v11 }
 0x681   : > { %v989_v14 = vmul.f32 %v987_v12, %v981_v13 }
 0x683   : > { %v990_v15 = vpack.c.bf16 %v989_v14, %v989_v14 }
 0x685   : > { %992 = vst.msk [vmem:[%s395_s14] sm:$0xf] %vm991_vm9, %v990_v15 }
 0x686 PF: > { %s19_s30 = sadd.s32 1, %s1244_s30  }
 0x687   : > { %p16_p4 = scmp.ge.s32.totalorder %s19_s30, 4  }
 0x689   :  { %18 = sbr.rel (!%p16_p4) target bundleno = 1 (0x1), region = 98 }

// kernel: adaptive_decoder_forward.47
= control target key start
LH: loop header
LB: loop body
LE: loop exit
PB: predicated region body
PF: predicated region fallthrough
CT: control target
= control target key end

     0   :  { %vm31_vm0 = vcmask 261120   ;;  %v269_v0 = vmov 0.0   ;;  %vm270_vm1 = vmmov 0   ;;  %vm75_vm2 = vcmask 523264   ;;  %s359_s1 = inlined_call_operand.vmem [shape: bf16[64,32], index: 1, kind: input, shape index: {}]   ;;  %s360_s0 = inlined_call_operand.vmem [shape: bf16[16,64], index: 0, kind: input, shape index: {}]   ;;  %s361_s3 = inlined_call_operand.vmem [shape: bf16[16,32], index: 3, kind: input, shape index: {}]   ;;  %s362_s2 = inlined_call_operand.vmem [shape: f32[1,32], index: 2, kind: input, shape index: {}]   ;;  %s363_s6 = inlined_call_operand.vmem [shape: f32[16,1], index: 6, kind: input, shape index: {}]   ;;  %s364_s4 = inlined_call_operand.vmem [shape: f32[1,32], index: 4, kind: input, shape index: {}]   ;;  %s365_s5 = inlined_call_operand.vmem [shape: f32[1,32], index: 5, kind: input, shape index: {}]   ;;  %s366_s7 = inlined_call_operand.vmem [shape: bf16[16,32], index: 7, kind: output, shape index: {}]  }
   0x1   :  { %243 = vmatprep.subr.bf16.mxu0 %v269_v0  ;;  %v260_v1 = vld [vmem:[%s359_s1] sm:$0xff]   ;;  %251 = vmatprep.mubr.msk.bf16.mxu0 %vm270_vm1, %v269_v0  ;;  %32 = vst.msk [vmem:[#allocation2] sm:$0xff] %vm31_vm0, %v269_v0  ;;  %33 = vst.msk [vmem:[#allocation2 + $0x8] sm:$0xff] %vm31_vm0, %v269_v0  ;;  %v261_v2 = vld [vmem:[%s359_s1 + $0x8] sm:$0xff]   ;;  %v271_v26 = vmov 0   ;;  %vm214_vm3 = vcmask 257024  }
   0x2   :  { %244 = vmatpush3.bf16.msra.mxu0 %v260_v1  ;;  %v262_v3 = vld [vmem:[%s359_s1 + $0x10] sm:$0xff]   ;;  %v263_v4 = vld [vmem:[%s359_s1 + $0x18] sm:$0xff]   ;;  %v264_v5 = vld [vmem:[%s360_s0] sm:$0xff]   ;;  %258 = vset.pattern.permute.xlu0 %v271_v26 }
   0x3   :  { %245 = vmatprep.subr.bf16.mxu0 %v269_v0  ;;  %v235_v14 = vld [vmem:[%s361_s3] sm:$0xff]   ;;  %259 = vset.pattern.permute.xlu1 %v271_v26  ;;  %v191_v39 = vld [vmem:[%s363_s6 + $0x8] sm:$0xff] }
   0x4   :  { %v227_v15 = vld [vmem:[%s362_s2] ss:$0 sm:$0xff]  ;;  %v236_v16 = vunpack.c.l.bf16 %v235_v14  ;;  %v237_v19 = vunpack.c.h.bf16 %v235_v14  ;;  %v193_v40 = vsub.f32 1.0, %v191_v39 }
   0x5   :  { %v190_v27 = vld [vmem:[%s363_s6] sm:$0xff] }
   0x6   :  { %246 = vmatpush3.bf16.msra.mxu0 %v261_v2  ;;  %v192_v28 = vsub.f32 1.0, %v190_v27  ;;  %v228_v48 = vld [vmem:[%s364_s4] ss:$0 sm:$0xff] }
   0x7   :  { %247 = vmatprep.subr.bf16.mxu0 %v269_v0  ;;  %v229_v50 = vld [vmem:[%s365_s5] ss:$0 sm:$0xff] }
   0x8   :  { %v34_v6 = vld [vmem:[#allocation2] sm:$0xff]  ;;  %v35_v8 = vld [vmem:[#allocation2 + $0x8] sm:$0xff] }
   0xa   :  { %248 = vmatpush3.bf16.msra.mxu0 %v262_v3 }
   0xb   :  { %249 = vmatprep.subr.bf16.mxu0 %v269_v0 }
   0xe   :  { %250 = vmatpush3.bf16.msra.mxu0 %v263_v4 }
  0x11   :  { %252 = vmatmul.mubr.msk.bf16.vlgmr.msra.gmra.mrb[0].mxu0 %vm75_vm2, %v264_v5 }
  0xe4   :  { %v113_v7 = vpop.f32.mrb[0].mxu0 }
  0xe5   :  { %v120_v9 = vadd.f32 %v113_v7, %v34_v6  ;;  %v253_v10 = vpop.f32.mrb[1].mxu0 }
  0xe6   :  { %v116_v11 = vpop.f32.mrb[2].mxu0 }
  0xe7   :  { %123 = vst.msk [vmem:[#allocation2] sm:$0xff] %vm31_vm0, %v120_v9  ;;  %v121_v12 = vadd.f32 %v116_v11, %v35_v8  ;;  %v254_v13 = vpop.f32.mrb[3].mxu0 }
  0xe9   :  { %124 = vst.msk [vmem:[#allocation2 + $0x8] sm:$0xff] %vm31_vm0, %v121_v12 }
  0xee   :  { %v128_v17 = vld [vmem:[#allocation2] sm:$0xff] }
  0xef   :  { %v137_v18 = vadd.f32 %v227_v15, %v128_v17 }
  0xf0   :  { %v129_v20 = vld [vmem:[#allocation2 + $0x8] sm:$0xff] }
  0xf1   :  { %v143_v21 = vadd.f32 %v236_v16, %v137_v18  ;;  %v138_v22 = vadd.f32 %v227_v15, %v129_v20 }
  0xf3   :  { %v145_v23 = vsel %vm31_vm0, %v143_v21, 0.0  ;;  %v144_v24 = vadd.f32 %v237_v19, %v138_v22 }
  0xf4   :  { %146 = vadd.xlane.f32.xlu0 %v145_v23 }
  0xf5   :  { %v148_v25 = vsel %vm31_vm0, %v144_v24, 0.0 }
  0xf8   :  { %149 = vadd.xlane.f32.xlu0 %v148_v25 }
 0x10e   :  { %196 = vperm.xlu0 %258, %v192_v28  }
 0x181   :  { %v147_v29 = vpop.xlane.xlu0 %146 }
 0x182   :  { %v152_v30 = vmul.f32 0.03125, %v147_v29 }
 0x184   :  { %v154_v31 = vsub.f32 %v143_v21, %v152_v30 }
 0x185   :  { %v150_v32 = vpop.xlane.xlu0 %149 }
 0x186   :  { %v153_v33 = vmul.f32 0.03125, %v150_v32  ;;  %v156_v34 = vmul.f32 %v154_v31, %v154_v31 }
 0x188   :  { %v155_v35 = vsub.f32 %v144_v24, %v153_v33  ;;  %v158_v36 = vsel %vm31_vm0, %v156_v34, 0.0 }
 0x189   :  { %159 = vadd.xlane.f32.xlu1 %v158_v36 }
 0x18a   :  { %v157_v37 = vmul.f32 %v155_v35, %v155_v35 }
 0x18c   :  { %v161_v38 = vsel %vm31_vm0, %v157_v37, 0.0 }
 0x18d   :  { %162 = vadd.xlane.f32.xlu1 %v161_v38  ;;  %v197_v53 = vpop.permute.xlu0 %196 }
 0x19e   :  { %201 = vperm.xlu1 %259, %v193_v40  }
 0x216   :  { %v160_v41 = vpop.xlane.xlu1 %159 }
 0x217   :  { %v164_v42 = vmul.f32 0.03125, %v160_v41 }
 0x219   :  { %v166_v43 = vadd.f32 1e-05, %v164_v42 }
 0x21a   :  { %v163_v44 = vpop.xlane.xlu1 %162 }
 0x21b   :  { %265 = vrsqrt.f32 %v166_v43  ;;  %v165_v45 = vmul.f32 0.03125, %v163_v44 }
 0x21d   :  { %v167_v46 = vadd.f32 1e-05, %v165_v45 }
 0x21e   :  { %v202_v58 = vpop.permute.xlu1 %201 }
 0x21f   :  { %267 = vrsqrt.f32 %v167_v46 }
 0x225   :  { %v266_v47 = vpop.eup %265 }
 0x226   :  { %v170_v49 = vmul.f32 %v266_v47, %v154_v31 }
 0x228   :  { %v179_v51 = vmul.f32 %v228_v48, %v170_v49 }
 0x229   :  { %v268_v52 = vpop.eup %267 }
 0x22a   :  { %v188_v54 = vadd.f32 %v229_v50, %v179_v51  ;;  %v171_v55 = vmul.f32 %v268_v52, %v155_v35 }
 0x22c   :  { %v204_v56 = vmul.f32 %v197_v53, %v188_v54  ;;  %v180_v57 = vmul.f32 %v228_v48, %v171_v55 }
 0x22e   :  { %v232_v59 = vpack.c.bf16 %v204_v56, %v204_v56  ;;  %v189_v60 = vadd.f32 %v229_v50, %v180_v57 }
 0x230   :  { %215 = vst.msk [vmem:[%s366_s7] sm:$0xf] %vm214_vm3, %v232_v59  ;;  %v205_v61 = vmul.f32 %v202_v58, %v189_v60 }
 0x232   :  { %v233_v62 = vpack.c.bf16 %v205_v61, %v205_v61 }
 0x234   :  { %216 = vst.msk [vmem:[%s366_s7 + $0x4] sm:$0xf] %vm214_vm3, %v233_v62 }

// kernel: adaptive_decoder_forward.45
= control target key start
LH: loop header
LB: loop body
LE: loop exit
PB: predicated region body
PF: predicated region fallthrough
CT: control target
= control target key end

     0   :  { %s1444_s13 = smov 0   ;;  %s1617_s0 = inlined_call_operand.vmem [shape: bf16[2,8,32], index: 0, kind: input, shape index: {}]   ;;  %s1618_s1 = inlined_call_operand.vmem [shape: bf16[2,10,64], index: 1, kind: input, shape index: {}]   ;;  %s1619_s2 = inlined_call_operand.vmem [shape: bf16[2,8,64], index: 2, kind: input, shape index: {}]   ;;  %s1620_s3 = inlined_call_operand.vmem [shape: f32[2,1,10], index: 3, kind: input, shape index: {}]   ;;  %s1621_s4 = inlined_call_operand.vmem [shape: bf16[2,8,32], index: 4, kind: input, shape index: {}]   ;;  %s1622_s5 = inlined_call_operand.vmem [shape: bf16[32,32], index: 5, kind: input, shape index: {}]   ;;  %s1623_s6 = inlined_call_operand.vmem [shape: f32[1,32], index: 6, kind: input, shape index: {}]   ;;  %s1624_s7 = inlined_call_operand.vmem [shape: f32[1,32], index: 7, kind: input, shape index: {}]   ;;  %s1625_s8 = inlined_call_operand.vmem [shape: f32[1,32], index: 8, kind: input, shape index: {}]   ;;  %s1626_s9 = inlined_call_operand.vmem [shape: f32[2,8,1], index: 9, kind: input, shape index: {}]   ;;  %s1627_s10 = inlined_call_operand.vmem [shape: bf16[2,8,32], index: 10, kind: output, shape index: {}]  }
   0x1 LB: > { %s1212_s14 = sadd.s32 4294967295, %s1374_s13   ;;  %p1216_p0 = scmp.ge.s32.totalorder %s1374_s13, 1  ;;  %s1374_s13 = sphi %s1444_s13, %s20_s13  }
   0x2   : > { %p356_p1 = scmp.lt.s32.totalorder %s1374_s13, 3 }
   0x4   : > { %p357_p2 = pnand %p1216_p0, %p356_p1 }
   0x5   : > { %p412_p3 = scmp.lt.s32.totalorder (!%p357_p2), %s1212_s14, 1  ;;  %v1376_v0 = vmov (!%p357_p2), 0.0   ;;  %vm1377_vm0 = vmmov (!%p357_p2), 0   ;;  %vm462_vm1 = vcmask (!%p357_p2), 64512   ;;  %s1378_s26 = smov (!%p357_p2), 96   ;;  %v449_v11 = vlaneseq (!%p357_p2) }
   0x6   : > { %360 = sbr.rel (%p357_p2) target bundleno = 1676 (0x68c), region = 60  ;;  %1261 = vmatprep.subr.bf16.mxu0 (!%p357_p2), %v1376_v0  ;;  %1263 = vmatprep.mubr.msk.bf16.mxu0 (!%p357_p2), %vm1377_vm0, %v1376_v0  ;;  %s1379_s27 = smov (!%p357_p2), 120   ;;  %vm514_vm3 = vcmask (!%p357_p2), 80896   ;;  %vm542_vm4 = vcmask (!%p357_p2), 1044480   ;;  %vm721_vm5 = vcmask (!%p357_p2), 130112   ;;  %vm854_vm6 = vcmask (!%p357_p2), 195712  }
   0x7   : > { %1267 = vmatprep.subr.bf16.mxu1 (!%p357_p2), %v1376_v0  ;;  %1269 = vmatprep.mubr.msk.bf16.mxu1 (!%p357_p2), %vm1377_vm0, %v1376_v0  ;;  %s1380_s28 = smov (!%p357_p2), 112   ;;  %s1381_s29 = smov (!%p357_p2), 104   ;;  %v450_v13 = vshrl.u32 (!%p357_p2), %v449_v11, 7  ;;  %vm987_vm7 = vcmask (!%p357_p2), 261312   ;;  %vm1014_vm8 = vcmask (!%p357_p2), 261120   ;;  %vm1100_vm9 = vcmask (!%p357_p2), 257024  }
   0x8   : > { %s1382_s17 = smov (!%p357_p2), 80   ;;  %s1383_s18 = smov (!%p357_p2), 88  }
   0x9   : > { %v451_v14 = vsub.s32 (!%p357_p2), 0, %v450_v13  ;;  %s1385_s20 = smov (!%p357_p2), 8  }
   0xd   : > { %s1629_s14 = smov (!%p412_p3, %s1212_s14), 1 }
   0xe   : > { %s1241_s15 = sshll.u32 %s1629_s14, 3  ;;  %s1462_s16 = sshll.u32 %s1629_s14, 2 }
   0xf   : > { %s420_s19 = scalar_lea.vmem %s1618_s1, %s1241_s15  ;;  %s415_s22 = scalar_lea.vmem %s1617_s0, %s1462_s16 }
  0x10   : > { %v1473_v1 = vld [vmem:[%s420_s19] sm:$0x1f]   ;;  %s424_s25 = scalar_lea.vmem %s1619_s2, %s1462_s16  ;;  %s427_s12 = scalar_lea.vmem %s1620_s3, %s1629_s14 }
  0x11   : > { %v441_v2 = vld [vmem:[%s415_s22] sm:$0xf]  ;;  %v467_v4 = vsel %vm462_vm1, %v1473_v1, 0  ;;  %533 = vrot.lane.b32.xlu1 %v1473_v1, %s1378_s26  ;;  %s1384_s19 = smov 72   ;;  %s439_s23 = scalar_lea.vmem %s1627_s10, %s1462_s16 }
  0x12   : > { %v444_v3 = vld [vmem:[%s424_s25] sm:$0xf]  ;;  %v454_v5 = vunpack.c.l.bf16 %v441_v2  ;;  %1262 = vmatpush3.bf16.xpose.msra.mxu0 %v467_v4  ;;  %s1386_s25 = smov 16  }
  0x13   : > { %v1481_v6 = vunpack.c.l.bf16 %v444_v3  ;;  %1279 = vmatprep.subr.bf16.mxu0 %v1376_v0  ;;  %v445_v12 = vld [vmem:[%s427_s12] sm:$0x1] }
  0x14   : > { %v455_v7 = vmul.f32 0.35355338, %v454_v5  ;;  %vm446_vm2 = vcmp.gt.f32.partialorder %v445_v12, 0.5 }
  0x15   : > { %591 = vrot.lane.b32.xlu1 %v1473_v1, %s1379_s27  ;;  %v447_v15 = vsel %vm446_vm2, -1e+30, %v1376_v0 }
  0x16   : > { %v456_v8 = vpack.c.bf16 %v455_v7, %v455_v7  ;;  %v510_v9 = vmul.f32 %v1481_v6, %v455_v7  ;;  %v1499_v16 = vrot.slane %v447_v15, %v451_v14 }
  0x18   : > { %v511_v10 = vsel %vm462_vm1, %v510_v9, 0.0 }
  0x19   : > { %512 = vadd.xlane.f32.xlu0 %v511_v10  ;;  %1264 = vmatmul.mubr.msk.bf16.vlgmr.msra.gmra.mrb[0].mxu0 %vm462_vm1, %v456_v8 }
  0x1a   : > { %1281 = vmatprep.mubr.msk.bf16.mxu0 %vm1377_vm0, %v1376_v0  ;;  %725 = vrot.lane.b32.xlu1 %v1473_v1, %s1380_s28 }
  0x1e   : > { %723 = vrot.lane.b32.xlu1 %v456_v8, %s1380_s28 }
  0x22   : > { %858 = vrot.lane.b32.xlu1 %v1473_v1, %s1381_s29 }
  0x26   : > { %856 = vrot.lane.b32.xlu1 %v456_v8, %s1381_s29 }
  0x2a   : > { %640 = vrot.lane.b32.xlu1 %v510_v9, %s1379_s27 }
  0x2e   : > { %773 = vrot.lane.b32.xlu1 %v510_v9, %s1380_s28 }
  0x83   : > { %v534_v23 = vpop.permute.xlu1 %533 }
  0x84   : > { %v544_v24 = vsel %vm542_vm4, %v534_v23, 0 }
  0x85   : > { %1268 = vmatpush3.bf16.msra.mxu1 %v544_v24 }
  0x86   : > { %1273 = vmatprep.subr.bf16.mxu1 %v1376_v0 }
  0x87   : > { %v592_v25 = vpop.permute.xlu1 %591 }
  0x88   : > { %v597_v39 = vsel %vm462_vm1, %v592_v25, 0 }
  0x8c   : > { %v726_v26 = vpop.permute.xlu1 %725 }
  0x8d   : > { %v731_v42 = vsel %vm462_vm1, %v726_v26, 0 }
  0x90   : > { %v724_v27 = vpop.permute.xlu1 %723 }
  0x94   : > { %v859_v28 = vpop.permute.xlu1 %858 }
  0x95   : > { %v864_v43 = vsel %vm462_vm1, %v859_v28, 0 }
  0x98   : > { %v857_v29 = vpop.permute.xlu1 %856 }
  0x9c   : > { %v641_v30 = vpop.permute.xlu1 %640 }
  0x9d   : > { %v643_v31 = vsel %vm462_vm1, %v641_v30, 0.0 }
  0x9e   : > { %644 = vadd.xlane.f32.xlu1 %v643_v31 }
  0xa0   : > { %v774_v44 = vpop.permute.xlu1 %773 }
  0xa1   : > { %v776_v45 = vsel %vm462_vm1, %v774_v44, 0.0 }
  0xa6   : > { %v1508_v32 = vpop.xlane.xlu0 %512 }
  0xaf   : > { %797 = vrot.lane.b32.xlu1 %v1473_v1, %s1382_s17 }
  0xec   : > { %v503_v17 = vpop.f32.mrb[0].mxu0 }
  0xed   : > { %v504_v18 = vadd.f32 %v503_v17, %v1499_v16  ;;  %v1265_v19 = vpop.f32.mrb[1].mxu0 }
  0xee   : > { %v506_v20 = vpop.f32.mrb[2].mxu0 }
  0xef   : > { %v1266_v21 = vpop.f32.mrb[3].mxu0  ;;  %v515_v22 = vsel %vm514_vm3, %v504_v18, -inf }
  0xf0   : > { %516 = vmax.xlane.f32.xlu0 %v515_v22 }
 0x106   : > { %589 = vrot.lane.b32.xlu0 %v456_v8, %s1379_s27 }
 0x10a   : > { %906 = vrot.lane.b32.xlu0 %v510_v9, %s1381_s29  ;;  %s431_s29 = scalar_lea.vmem %s1621_s4, %s1462_s16 }
 0x129   : > { %777 = vadd.xlane.f32.xlu0 %v776_v45 }
 0x12b   : > { %v645_v11 = vpop.xlane.xlu1 %644 }
 0x12f   : > { %v798_v15 = vpop.permute.xlu1 %797 }
 0x130   : > { %v807_v28 = vsel %vm542_vm4, %v798_v15, 0 }
 0x17d   : > { %v517_v33 = vpop.xlane.xlu0 %516 }
 0x17e   : > { %v1511_v34 = vmax.f32 %v517_v33, %v1508_v32 }
 0x180   : > { %v519_v35 = vsub.f32 %v504_v18, %v1511_v34  ;;  %v522_v36 = vsub.f32 %v1508_v32, %v1511_v34 }
 0x181   : > { %v590_v41 = vpop.permute.xlu0 %589 }
 0x182   : > { %v520_v37 = vmul.f32 1.442695, %v519_v35  ;;  %v523_v44 = vmul.f32 1.442695, %v522_v36 }
 0x184   : > { %1342 = vpow2.f32 %v520_v37 }
 0x185   : > { %v907_v46 = vpop.permute.xlu0 %906 }
 0x186   : > { %v909_v47 = vsel %vm462_vm1, %v907_v46, 0.0 }
 0x187   : > { %910 = vadd.xlane.f32.xlu0 %v909_v47 }
 0x18e   : > { %v1516_v38 = vpop.eup %1342 }
 0x18f   : > { %v531_v40 = vpack.c.bf16 %v1516_v38, %v1516_v38 }
 0x191   : > { %1270 = vmatmul.mubr.msk.bf16.vlgmr.msra.gmra.mrb[0].mxu1 %vm514_vm3, %v531_v40 }
 0x192   : > { %1274 = vmatpush3.bf16.xpose.msra.mxu1 %v597_v39  ;;  %1275 = vmatprep.mubr.msk.bf16.mxu1 %vm1377_vm0, %v1376_v0 }
 0x193   : > { %1285 = vmatprep.subr.bf16.mxu1 %v1376_v0 }
 0x199   : > { %1276 = vmatmul.mubr.msk.bf16.vlgmr.msra.gmra.mrb[4].mxu1 %vm462_vm1, %v590_v41 }
 0x19a   : > { %1286 = vmatpush3.bf16.xpose.msra.mxu1 %v731_v42  ;;  %1287 = vmatprep.mubr.msk.bf16.mxu1 %vm1377_vm0, %v1376_v0 }
 0x19b   : > { %1297 = vmatprep.subr.bf16.mxu1 %v1376_v0 }
 0x1a1   : > { %1288 = vmatmul.mubr.msk.bf16.vlgmr.msra.gmra.mrb[8].mxu1 %vm462_vm1, %v724_v27 }
 0x1a2   : > { %1298 = vmatpush3.bf16.xpose.msra.mxu1 %v864_v43  ;;  %1299 = vmatprep.mubr.msk.bf16.mxu1 %vm1377_vm0, %v1376_v0 }
 0x1a3   : > { %1309 = vmatprep.subr.bf16.mxu1 %v1376_v0 }
 0x1a9   : > { %1300 = vmatmul.mubr.msk.bf16.vlgmr.msra.gmra.mrb[12].mxu1 %vm462_vm1, %v857_v29 }
 0x1aa   : > { %1313 = vmatprep.mubr.msk.bf16.mxu1 %vm1377_vm0, %v1376_v0 }
 0x1b6   : > { %v778_v9 = vpop.xlane.xlu0 %777 }
 0x214   : > { %v911_v10 = vpop.xlane.xlu0 %910 }
 0x264   : > { %v1540_v48 = vpop.f32.mrb[0].mxu1 }
 0x265   : > { %v1271_v49 = vpop.f32.mrb[1].mxu1 }
 0x266   : > { %v583_v50 = vpop.f32.mrb[2].mxu1 }
 0x267   : > { %v1272_v51 = vpop.f32.mrb[3].mxu1 }
 0x26c   : > { %v633_v52 = vpop.f32.mrb[4].mxu1 }
 0x26d   : > { %v634_v53 = vadd.f32 %v633_v52, %v1499_v16  ;;  %v1277_v54 = vpop.f32.mrb[5].mxu1 }
 0x26e   : > { %v636_v55 = vpop.f32.mrb[6].mxu1 }
 0x26f   : > { %v1278_v56 = vpop.f32.mrb[7].mxu1  ;;  %v646_v57 = vsel %vm514_vm3, %v634_v53, -inf  ;;  %v525_v55 = vsel %vm514_vm3, %v1516_v38, 0.0 }
 0x270   : > { %647 = vmax.xlane.f32.xlu0 %v646_v57 }
 0x274   : > { %v767_v58 = vpop.f32.mrb[8].mxu1 }
 0x275   : > { %v768_v59 = vadd.f32 %v767_v58, %v1499_v16  ;;  %v1289_v60 = vpop.f32.mrb[9].mxu1 }
 0x276   : > { %v770_v61 = vpop.f32.mrb[10].mxu1 }
 0x277   : > { %v1290_v62 = vpop.f32.mrb[11].mxu1  ;;  %v779_v63 = vsel %vm514_vm3, %v768_v59, -inf }
 0x278   : > { %780 = vmax.xlane.f32.xlu1 %v779_v63 }
 0x27c   : > { %v900_v2 = vpop.f32.mrb[12].mxu1 }
 0x27d   : > { %v901_v3 = vadd.f32 %v900_v2, %v1499_v16  ;;  %v1301_v4 = vpop.f32.mrb[13].mxu1 }
 0x27e   : > { %v903_v5 = vpop.f32.mrb[14].mxu1 }
 0x27f   : > { %v1302_v7 = vpop.f32.mrb[15].mxu1  ;;  %v912_v8 = vsel %vm514_vm3, %v901_v3, -inf }
 0x280   : > { %913 = vmax.xlane.f32.xlu1 %v912_v8 }
 0x286   : > { %664 = vrot.lane.b32.xlu0 %v1473_v1, %s1383_s18 }
 0x291   : > { %930 = vrot.lane.b32.xlu1 %v1473_v1, %s1384_s19 }
 0x2fd   : > { %v648_v12 = vpop.xlane.xlu0 %647 }
 0x2fe   : > { %v649_v13 = vmax.f32 %v648_v12, %v645_v11 }
 0x300   : > { %v650_v14 = vsub.f32 %v634_v53, %v649_v13  ;;  %v653_v45 = vsub.f32 %v645_v11, %v649_v13  ;;  %v1340_v13 = vld [vmem:[%s1622_s5] sm:$0xff]  }
 0x301   : > { %v665_v16 = vpop.permute.xlu0 %664  ;;  %1310 = vmatpush3.bf16.msra.mxu1 %v1340_v13 }
 0x302   : > { %v651_v17 = vmul.f32 1.442695, %v650_v14  ;;  %v674_v18 = vsel %vm542_vm4, %v665_v16, 0  ;;  %v654_v49 = vmul.f32 1.442695, %v653_v45  ;;  %1311 = vmatprep.subr.bf16.mxu1 %v1376_v0 }
 0x303   : > { %1280 = vmatpush3.bf16.msra.mxu0 %v674_v18 }
 0x304   : > { %1344 = vpow2.f32 %v651_v17  ;;  %1291 = vmatprep.subr.bf16.mxu0 %v1376_v0 }
 0x305   : > { %v781_v19 = vpop.xlane.xlu1 %780 }
 0x306   : > { %v782_v20 = vmax.f32 %v781_v19, %v778_v9  ;;  %v1341_v19 = vld [vmem:[%s1622_s5 + $0x8] sm:$0xff]  }
 0x307   : > { %1312 = vmatpush3.bf16.msra.mxu1 %v1341_v19 }
 0x308   : > { %v783_v21 = vsub.f32 %v768_v59, %v782_v20  ;;  %v786_v29 = vsub.f32 %v778_v9, %v782_v20 }
 0x30a   : > { %v784_v22 = vmul.f32 1.442695, %v783_v21  ;;  %v787_v35 = vmul.f32 1.442695, %v786_v29 }
 0x30c   : > { %1346 = vpow2.f32 %v784_v22 }
 0x30d   : > { %v914_v1 = vpop.xlane.xlu1 %913 }
 0x30e   : > { %v1345_v23 = vpop.eup %1344  ;;  %v915_v24 = vmax.f32 %v914_v1, %v911_v10 }
 0x30f   : > { %v656_v25 = vsel %vm514_vm3, %v1345_v23, 0.0  ;;  %v662_v26 = vpack.c.bf16 %v1345_v23, %v1345_v23 }
 0x310   : > { %v916_v27 = vsub.f32 %v901_v3, %v915_v24  ;;  %657 = vadd.xlane.f32.xlu0 %v656_v25  ;;  %v919_v37 = vsub.f32 %v911_v10, %v915_v24 }
 0x311   : > { %1282 = vmatmul.mubr.msk.bf16.vlgmr.msra.gmra.mrb[4].mxu0 %vm514_vm3, %v662_v26  ;;  %v931_v31 = vpop.permute.xlu1 %930 }
 0x312   : > { %v917_v30 = vmul.f32 1.442695, %v916_v27  ;;  %1292 = vmatpush3.bf16.msra.mxu0 %v807_v28  ;;  %1293 = vmatprep.mubr.msk.bf16.mxu0 %vm1377_vm0, %v1376_v0  ;;  %v940_v39 = vsel %vm542_vm4, %v931_v31, 0  ;;  %v920_v42 = vmul.f32 1.442695, %v919_v37 }
 0x313   : > { %1303 = vmatprep.subr.bf16.mxu0 %v1376_v0  ;;  %v1233_v37 = vld [vmem:[%s1623_s6] ss:$0 sm:$0xff] }
 0x314   : > { %1348 = vpow2.f32 %v917_v30 }
 0x315   : > { %1350 = vpow2.f32 %v787_v35  ;;  %v1058_v35 = vld [vmem:[%s431_s29] sm:$0xf] }
 0x316   : > { %v1347_v33 = vpop.eup %1346  ;;  %1352 = vpow2.f32 %v920_v42 }
 0x317   : > { %v789_v40 = vsel %vm514_vm3, %v1347_v33, 0.0  ;;  %v795_v41 = vpack.c.bf16 %v1347_v33, %v1347_v33  ;;  %1354 = vpow2.f32 %v523_v44 }
 0x318   : > { %790 = vadd.xlane.f32.xlu1 %v789_v40  ;;  %1356 = vpow2.f32 %v654_v49 }
 0x319   : > { %1294 = vmatmul.mubr.msk.bf16.vlgmr.msra.gmra.mrb[8].mxu0 %vm514_vm3, %v795_v41 }
 0x31a   : > { %1304 = vmatpush3.bf16.msra.mxu0 %v940_v39  ;;  %1305 = vmatprep.mubr.msk.bf16.mxu0 %vm1377_vm0, %v1376_v0  ;;  %v1059_v39 = vunpack.c.l.bf16 %v1058_v35 }
 0x31e   : > { %v1349_v43 = vpop.eup %1348 }
 0x31f   : > { %v922_v46 = vsel %vm514_vm3, %v1349_v43, 0.0  ;;  %v928_v47 = vpack.c.bf16 %v1349_v43, %v1349_v43  ;;  %v1351_v50 = vpop.eup %1350 }
 0x320   : > { %923 = vadd.xlane.f32.xlu0 %v922_v46  ;;  %v796_v51 = vmul.f32 %v1351_v50, %v1481_v6  ;;  %v1353_v52 = vpop.eup %1352 }
 0x321   : > { %1306 = vmatmul.mubr.msk.bf16.vlgmr.msra.gmra.mrb[12].mxu0 %vm514_vm3, %v928_v47  ;;  %v929_v32 = vmul.f32 %v1353_v52, %v1481_v6  ;;  %v1355_v34 = vpop.eup %1354  ;;  %v1388_v47 = vmov 0  }
 0x322   : > { %v532_v36 = vmul.f32 %v1355_v34, %v1481_v6  ;;  %v1357_v53 = vpop.eup %1356  ;;  %1338 = vset.pattern.permute.xlu0 %v1388_v47 }
 0x323   : > { %v663_v54 = vmul.f32 %v1357_v53, %v1481_v6 }
 0x329   : > { %800 = vrot.lane.b32.xlu1 %v796_v51, %s1382_s17 }
 0x32d   : > { %933 = vrot.lane.b32.xlu1 %v929_v32, %s1384_s19 }
 0x331   : > { %536 = vrot.lane.b32.xlu1 %v532_v36, %s1378_s26  ;;  %s1387_s26 = smov 24  }
 0x336   : > { %667 = vrot.lane.b32.xlu0 %v663_v54, %s1383_s18  ;;  %s435_s18 = scalar_lea.vmem %s1626_s9, %s1241_s15 }
 0x355   : > { %526 = vadd.xlane.f32.xlu0 %v525_v55 }
 0x39d   : > { %v658_v56 = vpop.xlane.xlu0 %657 }
 0x39e   : > { %v659_v57 = vadd.f32 %v1357_v53, %v658_v56 }
 0x3a0   : > { %1358 = vrcp.f32 %v659_v57  ;;  %v1237_v57 = vld [vmem:[%s1624_s7] ss:$0 sm:$0xff] }
 0x3a5   : > { %v791_v59 = vpop.xlane.xlu1 %790 }
 0x3a6   : > { %v792_v62 = vadd.f32 %v1351_v50, %v791_v59  ;;  %v1238_v59 = vld [vmem:[%s1625_s8] ss:$0 sm:$0xff] }
 0x3a8   : > { %1360 = vrcp.f32 %v792_v62 }
 0x3a9   : > { %v801_v61 = vpop.permute.xlu1 %800 }
 0x3aa   : > { %v1359_v7 = vpop.eup %1358 }
 0x3ad   : > { %v924_v58 = vpop.xlane.xlu0 %923  ;;  %v934_v4 = vpop.permute.xlu1 %933 }
 0x3ae   : > { %v925_v10 = vadd.f32 %v1353_v52, %v924_v58 }
 0x3b1   : > { %v668_v60 = vpop.permute.xlu0 %667  ;;  %v537_v11 = vpop.permute.xlu1 %536 }
 0x3b2   : > { %v1361_v16 = vpop.eup %1360  ;;  %v581_v17 = vadd.f32 %v1540_v48, %v537_v11 }
 0x3e2   : > { %v527_v63 = vpop.xlane.xlu0 %526 }
 0x3e3   : > { %v528_v2 = vadd.f32 %v1355_v34, %v527_v63  ;;  %v1091_v34 = vld [vmem:[%s435_s18] sm:$0xff] }
 0x3e4   : > { %v710_v3 = vpop.f32.mrb[4].mxu0  ;;  %v1092_v36 = vsub.f32 1.0, %v1091_v34 }
 0x3e5   : > { %1362 = vrcp.f32 %v528_v2  ;;  %v711_v6 = vadd.f32 %v710_v3, %v668_v60  ;;  %v1283_v5 = vpop.f32.mrb[5].mxu0 }
 0x3e6   : > { %v713_v8 = vpop.f32.mrb[6].mxu0  ;;  %1364 = vrcp.f32 %v925_v10 }
 0x3e7   : > { %v716_v38 = vmul.f32 %v1359_v7, %v711_v6  ;;  %v1284_v9 = vpop.f32.mrb[7].mxu0 }
 0x3e9   : > { %718 = vrot.lane.b32.xlu1 %v716_v38, %s1385_s20 }
 0x3ec   : > { %v843_v12 = vpop.f32.mrb[8].mxu0 }
 0x3ed   : > { %v844_v14 = vadd.f32 %v843_v12, %v801_v61  ;;  %v1295_v15 = vpop.f32.mrb[9].mxu0 }
 0x3ee   : > { %v846_v18 = vpop.f32.mrb[10].mxu0 }
 0x3ef   : > { %v1363_v20 = vpop.eup %1362  ;;  %v849_v21 = vmul.f32 %v1361_v16, %v844_v14  ;;  %v1296_v22 = vpop.f32.mrb[11].mxu0 }
 0x3f0   : > { %v586_v1 = vmul.f32 %v1363_v20, %v581_v17  ;;  %v1365_v25 = vpop.eup %1364 }
 0x3f1   : > { %851 = vrot.lane.b32.xlu1 %v849_v21, %s1386_s25 }
 0x3f2   : > { %587 = vst.msk [vmem:[#allocation2] sm:$0xff] %vm462_vm1, %v586_v1 }
 0x3f4   : > { %v976_v23 = vpop.f32.mrb[12].mxu0 }
 0x3f5   : > { %v977_v24 = vadd.f32 %v976_v23, %v934_v4  ;;  %v1307_v48 = vpop.f32.mrb[13].mxu0 }
 0x3f6   : > { %v979_v26 = vpop.f32.mrb[14].mxu0 }
 0x3f7   : > { %v982_v27 = vmul.f32 %v1365_v25, %v977_v24  ;;  %v1308_v28 = vpop.f32.mrb[15].mxu0 }
 0x3f9   : > { %984 = vrot.lane.b32.xlu1 %v982_v27, %s1387_s26 }
 0x45b   : > { %v719_v29 = vpop.permute.xlu1 %718 }
 0x45c   : > { %722 = vst.msk [vmem:[#allocation2] sm:$0xff] %vm721_vm5, %v719_v29 }
 0x463   : > { %v852_v0 = vpop.permute.xlu1 %851 }
 0x464   : > { %855 = vst.msk [vmem:[#allocation2] sm:$0xff] %vm854_vm6, %v852_v0 }
 0x46b   : > { %v985_v30 = vpop.permute.xlu1 %984 }
 0x46c   : > { %988 = vst.msk [vmem:[#allocation2] sm:$0xff] %vm987_vm7, %v985_v30 }
 0x473   : > { %v989_v31 = vld [vmem:[#allocation2] sm:$0xff] }
 0x474   : > { %v990_v33 = vpack.c.bf16 %v989_v31, %v989_v31 }
 0x476   : > { %1314 = vmatmul.mubr.msk.bf16.vlgmr.msra.gmra.mrb[16].mxu1 %vm1014_vm8, %v990_v33 }
 0x549   : > { %v1052_v40 = vpop.f32.mrb[16].mxu1 }
 0x54a   : > { %v1053_v41 = vadd.f32 %v1233_v37, %v1052_v40  ;;  %v1315_v42 = vpop.f32.mrb[17].mxu1 }
 0x54b   : > { %v1055_v43 = vpop.f32.mrb[18].mxu1 }
 0x54c   : > { %v1316_v44 = vpop.f32.mrb[19].mxu1  ;;  %v1060_v45 = vadd.f32 %v1059_v39, %v1053_v41 }
 0x54e   : > { %v1061_v46 = vsel %vm1014_vm8, %v1060_v45, 0.0 }
 0x54f   : > { %1062 = vadd.xlane.f32.xlu1 %v1061_v46 }
 0x5dc   : > { %v1063_v49 = vpop.xlane.xlu1 %1062 }
 0x5dd   : > { %v1065_v50 = vmul.f32 0.03125, %v1063_v49 }
 0x5df   : > { %v1066_v51 = vsub.f32 %v1060_v45, %v1065_v50 }
 0x5e1   : > { %v1067_v52 = vmul.f32 %v1066_v51, %v1066_v51 }
 0x5e3   : > { %v1068_v32 = vsel %vm1014_vm8, %v1067_v52, 0.0 }
 0x5e4   : > { %1069 = vadd.xlane.f32.xlu0 %v1068_v32 }
 0x5fa   : > { %1095 = vperm.xlu0 %1338, %v1092_v36  }
 0x671   : > { %v1070_v53 = vpop.xlane.xlu0 %1069 }
 0x672   : > { %v1071_v54 = vmul.f32 0.03125, %v1070_v53 }
 0x674   : > { %v1072_v55 = vadd.f32 1e-05, %v1071_v54 }
 0x676   : > { %1366 = vrsqrt.f32 %v1072_v55 }
 0x679   : > { %v1096_v61 = vpop.permute.xlu0 %1095 }
 0x680   : > { %v1367_v56 = vpop.eup %1366 }
 0x681   : > { %v1074_v58 = vmul.f32 %v1367_v56, %v1066_v51 }
 0x683   : > { %v1082_v60 = vmul.f32 %v1237_v57, %v1074_v58 }
 0x685   : > { %v1090_v62 = vadd.f32 %v1238_v59, %v1082_v60 }
 0x687   : > { %v1098_v63 = vmul.f32 %v1096_v61, %v1090_v62 }
 0x689   : > { %v1099_v2 = vpack.c.bf16 %v1098_v63, %v1098_v63 }
 0x68b   : > { %1101 = vst.msk [vmem:[%s439_s23] sm:$0xf] %vm1100_vm9, %v1099_v2 }
 0x68c PF: > { %s20_s13 = sadd.s32 1, %s1374_s13  }
 0x68d   : > { %p17_p4 = scmp.ge.s32.totalorder %s20_s13, 4  }
 0x68f   :  { %19 = sbr.rel (!%p17_p4) target bundleno = 1 (0x1), region = 105 }

// kernel: adaptive_decoder_forward.48
= control target key start
LH: loop header
LB: loop body
LE: loop exit
PB: predicated region body
PF: predicated region fallthrough
CT: control target
= control target key end

     0   :  { %v202_v0 = vmov 0.0   ;;  %vm203_vm0 = vmmov 0   ;;  %vm46_vm1 = vcmask 261120   ;;  %vm18_vm2 = vcmask 7168   ;;  %s263_s1 = inlined_call_operand.vmem [shape: bf16[32,50], index: 1, kind: input, shape index: {}]   ;;  %s264_s0 = inlined_call_operand.vmem [shape: bf16[16,32], index: 0, kind: input, shape index: {}]   ;;  %s265_s2 = inlined_call_operand.vmem [shape: f32[16,50], index: 2, kind: output, shape index: {0}]   ;;  %s266_s3 = inlined_call_operand.vmem [shape: f32[16,1], index: 3, kind: output, shape index: {1}]  }
   0x1   :  { %173 = vmatprep.subr.bf16.mxu0 %v202_v0  ;;  %v187_v1 = vld [vmem:[%s263_s1] sm:$0xff]   ;;  %177 = vmatprep.mubr.msk.bf16.mxu0 %vm203_vm0, %v202_v0  ;;  %v188_v2 = vld [vmem:[%s263_s1 + $0x8] sm:$0xff]   ;;  %v204_v4 = vmov -inf   ;;  %21 = vst.msk [vmem:[#allocation3] sm:$0xff] %vm18_vm2, %v202_v0  ;;  %22 = vst.msk [vmem:[#allocation3 + $0x8] sm:$0xff] %vm18_vm2, %v202_v0  ;;  %vm91_vm3 = vcmask 408576  }
   0x2   :  { %174 = vmatpush3.bf16.msra.mxu0 %v187_v1  ;;  %v189_v3 = vld [vmem:[%s264_s0] sm:$0xff]   ;;  %19 = vst.msk [vmem:[#allocation2] sm:$0xff] %vm18_vm2, %v204_v4  ;;  %20 = vst.msk [vmem:[#allocation2 + $0x8] sm:$0xff] %vm18_vm2, %v204_v4  ;;  %v205_v11 = vmov 0  }
   0x3   :  { %175 = vmatprep.subr.bf16.mxu0 %v202_v0  ;;  %185 = vset.pattern.permute.xlu1 %v205_v11 }
   0x4   :  { %186 = vset.pattern.permute.xlu0 %v205_v11 }
   0x6   :  { %176 = vmatpush3.bf16.msra.mxu0 %v188_v2 }
   0x8   :  { %v104_v33 = vld [vmem:[#allocation3] sm:$0xff]  ;;  %v105_v37 = vld [vmem:[#allocation3 + $0x8] sm:$0xff] }
   0x9   :  { %178 = vmatmul.mubr.msk.bf16.vlgmr.msra.gmra.mrb[0].mxu0 %vm46_vm1, %v189_v3  ;;  %v94_v12 = vld [vmem:[#allocation2] sm:$0xff]  ;;  %v95_v15 = vld [vmem:[#allocation2 + $0x8] sm:$0xff] }
  0xdc   :  { %v84_v5 = vpop.f32.mrb[0].mxu0 }
  0xdd   :  { %92 = vst.msk [vmem:[%s265_s2] sm:$0xff] %vm91_vm3, %v84_v5  ;;  %v179_v6 = vpop.f32.mrb[1].mxu0  ;;  %v96_v7 = vsel %vm91_vm3, %v84_v5, -inf }
  0xde   :  { %97 = vmax.xlane.f32.xlu0 %v96_v7  ;;  %v87_v8 = vpop.f32.mrb[2].mxu0 }
  0xdf   :  { %93 = vst.msk [vmem:[%s265_s2 + $0x8] sm:$0xff] %vm91_vm3, %v87_v8  ;;  %v180_v9 = vpop.f32.mrb[3].mxu0  ;;  %v99_v10 = vsel %vm91_vm3, %v87_v8, -inf }
  0xe2   :  { %100 = vmax.xlane.f32.xlu0 %v99_v10 }
 0x16b   :  { %v98_v13 = vpop.xlane.xlu0 %97 }
 0x16c   :  { %v102_v14 = vmax.f32 %v94_v12, %v98_v13 }
 0x16e   :  { %v106_v16 = vsub.f32 %v94_v12, %v102_v14  ;;  %141 = vst.msk [vmem:[#allocation2] sm:$0xff] %vm18_vm2, %v102_v14  ;;  %116 = vperm.xlu1 %185, %v102_v14  }
 0x16f   :  { %v101_v17 = vpop.xlane.xlu0 %100 }
 0x170   :  { %v103_v18 = vmax.f32 %v95_v15, %v101_v17  ;;  %v108_v30 = vmul.f32 1.442695, %v106_v16 }
 0x172   :  { %v107_v19 = vsub.f32 %v95_v15, %v103_v18  ;;  %142 = vst.msk [vmem:[#allocation2 + $0x8] sm:$0xff] %vm18_vm2, %v103_v18  ;;  %121 = vperm.xlu1 %185, %v103_v18  }
 0x174   :  { %v110_v31 = vmul.f32 1.442695, %v107_v19 }
 0x175   :  { %v146_v46 = vld [vmem:[#allocation2] sm:$0xff] }
 0x179   :  { %v147_v50 = vld [vmem:[#allocation2 + $0x8] sm:$0xff] }
 0x1ed   :  { %v117_v20 = vpop.permute.xlu1 %116 }
 0x1ee   :  { %v124_v21 = vsub.f32 %v84_v5, %v117_v20 }
 0x1f0   :  { %v126_v22 = vmul.f32 1.442695, %v124_v21 }
 0x1f1   :  { %v122_v23 = vpop.permute.xlu1 %121 }
 0x1f2   :  { %190 = vpow2.f32 %v126_v22  ;;  %v125_v24 = vsub.f32 %v87_v8, %v122_v23 }
 0x1f4   :  { %v128_v25 = vmul.f32 1.442695, %v125_v24 }
 0x1f6   :  { %192 = vpow2.f32 %v128_v25 }
 0x1f7   :  { %194 = vpow2.f32 %v108_v30 }
 0x1f8   :  { %196 = vpow2.f32 %v110_v31 }
 0x1fc   :  { %v191_v26 = vpop.eup %190 }
 0x1fd   :  { %v130_v27 = vsel %vm91_vm3, %v191_v26, 0.0 }
 0x1fe   :  { %131 = vadd.xlane.f32.xlu0 %v130_v27 }
 0x200   :  { %v193_v28 = vpop.eup %192 }
 0x201   :  { %v133_v29 = vsel %vm91_vm3, %v193_v28, 0.0  ;;  %v195_v32 = vpop.eup %194 }
 0x202   :  { %134 = vadd.xlane.f32.xlu1 %v133_v29  ;;  %v112_v34 = vmul.f32 %v195_v32, %v104_v33  ;;  %v197_v35 = vpop.eup %196 }
 0x203   :  { %v113_v39 = vmul.f32 %v197_v35, %v105_v37 }
 0x28b   :  { %v132_v36 = vpop.xlane.xlu0 %131 }
 0x28c   :  { %v136_v38 = vadd.f32 %v132_v36, %v112_v34 }
 0x28e   :  { %139 = vst.msk [vmem:[#allocation3] sm:$0xff] %vm18_vm2, %v136_v38 }
 0x28f   :  { %v135_v40 = vpop.xlane.xlu1 %134 }
 0x290   :  { %v137_v41 = vadd.f32 %v135_v40, %v113_v39 }
 0x292   :  { %140 = vst.msk [vmem:[#allocation3 + $0x8] sm:$0xff] %vm18_vm2, %v137_v41 }
 0x295   :  { %v148_v42 = vld [vmem:[#allocation3] sm:$0xff] }
 0x296   :  { %198 = vlog2.f32 %v148_v42 }
 0x299   :  { %v149_v43 = vld [vmem:[#allocation3 + $0x8] sm:$0xff] }
 0x29a   :  { %200 = vlog2.f32 %v149_v43 }
 0x2a0   :  { %v199_v44 = vpop.eup %198 }
 0x2a1   :  { %v151_v45 = vmul.f32 0.6931472, %v199_v44 }
 0x2a3   :  { %v154_v47 = vadd.f32 %v151_v45, %v146_v46 }
 0x2a4   :  { %v201_v48 = vpop.eup %200 }
 0x2a5   :  { %156 = vst.msk [vmem:[%s266_s3] sm:$0xff] %vm18_vm2, %v154_v47  ;;  %v153_v49 = vmul.f32 0.6931472, %v201_v48 }
 0x2a7   :  { %v155_v51 = vadd.f32 %v153_v49, %v147_v50 }
 0x2a9   :  { %157 = vst.msk [vmem:[%s266_s3 + $0x8] sm:$0xff] %vm18_vm2, %v155_v51 }

// kernel: adaptive_decoder_forward.49
= control target key start
LH: loop header
LB: loop body
LE: loop exit
PB: predicated region body
PF: predicated region fallthrough
CT: control target
= control target key end

     0   :  { %s119_s0 = inlined_call_operand.vmem [shape: f32[16,50], index: 0, kind: input, shape index: {}]   ;;  %s120_s1 = inlined_call_operand.vmem [shape: f32[16,1], index: 1, kind: input, shape index: {}]   ;;  %s121_s2 = inlined_call_operand.hbm [shape: f32[16,50], index: 2, kind: output, shape index: {}]  }
   0x1   :  { %v14_v0 = vld [vmem:[%s120_s1] sm:$0xff] }
   0x2   :  { %7 = vsyncpa [#allocation3], 0  ;;  %v76_v1 = vmov 0   ;;  %v15_v2 = vld [vmem:[%s120_s1 + $0x8] sm:$0xff]  ;;  %v12_v3 = vld [vmem:[%s119_s0] sm:$0xff]  ;;  %vm28_vm0 = vcmask 408576  }
   0x3   :  { %51 = vset.pattern.permute.xlu0 %v76_v1  ;;  %s77_s15 = smov [#allocation2]   ;;  %v13_v6 = vld [vmem:[%s119_s0 + $0x8] sm:$0xff] }
   0x4   :  { %18 = vperm.xlu0 %51, %v14_v0   ;;  %s36_s16 = sshll.u32 %s77_s15, 4  ;;  %s37_s16 = int_to_ptr.vmem [resolvable:$true] %s36_s16 }
   0x5   :  { %s52_s1 = scalar_lea.vmem %s37_s16, 256  ;;  %p57_p1 = scmp.lt.s32.totalorder %s37_s16, %s37_s16 }
   0x6   :  { %p53_p0 = scmp.ne.s32.totalorder %s37_s16, %s52_s1  ;;  %p58_p2 = scmp.lt.s32.totalorder %s52_s1, %s52_s1 }
   0x8   :  { %23 = vperm.xlu0 %51, %v15_v2   ;;  %p59_p3 = por %p58_p2, %p57_p1 }
   0xa   :  { %p60_p4 = pnand %p59_p3, %p53_p0 }
  0x83   :  { %v19_v4 = vpop.permute.xlu0 %18 }
  0x84   :  { %v26_v5 = vsub.f32 %v12_v3, %v19_v4 }
  0x86   :  { %29 = vst.msk [vmem:[#allocation2] sm:$0xff] %vm28_vm0, %v26_v5 }
  0x87   :  { %v24_v7 = vpop.permute.xlu0 %23 }
  0x88   :  { %v27_v8 = vsub.f32 %v13_v6, %v24_v7 }
  0x8a   :  { %30 = vst.msk [vmem:[#allocation2 + $0x8] sm:$0xff] %vm28_vm0, %v27_v8 }
  0x8b   :  { %63 = shalt.err (!%p60_p4)
}
  0x8c   :  { %s64_s21 = scalar_lea.hbm %s121_s2, 256 }
  0x8d   :  { %p65_p5 = scmp.ne.s32.totalorder %s121_s2, %s64_s21  ;;  %p68_p6 = scmp.lt.u32.totalorder %s64_s21, %s121_s2 }
  0x8f   :  { %p70_p7 = pnand %p68_p6, %p65_p5 }
  0x91   :  { %73 = shalt.err (!%p70_p7)
}
  0x92   :  { %s78_s25 = smov 128   ;;  %s79_s26 = smov 8  }
  0x93   :  { %42 = dma.vmem_to_hbm [thread:$0]  %s37_s16, 256, %s121_s2, [#allocation3], %s78_s25, %s78_s25, %s79_s26  }
  0x94   :  { %74 = dma.done.wait [#allocation3], 256  }
  0x95   :  { %75 = vsyncadd [#allocation3], 4294967040 }
  0x96   :  { %46 = vsyncpa [#allocation3], 1 }

</bundles_post_ra>
